<compile_context>
chip_gen: v7x
topology: tpu7x:2x2x1
jax: 0.10.0
libtpu: 0.0.40
codegen_flags: <defaults>
</compile_context>

<pallas_src>
import functools

import jax
import jax.numpy as jnp
from jax.experimental import pallas as pl
from jax.experimental.pallas import tpu as pltpu

BN_EPS = 1e-5


# --------------------------------------------------------------------------- Pallas kernel
def _tap_matmul_kernel(x_ref, w_ref, s_ref, o_ref, *, taps, cin, m, n_phases, relu):
    """Fused multi-tap conv-as-matmul.

    x_ref : (1, CinT, L)        bf16  flattened (row-major) padded image for this batch elem
    w_ref : (T, Cout, Cin)      bf16  per-tap folded weight matrices
    s_ref : (Cout, 1)           f32   folded bias + BN shift
    o_ref : (1, P, Cout, M)           lane-dense output (M = rows * padded_width)

    taps  : static tuple of (phase, channel_offset, flat_offset)
    """
    shift = s_ref[...]                                     # (Cout, 1) f32
    for p in range(n_phases):
        acc = None
        for t, (tp, c0, off) in enumerate(taps):
            if tp != p:
                continue
            rhs = x_ref[0, c0:c0 + cin, off:off + m]       # (Cin, M) bf16, contiguous lane slice
            part = jnp.dot(w_ref[t], rhs, preferred_element_type=jnp.float32)
            acc = part if acc is None else acc + part
        acc = acc + shift                                  # f32
        if relu:
            acc = jnp.maximum(acc, 0.0)
        o_ref[0, p] = acc.astype(o_ref.dtype)


def tap_conv(x_flat, w_taps, shift, *, taps, cin, m, n_phases, relu, out_dtype):
    """One pallas_call per layer: grid over the batch, parallel across TensorCores."""
    N, cin_total, L = x_flat.shape
    T, cout, cin_w = w_taps.shape
    assert cin_w == cin and len(taps) == T

    x_flat = x_flat.astype(jnp.bfloat16)
    w_taps = w_taps.astype(jnp.bfloat16)
    shift = shift.reshape(cout, 1).astype(jnp.float32)

    kernel = functools.partial(
        _tap_matmul_kernel, taps=tuple(taps), cin=cin, m=m,
        n_phases=n_phases, relu=relu)

    return pl.pallas_call(
        kernel,
        out_shape=jax.ShapeDtypeStruct((N, n_phases, cout, m), out_dtype),
        grid=(N,),
        in_specs=[
            pl.BlockSpec((1, cin_total, L), lambda n: (n, 0, 0)),
            pl.BlockSpec((T, cout, cin), lambda n: (0, 0, 0)),
            pl.BlockSpec((cout, 1), lambda n: (0, 0)),
        ],
        out_specs=pl.BlockSpec((1, n_phases, cout, m), lambda n: (n, 0, 0, 0)),
        compiler_params=pltpu.CompilerParams(
            dimension_semantics=("parallel",)),
    )(x_flat, w_taps, shift)


# --------------------------------------------------------------------------- folding helpers
def _fold_conv_bn(w, b, bn):
    """Fold bias + inference BatchNorm into (scaled weight, per-channel shift)."""
    if bn is None:
        return w, b
    scale = bn['gamma'] * jax.lax.rsqrt(bn['var'] + BN_EPS)
    shift = b * scale + (bn['beta'] - bn['mean'] * scale)
    return w * scale[:, None, None, None], shift


# --------------------------------------------------------------------------- layer wrappers
def conv_block(x, p, *, stride, relu=True, out_dtype=jnp.bfloat16):
    """Conv(k3, pad=k//2, stride) [+BN] [+ReLU].   x: (N, Cin, H, W)."""
    N, cin, H, W = x.shape
    w = p['w']                                   # (Cout, Cin, K, K)  PyTorch Conv2d layout
    cout, _, K, _ = w.shape
    pad = K // 2
    bn = p if 'gamma' in p else None
    w_f, shift = _fold_conv_bn(w, p['b'], bn)

    xp = jnp.pad(x, ((0, 0), (0, 0), (pad, pad), (pad, pad)))
    Hp, Wp = H + 2 * pad, W + 2 * pad

    if stride == 1:
        ho, wo = H, W
        hs, ws = Hp, Wp
        x_src = xp
        # (kh, kw, channel_offset, dh, dw)
        tap_geo = [(kh, kw, 0, kh, kw) for kh in range(K) for kw in range(K)]
    else:
        s = stride
        assert Hp % s == 0 and Wp % s == 0, \
            "phase decomposition needs padded size divisible by stride"
        ho = (Hp - K) // s + 1
        wo = (Wp - K) // s + 1
        hs, ws = Hp // s, Wp // s
        # stack the s*s sub-pixel phases of the padded input along the channel axis
        x_src = jnp.concatenate(
            [xp[:, :, a::s, bb::s] for a in range(s) for bb in range(s)], axis=1)
        tap_geo = [(kh, kw, ((kh % s) * s + (kw % s)) * cin, kh // s, kw // s)
                   for kh in range(K) for kw in range(K)]

    m = ho * ws
    taps = tuple((0, c0, dh * ws + dw) for (_, _, c0, dh, dw) in tap_geo)
    w_taps = jnp.stack([w_f[:, :, kh, kw] for (kh, kw, _, _, _) in tap_geo], axis=0)

    x_flat = x_src.reshape(N, x_src.shape[1], hs * ws)
    need = max(off + m for (_, _, off) in taps)
    extra = max(0, need - hs * ws)               # keep the last tap's slice in-bounds
    if extra:
        x_flat = jnp.pad(x_flat, ((0, 0), (0, 0), (0, extra)))

    out = tap_conv(x_flat, w_taps, shift, taps=taps, cin=cin, m=m,
                   n_phases=1, relu=relu, out_dtype=out_dtype)     # (N, 1, Cout, ho*ws)
    return out.reshape(N, cout, ho, ws)[:, :, :, :wo]              # drop halo columns


def deconv_block(x, p, *, stride, out_dtype=jnp.bfloat16):
    """ConvTranspose(k=3, stride=2, padding=1, output_padding=1) + BN + ReLU,
    computed by sub-pixel phase decomposition (4 small stride-1 convs on the
    un-dilated input, outputs interleaved).  x: (N, Cin, H, W) -> (N, Cout, 2H, 2W)."""
    N, cin, H, W = x.shape
    w_t = p['w']                                  # (Cin, Cout, K, K) ConvTranspose2d layout
    cout = w_t.shape[1]
    K = w_t.shape[-1]
    # TODO(synk): phase decomposition implemented for kernel_size=3 / stride=2 only.
    assert stride == 2 and K == 3

    scale = p['gamma'] * jax.lax.rsqrt(p['var'] + BN_EPS)
    shift = p['b'] * scale + (p['beta'] - p['mean'] * scale)

    xp = jnp.pad(x, ((0, 0), (0, 0), (0, 1), (0, 1)))   # taps reference x[i+1]/x[j+1] (zeros)
    hs, ws = H + 1, W + 1
    m = H * ws

    # 1-D decomposition: out[2i]   = w_t[1] * x[i]
    #                    out[2i+1] = w_t[2] * x[i] + w_t[0] * x[i+1]
    def taps_1d(par):
        return [(1, 0)] if par == 0 else [(2, 0), (0, 1)]   # (w_t kernel index, src offset)

    taps, w_list = [], []
    for r in range(2):
        for c in range(2):
            ph = r * 2 + c
            for kh, dh in taps_1d(r):
                for kw, dw in taps_1d(c):
                    taps.append((ph, 0, dh * ws + dw))
                    w_list.append(w_t[:, :, kh, kw].T * scale[:, None])   # (Cout, Cin)
    w_taps = jnp.stack(w_list, axis=0)

    x_flat = xp.reshape(N, cin, hs * ws)
    need = max(off + m for (_, _, off) in taps)
    extra = max(0, need - hs * ws)
    if extra:
        x_flat = jnp.pad(x_flat, ((0, 0), (0, 0), (0, extra)))

    out = tap_conv(x_flat, w_taps, shift, taps=tuple(taps), cin=cin, m=m,
                   n_phases=4, relu=True, out_dtype=out_dtype)     # (N, 4, Cout, H*ws)
    out = out.reshape(N, 2, 2, cout, H, ws)[..., :W]               # drop halo columns
    out = jnp.transpose(out, (0, 3, 4, 1, 5, 2))                   # (N, Cout, H, 2, W, 2)
    return out.reshape(N, cout, 2 * H, 2 * W)


# --------------------------------------------------------------------------- parameters
def _bn_params(keys, c):
    k3, k4, k5, k6 = keys
    return dict(
        gamma=1.0 + 0.1 * jax.random.normal(k3, (c,), jnp.float32),
        beta=0.1 * jax.random.normal(k4, (c,), jnp.float32),
        mean=0.1 * jax.random.normal(k5, (c,), jnp.float32),
        var=1.0 + 0.1 * jnp.abs(jax.random.normal(k6, (c,), jnp.float32)),
    )


def make_conv_block(key, cin, cout, k=3, with_bn=True):
    ks = jax.random.split(key, 6)
    p = dict(
        w=0.1 * jax.random.normal(ks[0], (cout, cin, k, k), jnp.float32),
        b=0.05 * jax.random.normal(ks[1], (cout,), jnp.float32),
    )
    if with_bn:
        p.update(_bn_params(ks[2:6], cout))
    return p


def make_deconv_block(key, cin, cout, k=3):
    ks = jax.random.split(key, 6)
    p = dict(
        w=0.1 * jax.random.normal(ks[0], (cin, cout, k, k), jnp.float32),
        b=0.05 * jax.random.normal(ks[1], (cout,), jnp.float32),
    )
    p.update(_bn_params(ks[2:6], cout))
    return p


def build_unet_params(key, input_channels, channels, output_channels):
    out_init = channels[0] // 2
    keys = jax.random.split(key, 4 + 3 * len(channels))
    it = iter(keys)

    params = {}
    params['init'] = make_conv_block(next(it), input_channels, out_init)

    downs = []
    cin = out_init
    for c in channels:
        downs.append(make_conv_block(next(it), cin, c))
        cin = c
    params['downs'] = downs

    # middle = LatentConv with latent_channels=None -> plain conv block
    params['middle'] = make_conv_block(next(it), channels[-1], channels[-1])

    ups = []
    cin = channels[-1]
    for i in range(len(channels)):
        skip_c = out_init if i + 1 == len(channels) else channels[-(i + 2)]
        out_c = skip_c
        ups.append(dict(
            deconv=make_deconv_block(next(it), cin, out_c),
            conv=make_conv_block(next(it), skip_c + out_c, out_c),
        ))
        cin = out_c
    params['ups'] = ups

    params['output'] = make_conv_block(next(it), out_init, output_channels, with_bn=False)
    return params


# --------------------------------------------------------------------------- UNetBase forward
def unet_forward(params, x_nchw, strides):
    x = x_nchw.astype(jnp.bfloat16)                       # activations kept bf16 between layers

    prev = conv_block(x, params['init'], stride=1)
    skips = [prev]
    for p, s in zip(params['downs'], strides):
        prev = conv_block(prev, p, stride=s)
        skips.append(prev)

    # TODO(synk): latent-variable concat + linear-upsample path of LatentConv is not
    #             exercised because latent_channels=None in this configuration.
    prev = conv_block(skips[-1], params['middle'], stride=1)

    n = len(strides)
    for i, (skip, up_p) in enumerate(zip(reversed(skips[:-1]), params['ups'])):
        s = strides[n - 1 - i]
        up = deconv_block(prev, up_p['deconv'], stride=s)
        cat = jnp.concatenate([skip, up], axis=1)          # torch.cat([skip, x], dim=1)
        prev = conv_block(cat, up_p['conv'], stride=1)

    return conv_block(prev, params['output'], stride=1, relu=False, out_dtype=jnp.float32)


# --------------------------------------------------------------------------- main
if __name__ == "__main__":
    key = jax.random.PRNGKey(0)
    k_params, k_x = jax.random.split(key)

    batch, input_channels, spatial = 2, 4, 16
    channels = [8, 16]
    output_channels = 3
    strides = (2, 2)

    params = build_unet_params(k_params, input_channels, channels, output_channels)
    x = jax.random.normal(k_x, (batch, input_channels, spatial, spatial), jnp.float32)

    fwd = jax.jit(functools.partial(unet_forward, strides=strides))
    out = fwd(params, x)
    jax.block_until_ready(out)

    assert out.shape == (batch, output_channels, spatial, spatial), out.shape
    assert out.dtype == jnp.float32
    print("KERNEL_OK")
</pallas_src>

<mosaic_0001>
module attributes {stable_mosaic.version = 11 : i64} {
  func.func @_tap_matmul_kernel(%arg0: i32, %arg1: memref<1x4x326xbf16, #tpu.memory_space<vmem>>, %arg2: memref<9x4x4xbf16, #tpu.memory_space<vmem>>, %arg3: memref<4x1xf32, #tpu.memory_space<vmem>>, %arg4: memref<1x1x4x288xbf16, #tpu.memory_space<vmem>>) attributes {dimension_semantics = [#tpu.dimension_semantics<parallel>], iteration_bounds = array<i64: 2>, scalar_prefetch = 0 : i64, scratch_operands = 0 : i64, tpu.core_type = #tpu.core_type<tc>, window_params = [{transform_indices = @transform_0, window_bounds = array<i64: 1, 4, 326>}, {pipeline_mode = #tpu.pipeline_mode<synchronous>, transform_indices = @transform_1, window_bounds = array<i64: 9, 4, 4>}, {pipeline_mode = #tpu.pipeline_mode<synchronous>, transform_indices = @transform_2, window_bounds = array<i64: 4, 1>}, {transform_indices = @transform_3, window_bounds = array<i64: 1, 1, 4, 288>}]} {
    %c0 = arith.constant 0 : index
    %c0_0 = arith.constant 0 : index
    %0 = vector.load %arg3[%c0, %c0_0] : memref<4x1xf32, #tpu.memory_space<vmem>>, vector<4x1xf32>
    %c0_1 = arith.constant 0 : index
    %c0_2 = arith.constant 0 : index
    %c0_3 = arith.constant 0 : index
    %1 = vector.load %arg1[%c0_1, %c0_2, %c0_3] : memref<1x4x326xbf16, #tpu.memory_space<vmem>>, vector<1x4x288xbf16>
    %2 = vector.shape_cast %1 : vector<1x4x288xbf16> to vector<4x288xbf16>
    %c0_4 = arith.constant 0 : index
    %c0_5 = arith.constant 0 : index
    %c0_6 = arith.constant 0 : index
    %3 = vector.load %arg2[%c0_4, %c0_5, %c0_6] : memref<9x4x4xbf16, #tpu.memory_space<vmem>>, vector<1x4x4xbf16>
    %4 = vector.shape_cast %3 : vector<1x4x4xbf16> to vector<4x4xbf16>
    %cst = arith.constant dense<0.000000e+00> : vector<4x288xf32>
    %5 = tpu.matmul %4, %2, %cst {dimension_numbers = #tpu.dot_dimension_numbers<[1], [0], [0], [1], [0, 0, 1, 1], [], []>} : vector<4x4xbf16>, vector<4x288xbf16>, vector<4x288xf32> -> vector<4x288xf32>
    %c0_7 = arith.constant 0 : index
    %c0_8 = arith.constant 0 : index
    %c1 = arith.constant 1 : index
    %6 = vector.load %arg1[%c0_7, %c0_8, %c1] : memref<1x4x326xbf16, #tpu.memory_space<vmem>>, vector<1x4x288xbf16>
    %7 = vector.shape_cast %6 : vector<1x4x288xbf16> to vector<4x288xbf16>
    %c1_9 = arith.constant 1 : index
    %c0_10 = arith.constant 0 : index
    %c0_11 = arith.constant 0 : index
    %8 = vector.load %arg2[%c1_9, %c0_10, %c0_11] : memref<9x4x4xbf16, #tpu.memory_space<vmem>>, vector<1x4x4xbf16>
    %9 = vector.shape_cast %8 : vector<1x4x4xbf16> to vector<4x4xbf16>
    %cst_12 = arith.constant dense<0.000000e+00> : vector<4x288xf32>
    %10 = tpu.matmul %9, %7, %cst_12 {dimension_numbers = #tpu.dot_dimension_numbers<[1], [0], [0], [1], [0, 0, 1, 1], [], []>} : vector<4x4xbf16>, vector<4x288xbf16>, vector<4x288xf32> -> vector<4x288xf32>
    %11 = arith.addf %5, %10 : vector<4x288xf32>
    %c0_13 = arith.constant 0 : index
    %c0_14 = arith.constant 0 : index
    %c2 = arith.constant 2 : index
    %12 = vector.load %arg1[%c0_13, %c0_14, %c2] : memref<1x4x326xbf16, #tpu.memory_space<vmem>>, vector<1x4x288xbf16>
    %13 = vector.shape_cast %12 : vector<1x4x288xbf16> to vector<4x288xbf16>
    %c2_15 = arith.constant 2 : index
    %c0_16 = arith.constant 0 : index
    %c0_17 = arith.constant 0 : index
    %14 = vector.load %arg2[%c2_15, %c0_16, %c0_17] : memref<9x4x4xbf16, #tpu.memory_space<vmem>>, vector<1x4x4xbf16>
    %15 = vector.shape_cast %14 : vector<1x4x4xbf16> to vector<4x4xbf16>
    %cst_18 = arith.constant dense<0.000000e+00> : vector<4x288xf32>
    %16 = tpu.matmul %15, %13, %cst_18 {dimension_numbers = #tpu.dot_dimension_numbers<[1], [0], [0], [1], [0, 0, 1, 1], [], []>} : vector<4x4xbf16>, vector<4x288xbf16>, vector<4x288xf32> -> vector<4x288xf32>
    %17 = arith.addf %11, %16 : vector<4x288xf32>
    %c0_19 = arith.constant 0 : index
    %c0_20 = arith.constant 0 : index
    %c18 = arith.constant 18 : index
    %18 = vector.load %arg1[%c0_19, %c0_20, %c18] : memref<1x4x326xbf16, #tpu.memory_space<vmem>>, vector<1x4x288xbf16>
    %19 = vector.shape_cast %18 : vector<1x4x288xbf16> to vector<4x288xbf16>
    %c3 = arith.constant 3 : index
    %c0_21 = arith.constant 0 : index
    %c0_22 = arith.constant 0 : index
    %20 = vector.load %arg2[%c3, %c0_21, %c0_22] : memref<9x4x4xbf16, #tpu.memory_space<vmem>>, vector<1x4x4xbf16>
    %21 = vector.shape_cast %20 : vector<1x4x4xbf16> to vector<4x4xbf16>
    %cst_23 = arith.constant dense<0.000000e+00> : vector<4x288xf32>
    %22 = tpu.matmul %21, %19, %cst_23 {dimension_numbers = #tpu.dot_dimension_numbers<[1], [0], [0], [1], [0, 0, 1, 1], [], []>} : vector<4x4xbf16>, vector<4x288xbf16>, vector<4x288xf32> -> vector<4x288xf32>
    %23 = arith.addf %17, %22 : vector<4x288xf32>
    %c0_24 = arith.constant 0 : index
    %c0_25 = arith.constant 0 : index
    %c19 = arith.constant 19 : index
    %24 = vector.load %arg1[%c0_24, %c0_25, %c19] : memref<1x4x326xbf16, #tpu.memory_space<vmem>>, vector<1x4x288xbf16>
    %25 = vector.shape_cast %24 : vector<1x4x288xbf16> to vector<4x288xbf16>
    %c4 = arith.constant 4 : index
    %c0_26 = arith.constant 0 : index
    %c0_27 = arith.constant 0 : index
    %26 = vector.load %arg2[%c4, %c0_26, %c0_27] : memref<9x4x4xbf16, #tpu.memory_space<vmem>>, vector<1x4x4xbf16>
    %27 = vector.shape_cast %26 : vector<1x4x4xbf16> to vector<4x4xbf16>
    %cst_28 = arith.constant dense<0.000000e+00> : vector<4x288xf32>
    %28 = tpu.matmul %27, %25, %cst_28 {dimension_numbers = #tpu.dot_dimension_numbers<[1], [0], [0], [1], [0, 0, 1, 1], [], []>} : vector<4x4xbf16>, vector<4x288xbf16>, vector<4x288xf32> -> vector<4x288xf32>
    %29 = arith.addf %23, %28 : vector<4x288xf32>
    %c0_29 = arith.constant 0 : index
    %c0_30 = arith.constant 0 : index
    %c20 = arith.constant 20 : index
    %30 = vector.load %arg1[%c0_29, %c0_30, %c20] : memref<1x4x326xbf16, #tpu.memory_space<vmem>>, vector<1x4x288xbf16>
    %31 = vector.shape_cast %30 : vector<1x4x288xbf16> to vector<4x288xbf16>
    %c5 = arith.constant 5 : index
    %c0_31 = arith.constant 0 : index
    %c0_32 = arith.constant 0 : index
    %32 = vector.load %arg2[%c5, %c0_31, %c0_32] : memref<9x4x4xbf16, #tpu.memory_space<vmem>>, vector<1x4x4xbf16>
    %33 = vector.shape_cast %32 : vector<1x4x4xbf16> to vector<4x4xbf16>
    %cst_33 = arith.constant dense<0.000000e+00> : vector<4x288xf32>
    %34 = tpu.matmul %33, %31, %cst_33 {dimension_numbers = #tpu.dot_dimension_numbers<[1], [0], [0], [1], [0, 0, 1, 1], [], []>} : vector<4x4xbf16>, vector<4x288xbf16>, vector<4x288xf32> -> vector<4x288xf32>
    %35 = arith.addf %29, %34 : vector<4x288xf32>
    %c0_34 = arith.constant 0 : index
    %c0_35 = arith.constant 0 : index
    %c36 = arith.constant 36 : index
    %36 = vector.load %arg1[%c0_34, %c0_35, %c36] : memref<1x4x326xbf16, #tpu.memory_space<vmem>>, vector<1x4x288xbf16>
    %37 = vector.shape_cast %36 : vector<1x4x288xbf16> to vector<4x288xbf16>
    %c6 = arith.constant 6 : index
    %c0_36 = arith.constant 0 : index
    %c0_37 = arith.constant 0 : index
    %38 = vector.load %arg2[%c6, %c0_36, %c0_37] : memref<9x4x4xbf16, #tpu.memory_space<vmem>>, vector<1x4x4xbf16>
    %39 = vector.shape_cast %38 : vector<1x4x4xbf16> to vector<4x4xbf16>
    %cst_38 = arith.constant dense<0.000000e+00> : vector<4x288xf32>
    %40 = tpu.matmul %39, %37, %cst_38 {dimension_numbers = #tpu.dot_dimension_numbers<[1], [0], [0], [1], [0, 0, 1, 1], [], []>} : vector<4x4xbf16>, vector<4x288xbf16>, vector<4x288xf32> -> vector<4x288xf32>
    %41 = arith.addf %35, %40 : vector<4x288xf32>
    %c0_39 = arith.constant 0 : index
    %c0_40 = arith.constant 0 : index
    %c37 = arith.constant 37 : index
    %42 = vector.load %arg1[%c0_39, %c0_40, %c37] : memref<1x4x326xbf16, #tpu.memory_space<vmem>>, vector<1x4x288xbf16>
    %43 = vector.shape_cast %42 : vector<1x4x288xbf16> to vector<4x288xbf16>
    %c7 = arith.constant 7 : index
    %c0_41 = arith.constant 0 : index
    %c0_42 = arith.constant 0 : index
    %44 = vector.load %arg2[%c7, %c0_41, %c0_42] : memref<9x4x4xbf16, #tpu.memory_space<vmem>>, vector<1x4x4xbf16>
    %45 = vector.shape_cast %44 : vector<1x4x4xbf16> to vector<4x4xbf16>
    %cst_43 = arith.constant dense<0.000000e+00> : vector<4x288xf32>
    %46 = tpu.matmul %45, %43, %cst_43 {dimension_numbers = #tpu.dot_dimension_numbers<[1], [0], [0], [1], [0, 0, 1, 1], [], []>} : vector<4x4xbf16>, vector<4x288xbf16>, vector<4x288xf32> -> vector<4x288xf32>
    %47 = arith.addf %41, %46 : vector<4x288xf32>
    %c0_44 = arith.constant 0 : index
    %c0_45 = arith.constant 0 : index
    %c38 = arith.constant 38 : index
    %48 = vector.load %arg1[%c0_44, %c0_45, %c38] : memref<1x4x326xbf16, #tpu.memory_space<vmem>>, vector<1x4x288xbf16>
    %49 = vector.shape_cast %48 : vector<1x4x288xbf16> to vector<4x288xbf16>
    %c8 = arith.constant 8 : index
    %c0_46 = arith.constant 0 : index
    %c0_47 = arith.constant 0 : index
    %50 = vector.load %arg2[%c8, %c0_46, %c0_47] : memref<9x4x4xbf16, #tpu.memory_space<vmem>>, vector<1x4x4xbf16>
    %51 = vector.shape_cast %50 : vector<1x4x4xbf16> to vector<4x4xbf16>
    %cst_48 = arith.constant dense<0.000000e+00> : vector<4x288xf32>
    %52 = tpu.matmul %51, %49, %cst_48 {dimension_numbers = #tpu.dot_dimension_numbers<[1], [0], [0], [1], [0, 0, 1, 1], [], []>} : vector<4x4xbf16>, vector<4x288xbf16>, vector<4x288xf32> -> vector<4x288xf32>
    %53 = arith.addf %47, %52 : vector<4x288xf32>
    %54 = vector.broadcast %0 : vector<4x1xf32> to vector<4x288xf32>
    %55 = arith.addf %53, %54 : vector<4x288xf32>
    %cst_49 = arith.constant 0.000000e+00 : f32
    %56 = vector.broadcast %cst_49 : f32 to vector<4x288xf32>
    %57 = arith.maximumf %55, %56 : vector<4x288xf32>
    %58 = arith.truncf %57 : vector<4x288xf32> to vector<4x288xbf16>
    %c0_50 = arith.constant 0 : index
    %c0_51 = arith.constant 0 : index
    %c0_52 = arith.constant 0 : index
    %c0_53 = arith.constant 0 : index
    %59 = vector.load %arg4[%c0_50, %c0_51, %c0_52, %c0_53] : memref<1x1x4x288xbf16, #tpu.memory_space<vmem>>, vector<1x1x4x288xbf16>
    %60 = vector.shape_cast %59 : vector<1x1x4x288xbf16> to vector<4x288xbf16>
    %61 = vector.shape_cast %58 : vector<4x288xbf16> to vector<1x1x4x288xbf16>
    tpu.vector_store %arg4[%c0_50, %c0_51, %c0_52, %c0_53], %61 {strides = array<i32>} : memref<1x1x4x288xbf16, #tpu.memory_space<vmem>>, vector<1x1x4x288xbf16>,
    return
  }
  func.func @transform_0(%arg0: i32) -> (i32, i32, i32) {
    %c0_i32 = arith.constant 0 : i32
    %c0_i32_0 = arith.constant 0 : i32
    %c0_i32_1 = arith.constant 0 : i32
    return %arg0, %c0_i32, %c0_i32_0 : i32, i32, i32
  }
  func.func @transform_1(%arg0: i32) -> (i32, i32, i32) {
    %c0_i32 = arith.constant 0 : i32
    %c0_i32_0 = arith.constant 0 : i32
    %c0_i32_1 = arith.constant 0 : i32
    %c0_i32_2 = arith.constant 0 : i32
    return %c0_i32, %c0_i32_0, %c0_i32_1 : i32, i32, i32
  }
  func.func @transform_2(%arg0: i32) -> (i32, i32) {
    %c0_i32 = arith.constant 0 : i32
    %c0_i32_0 = arith.constant 0 : i32
    %c0_i32_1 = arith.constant 0 : i32
    return %c0_i32, %c0_i32_0 : i32, i32
  }
  func.func @transform_3(%arg0: i32) -> (i32, i32, i32, i32) {
    %c0_i32 = arith.constant 0 : i32
    %c0_i32_0 = arith.constant 0 : i32
    %c0_i32_1 = arith.constant 0 : i32
    %c0_i32_2 = arith.constant 0 : i32
    return %arg0, %c0_i32, %c0_i32_0, %c0_i32_1 : i32, i32, i32, i32
  }
}

module attributes {stable_mosaic.version = 11 : i64} {
  func.func @_tap_matmul_kernel(%arg0: i32, %arg1: memref<1x16x82xbf16, #tpu.memory_space<vmem>>, %arg2: memref<9x8x4xbf16, #tpu.memory_space<vmem>>, %arg3: memref<8x1xf32, #tpu.memory_space<vmem>>, %arg4: memref<1x1x8x72xbf16, #tpu.memory_space<vmem>>) attributes {dimension_semantics = [#tpu.dimension_semantics<parallel>], iteration_bounds = array<i64: 2>, scalar_prefetch = 0 : i64, scratch_operands = 0 : i64, tpu.core_type = #tpu.core_type<tc>, window_params = [{transform_indices = @transform_0, window_bounds = array<i64: 1, 16, 82>}, {pipeline_mode = #tpu.pipeline_mode<synchronous>, transform_indices = @transform_1, window_bounds = array<i64: 9, 8, 4>}, {pipeline_mode = #tpu.pipeline_mode<synchronous>, transform_indices = @transform_2, window_bounds = array<i64: 8, 1>}, {transform_indices = @transform_3, window_bounds = array<i64: 1, 1, 8, 72>}]} {
    %c0 = arith.constant 0 : index
    %c0_0 = arith.constant 0 : index
    %0 = vector.load %arg3[%c0, %c0_0] : memref<8x1xf32, #tpu.memory_space<vmem>>, vector<8x1xf32>
    %c0_1 = arith.constant 0 : index
    %c0_2 = arith.constant 0 : index
    %c0_3 = arith.constant 0 : index
    %1 = vector.load %arg1[%c0_1, %c0_2, %c0_3] : memref<1x16x82xbf16, #tpu.memory_space<vmem>>, vector<1x4x72xbf16>
    %2 = vector.shape_cast %1 : vector<1x4x72xbf16> to vector<4x72xbf16>
    %c0_4 = arith.constant 0 : index
    %c0_5 = arith.constant 0 : index
    %c0_6 = arith.constant 0 : index
    %3 = vector.load %arg2[%c0_4, %c0_5, %c0_6] : memref<9x8x4xbf16, #tpu.memory_space<vmem>>, vector<1x8x4xbf16>
    %4 = vector.shape_cast %3 : vector<1x8x4xbf16> to vector<8x4xbf16>
    %cst = arith.constant dense<0.000000e+00> : vector<8x72xf32>
    %5 = tpu.matmul %4, %2, %cst {dimension_numbers = #tpu.dot_dimension_numbers<[1], [0], [0], [1], [0, 0, 1, 1], [], []>} : vector<8x4xbf16>, vector<4x72xbf16>, vector<8x72xf32> -> vector<8x72xf32>
    %c0_7 = arith.constant 0 : index
    %c4 = arith.constant 4 : index
    %c0_8 = arith.constant 0 : index
    %6 = vector.load %arg1[%c0_7, %c4, %c0_8] : memref<1x16x82xbf16, #tpu.memory_space<vmem>>, vector<1x4x72xbf16>
    %7 = vector.shape_cast %6 : vector<1x4x72xbf16> to vector<4x72xbf16>
    %c1 = arith.constant 1 : index
    %c0_9 = arith.constant 0 : index
    %c0_10 = arith.constant 0 : index
    %8 = vector.load %arg2[%c1, %c0_9, %c0_10] : memref<9x8x4xbf16, #tpu.memory_space<vmem>>, vector<1x8x4xbf16>
    %9 = vector.shape_cast %8 : vector<1x8x4xbf16> to vector<8x4xbf16>
    %cst_11 = arith.constant dense<0.000000e+00> : vector<8x72xf32>
    %10 = tpu.matmul %9, %7, %cst_11 {dimension_numbers = #tpu.dot_dimension_numbers<[1], [0], [0], [1], [0, 0, 1, 1], [], []>} : vector<8x4xbf16>, vector<4x72xbf16>, vector<8x72xf32> -> vector<8x72xf32>
    %11 = arith.addf %5, %10 : vector<8x72xf32>
    %c0_12 = arith.constant 0 : index
    %c0_13 = arith.constant 0 : index
    %c1_14 = arith.constant 1 : index
    %12 = vector.load %arg1[%c0_12, %c0_13, %c1_14] : memref<1x16x82xbf16, #tpu.memory_space<vmem>>, vector<1x4x72xbf16>
    %13 = vector.shape_cast %12 : vector<1x4x72xbf16> to vector<4x72xbf16>
    %c2 = arith.constant 2 : index
    %c0_15 = arith.constant 0 : index
    %c0_16 = arith.constant 0 : index
    %14 = vector.load %arg2[%c2, %c0_15, %c0_16] : memref<9x8x4xbf16, #tpu.memory_space<vmem>>, vector<1x8x4xbf16>
    %15 = vector.shape_cast %14 : vector<1x8x4xbf16> to vector<8x4xbf16>
    %cst_17 = arith.constant dense<0.000000e+00> : vector<8x72xf32>
    %16 = tpu.matmul %15, %13, %cst_17 {dimension_numbers = #tpu.dot_dimension_numbers<[1], [0], [0], [1], [0, 0, 1, 1], [], []>} : vector<8x4xbf16>, vector<4x72xbf16>, vector<8x72xf32> -> vector<8x72xf32>
    %17 = arith.addf %11, %16 : vector<8x72xf32>
    %c0_18 = arith.constant 0 : index
    %c8 = arith.constant 8 : index
    %c0_19 = arith.constant 0 : index
    %18 = vector.load %arg1[%c0_18, %c8, %c0_19] : memref<1x16x82xbf16, #tpu.memory_space<vmem>>, vector<1x4x72xbf16>
    %19 = vector.shape_cast %18 : vector<1x4x72xbf16> to vector<4x72xbf16>
    %c3 = arith.constant 3 : index
    %c0_20 = arith.constant 0 : index
    %c0_21 = arith.constant 0 : index
    %20 = vector.load %arg2[%c3, %c0_20, %c0_21] : memref<9x8x4xbf16, #tpu.memory_space<vmem>>, vector<1x8x4xbf16>
    %21 = vector.shape_cast %20 : vector<1x8x4xbf16> to vector<8x4xbf16>
    %cst_22 = arith.constant dense<0.000000e+00> : vector<8x72xf32>
    %22 = tpu.matmul %21, %19, %cst_22 {dimension_numbers = #tpu.dot_dimension_numbers<[1], [0], [0], [1], [0, 0, 1, 1], [], []>} : vector<8x4xbf16>, vector<4x72xbf16>, vector<8x72xf32> -> vector<8x72xf32>
    %23 = arith.addf %17, %22 : vector<8x72xf32>
    %c0_23 = arith.constant 0 : index
    %c12 = arith.constant 12 : index
    %c0_24 = arith.constant 0 : index
    %24 = vector.load %arg1[%c0_23, %c12, %c0_24] : memref<1x16x82xbf16, #tpu.memory_space<vmem>>, vector<1x4x72xbf16>
    %25 = vector.shape_cast %24 : vector<1x4x72xbf16> to vector<4x72xbf16>
    %c4_25 = arith.constant 4 : index
    %c0_26 = arith.constant 0 : index
    %c0_27 = arith.constant 0 : index
    %26 = vector.load %arg2[%c4_25, %c0_26, %c0_27] : memref<9x8x4xbf16, #tpu.memory_space<vmem>>, vector<1x8x4xbf16>
    %27 = vector.shape_cast %26 : vector<1x8x4xbf16> to vector<8x4xbf16>
    %cst_28 = arith.constant dense<0.000000e+00> : vector<8x72xf32>
    %28 = tpu.matmul %27, %25, %cst_28 {dimension_numbers = #tpu.dot_dimension_numbers<[1], [0], [0], [1], [0, 0, 1, 1], [], []>} : vector<8x4xbf16>, vector<4x72xbf16>, vector<8x72xf32> -> vector<8x72xf32>
    %29 = arith.addf %23, %28 : vector<8x72xf32>
    %c0_29 = arith.constant 0 : index
    %c8_30 = arith.constant 8 : index
    %c1_31 = arith.constant 1 : index
    %30 = vector.load %arg1[%c0_29, %c8_30, %c1_31] : memref<1x16x82xbf16, #tpu.memory_space<vmem>>, vector<1x4x72xbf16>
    %31 = vector.shape_cast %30 : vector<1x4x72xbf16> to vector<4x72xbf16>
    %c5 = arith.constant 5 : index
    %c0_32 = arith.constant 0 : index
    %c0_33 = arith.constant 0 : index
    %32 = vector.load %arg2[%c5, %c0_32, %c0_33] : memref<9x8x4xbf16, #tpu.memory_space<vmem>>, vector<1x8x4xbf16>
    %33 = vector.shape_cast %32 : vector<1x8x4xbf16> to vector<8x4xbf16>
    %cst_34 = arith.constant dense<0.000000e+00> : vector<8x72xf32>
    %34 = tpu.matmul %33, %31, %cst_34 {dimension_numbers = #tpu.dot_dimension_numbers<[1], [0], [0], [1], [0, 0, 1, 1], [], []>} : vector<8x4xbf16>, vector<4x72xbf16>, vector<8x72xf32> -> vector<8x72xf32>
    %35 = arith.addf %29, %34 : vector<8x72xf32>
    %c0_35 = arith.constant 0 : index
    %c0_36 = arith.constant 0 : index
    %c9 = arith.constant 9 : index
    %36 = vector.load %arg1[%c0_35, %c0_36, %c9] : memref<1x16x82xbf16, #tpu.memory_space<vmem>>, vector<1x4x72xbf16>
    %37 = vector.shape_cast %36 : vector<1x4x72xbf16> to vector<4x72xbf16>
    %c6 = arith.constant 6 : index
    %c0_37 = arith.constant 0 : index
    %c0_38 = arith.constant 0 : index
    %38 = vector.load %arg2[%c6, %c0_37, %c0_38] : memref<9x8x4xbf16, #tpu.memory_space<vmem>>, vector<1x8x4xbf16>
    %39 = vector.shape_cast %38 : vector<1x8x4xbf16> to vector<8x4xbf16>
    %cst_39 = arith.constant dense<0.000000e+00> : vector<8x72xf32>
    %40 = tpu.matmul %39, %37, %cst_39 {dimension_numbers = #tpu.dot_dimension_numbers<[1], [0], [0], [1], [0, 0, 1, 1], [], []>} : vector<8x4xbf16>, vector<4x72xbf16>, vector<8x72xf32> -> vector<8x72xf32>
    %41 = arith.addf %35, %40 : vector<8x72xf32>
    %c0_40 = arith.constant 0 : index
    %c4_41 = arith.constant 4 : index
    %c9_42 = arith.constant 9 : index
    %42 = vector.load %arg1[%c0_40, %c4_41, %c9_42] : memref<1x16x82xbf16, #tpu.memory_space<vmem>>, vector<1x4x72xbf16>
    %43 = vector.shape_cast %42 : vector<1x4x72xbf16> to vector<4x72xbf16>
    %c7 = arith.constant 7 : index
    %c0_43 = arith.constant 0 : index
    %c0_44 = arith.constant 0 : index
    %44 = vector.load %arg2[%c7, %c0_43, %c0_44] : memref<9x8x4xbf16, #tpu.memory_space<vmem>>, vector<1x8x4xbf16>
    %45 = vector.shape_cast %44 : vector<1x8x4xbf16> to vector<8x4xbf16>
    %cst_45 = arith.constant dense<0.000000e+00> : vector<8x72xf32>
    %46 = tpu.matmul %45, %43, %cst_45 {dimension_numbers = #tpu.dot_dimension_numbers<[1], [0], [0], [1], [0, 0, 1, 1], [], []>} : vector<8x4xbf16>, vector<4x72xbf16>, vector<8x72xf32> -> vector<8x72xf32>
    %47 = arith.addf %41, %46 : vector<8x72xf32>
    %c0_46 = arith.constant 0 : index
    %c0_47 = arith.constant 0 : index
    %c10 = arith.constant 10 : index
    %48 = vector.load %arg1[%c0_46, %c0_47, %c10] : memref<1x16x82xbf16, #tpu.memory_space<vmem>>, vector<1x4x72xbf16>
    %49 = vector.shape_cast %48 : vector<1x4x72xbf16> to vector<4x72xbf16>
    %c8_48 = arith.constant 8 : index
    %c0_49 = arith.constant 0 : index
    %c0_50 = arith.constant 0 : index
    %50 = vector.load %arg2[%c8_48, %c0_49, %c0_50] : memref<9x8x4xbf16, #tpu.memory_space<vmem>>, vector<1x8x4xbf16>
    %51 = vector.shape_cast %50 : vector<1x8x4xbf16> to vector<8x4xbf16>
    %cst_51 = arith.constant dense<0.000000e+00> : vector<8x72xf32>
    %52 = tpu.matmul %51, %49, %cst_51 {dimension_numbers = #tpu.dot_dimension_numbers<[1], [0], [0], [1], [0, 0, 1, 1], [], []>} : vector<8x4xbf16>, vector<4x72xbf16>, vector<8x72xf32> -> vector<8x72xf32>
    %53 = arith.addf %47, %52 : vector<8x72xf32>
    %54 = vector.broadcast %0 : vector<8x1xf32> to vector<8x72xf32>
    %55 = arith.addf %53, %54 : vector<8x72xf32>
    %cst_52 = arith.constant 0.000000e+00 : f32
    %56 = vector.broadcast %cst_52 : f32 to vector<8x72xf32>
    %57 = arith.maximumf %55, %56 : vector<8x72xf32>
    %58 = arith.truncf %57 : vector<8x72xf32> to vector<8x72xbf16>
    %c0_53 = arith.constant 0 : index
    %c0_54 = arith.constant 0 : index
    %c0_55 = arith.constant 0 : index
    %c0_56 = arith.constant 0 : index
    %59 = vector.load %arg4[%c0_53, %c0_54, %c0_55, %c0_56] : memref<1x1x8x72xbf16, #tpu.memory_space<vmem>>, vector<1x1x8x72xbf16>
    %60 = vector.shape_cast %59 : vector<1x1x8x72xbf16> to vector<8x72xbf16>
    %61 = vector.shape_cast %58 : vector<8x72xbf16> to vector<1x1x8x72xbf16>
    tpu.vector_store %arg4[%c0_53, %c0_54, %c0_55, %c0_56], %61 {strides = array<i32>} : memref<1x1x8x72xbf16, #tpu.memory_space<vmem>>, vector<1x1x8x72xbf16>,
    return
  }
  func.func @transform_0(%arg0: i32) -> (i32, i32, i32) {
    %c0_i32 = arith.constant 0 : i32
    %c0_i32_0 = arith.constant 0 : i32
    %c0_i32_1 = arith.constant 0 : i32
    return %arg0, %c0_i32, %c0_i32_0 : i32, i32, i32
  }
  func.func @transform_1(%arg0: i32) -> (i32, i32, i32) {
    %c0_i32 = arith.constant 0 : i32
    %c0_i32_0 = arith.constant 0 : i32
    %c0_i32_1 = arith.constant 0 : i32
    %c0_i32_2 = arith.constant 0 : i32
    return %c0_i32, %c0_i32_0, %c0_i32_1 : i32, i32, i32
  }
  func.func @transform_2(%arg0: i32) -> (i32, i32) {
    %c0_i32 = arith.constant 0 : i32
    %c0_i32_0 = arith.constant 0 : i32
    %c0_i32_1 = arith.constant 0 : i32
    return %c0_i32, %c0_i32_0 : i32, i32
  }
  func.func @transform_3(%arg0: i32) -> (i32, i32, i32, i32) {
    %c0_i32 = arith.constant 0 : i32
    %c0_i32_0 = arith.constant 0 : i32
    %c0_i32_1 = arith.constant 0 : i32
    %c0_i32_2 = arith.constant 0 : i32
    return %arg0, %c0_i32, %c0_i32_0, %c0_i32_1 : i32, i32, i32, i32
  }
}

module attributes {stable_mosaic.version = 11 : i64} {
  func.func @_tap_matmul_kernel(%arg0: i32, %arg1: memref<1x32x26xbf16, #tpu.memory_space<vmem>>, %arg2: memref<9x16x8xbf16, #tpu.memory_space<vmem>>, %arg3: memref<16x1xf32, #tpu.memory_space<vmem>>, %arg4: memref<1x1x16x20xbf16, #tpu.memory_space<vmem>>) attributes {dimension_semantics = [#tpu.dimension_semantics<parallel>], iteration_bounds = array<i64: 2>, scalar_prefetch = 0 : i64, scratch_operands = 0 : i64, tpu.core_type = #tpu.core_type<tc>, window_params = [{transform_indices = @transform_0, window_bounds = array<i64: 1, 32, 26>}, {pipeline_mode = #tpu.pipeline_mode<synchronous>, transform_indices = @transform_1, window_bounds = array<i64: 9, 16, 8>}, {pipeline_mode = #tpu.pipeline_mode<synchronous>, transform_indices = @transform_2, window_bounds = array<i64: 16, 1>}, {transform_indices = @transform_3, window_bounds = array<i64: 1, 1, 16, 20>}]} {
    %c0 = arith.constant 0 : index
    %c0_0 = arith.constant 0 : index
    %0 = vector.load %arg3[%c0, %c0_0] : memref<16x1xf32, #tpu.memory_space<vmem>>, vector<16x1xf32>
    %c0_1 = arith.constant 0 : index
    %c0_2 = arith.constant 0 : index
    %c0_3 = arith.constant 0 : index
    %1 = vector.load %arg1[%c0_1, %c0_2, %c0_3] : memref<1x32x26xbf16, #tpu.memory_space<vmem>>, vector<1x8x20xbf16>
    %2 = vector.shape_cast %1 : vector<1x8x20xbf16> to vector<8x20xbf16>
    %c0_4 = arith.constant 0 : index
    %c0_5 = arith.constant 0 : index
    %c0_6 = arith.constant 0 : index
    %3 = vector.load %arg2[%c0_4, %c0_5, %c0_6] : memref<9x16x8xbf16, #tpu.memory_space<vmem>>, vector<1x16x8xbf16>
    %4 = vector.shape_cast %3 : vector<1x16x8xbf16> to vector<16x8xbf16>
    %cst = arith.constant dense<0.000000e+00> : vector<16x20xf32>
    %5 = tpu.matmul %4, %2, %cst {dimension_numbers = #tpu.dot_dimension_numbers<[1], [0], [0], [1], [0, 0, 1, 1], [], []>} : vector<16x8xbf16>, vector<8x20xbf16>, vector<16x20xf32> -> vector<16x20xf32>
    %c0_7 = arith.constant 0 : index
    %c8 = arith.constant 8 : index
    %c0_8 = arith.constant 0 : index
    %6 = vector.load %arg1[%c0_7, %c8, %c0_8] : memref<1x32x26xbf16, #tpu.memory_space<vmem>>, vector<1x8x20xbf16>
    %7 = vector.shape_cast %6 : vector<1x8x20xbf16> to vector<8x20xbf16>
    %c1 = arith.constant 1 : index
    %c0_9 = arith.constant 0 : index
    %c0_10 = arith.constant 0 : index
    %8 = vector.load %arg2[%c1, %c0_9, %c0_10] : memref<9x16x8xbf16, #tpu.memory_space<vmem>>, vector<1x16x8xbf16>
    %9 = vector.shape_cast %8 : vector<1x16x8xbf16> to vector<16x8xbf16>
    %cst_11 = arith.constant dense<0.000000e+00> : vector<16x20xf32>
    %10 = tpu.matmul %9, %7, %cst_11 {dimension_numbers = #tpu.dot_dimension_numbers<[1], [0], [0], [1], [0, 0, 1, 1], [], []>} : vector<16x8xbf16>, vector<8x20xbf16>, vector<16x20xf32> -> vector<16x20xf32>
    %11 = arith.addf %5, %10 : vector<16x20xf32>
    %c0_12 = arith.constant 0 : index
    %c0_13 = arith.constant 0 : index
    %c1_14 = arith.constant 1 : index
    %12 = vector.load %arg1[%c0_12, %c0_13, %c1_14] : memref<1x32x26xbf16, #tpu.memory_space<vmem>>, vector<1x8x20xbf16>
    %13 = vector.shape_cast %12 : vector<1x8x20xbf16> to vector<8x20xbf16>
    %c2 = arith.constant 2 : index
    %c0_15 = arith.constant 0 : index
    %c0_16 = arith.constant 0 : index
    %14 = vector.load %arg2[%c2, %c0_15, %c0_16] : memref<9x16x8xbf16, #tpu.memory_space<vmem>>, vector<1x16x8xbf16>
    %15 = vector.shape_cast %14 : vector<1x16x8xbf16> to vector<16x8xbf16>
    %cst_17 = arith.constant dense<0.000000e+00> : vector<16x20xf32>
    %16 = tpu.matmul %15, %13, %cst_17 {dimension_numbers = #tpu.dot_dimension_numbers<[1], [0], [0], [1], [0, 0, 1, 1], [], []>} : vector<16x8xbf16>, vector<8x20xbf16>, vector<16x20xf32> -> vector<16x20xf32>
    %17 = arith.addf %11, %16 : vector<16x20xf32>
    %c0_18 = arith.constant 0 : index
    %c16 = arith.constant 16 : index
    %c0_19 = arith.constant 0 : index
    %18 = vector.load %arg1[%c0_18, %c16, %c0_19] : memref<1x32x26xbf16, #tpu.memory_space<vmem>>, vector<1x8x20xbf16>
    %19 = vector.shape_cast %18 : vector<1x8x20xbf16> to vector<8x20xbf16>
    %c3 = arith.constant 3 : index
    %c0_20 = arith.constant 0 : index
    %c0_21 = arith.constant 0 : index
    %20 = vector.load %arg2[%c3, %c0_20, %c0_21] : memref<9x16x8xbf16, #tpu.memory_space<vmem>>, vector<1x16x8xbf16>
    %21 = vector.shape_cast %20 : vector<1x16x8xbf16> to vector<16x8xbf16>
    %cst_22 = arith.constant dense<0.000000e+00> : vector<16x20xf32>
    %22 = tpu.matmul %21, %19, %cst_22 {dimension_numbers = #tpu.dot_dimension_numbers<[1], [0], [0], [1], [0, 0, 1, 1], [], []>} : vector<16x8xbf16>, vector<8x20xbf16>, vector<16x20xf32> -> vector<16x20xf32>
    %23 = arith.addf %17, %22 : vector<16x20xf32>
    %c0_23 = arith.constant 0 : index
    %c24 = arith.constant 24 : index
    %c0_24 = arith.constant 0 : index
    %24 = vector.load %arg1[%c0_23, %c24, %c0_24] : memref<1x32x26xbf16, #tpu.memory_space<vmem>>, vector<1x8x20xbf16>
    %25 = vector.shape_cast %24 : vector<1x8x20xbf16> to vector<8x20xbf16>
    %c4 = arith.constant 4 : index
    %c0_25 = arith.constant 0 : index
    %c0_26 = arith.constant 0 : index
    %26 = vector.load %arg2[%c4, %c0_25, %c0_26] : memref<9x16x8xbf16, #tpu.memory_space<vmem>>, vector<1x16x8xbf16>
    %27 = vector.shape_cast %26 : vector<1x16x8xbf16> to vector<16x8xbf16>
    %cst_27 = arith.constant dense<0.000000e+00> : vector<16x20xf32>
    %28 = tpu.matmul %27, %25, %cst_27 {dimension_numbers = #tpu.dot_dimension_numbers<[1], [0], [0], [1], [0, 0, 1, 1], [], []>} : vector<16x8xbf16>, vector<8x20xbf16>, vector<16x20xf32> -> vector<16x20xf32>
    %29 = arith.addf %23, %28 : vector<16x20xf32>
    %c0_28 = arith.constant 0 : index
    %c16_29 = arith.constant 16 : index
    %c1_30 = arith.constant 1 : index
    %30 = vector.load %arg1[%c0_28, %c16_29, %c1_30] : memref<1x32x26xbf16, #tpu.memory_space<vmem>>, vector<1x8x20xbf16>
    %31 = vector.shape_cast %30 : vector<1x8x20xbf16> to vector<8x20xbf16>
    %c5 = arith.constant 5 : index
    %c0_31 = arith.constant 0 : index
    %c0_32 = arith.constant 0 : index
    %32 = vector.load %arg2[%c5, %c0_31, %c0_32] : memref<9x16x8xbf16, #tpu.memory_space<vmem>>, vector<1x16x8xbf16>
    %33 = vector.shape_cast %32 : vector<1x16x8xbf16> to vector<16x8xbf16>
    %cst_33 = arith.constant dense<0.000000e+00> : vector<16x20xf32>
    %34 = tpu.matmul %33, %31, %cst_33 {dimension_numbers = #tpu.dot_dimension_numbers<[1], [0], [0], [1], [0, 0, 1, 1], [], []>} : vector<16x8xbf16>, vector<8x20xbf16>, vector<16x20xf32> -> vector<16x20xf32>
    %35 = arith.addf %29, %34 : vector<16x20xf32>
    %c0_34 = arith.constant 0 : index
    %c0_35 = arith.constant 0 : index
    %c5_36 = arith.constant 5 : index
    %36 = vector.load %arg1[%c0_34, %c0_35, %c5_36] : memref<1x32x26xbf16, #tpu.memory_space<vmem>>, vector<1x8x20xbf16>
    %37 = vector.shape_cast %36 : vector<1x8x20xbf16> to vector<8x20xbf16>
    %c6 = arith.constant 6 : index
    %c0_37 = arith.constant 0 : index
    %c0_38 = arith.constant 0 : index
    %38 = vector.load %arg2[%c6, %c0_37, %c0_38] : memref<9x16x8xbf16, #tpu.memory_space<vmem>>, vector<1x16x8xbf16>
    %39 = vector.shape_cast %38 : vector<1x16x8xbf16> to vector<16x8xbf16>
    %cst_39 = arith.constant dense<0.000000e+00> : vector<16x20xf32>
    %40 = tpu.matmul %39, %37, %cst_39 {dimension_numbers = #tpu.dot_dimension_numbers<[1], [0], [0], [1], [0, 0, 1, 1], [], []>} : vector<16x8xbf16>, vector<8x20xbf16>, vector<16x20xf32> -> vector<16x20xf32>
    %41 = arith.addf %35, %40 : vector<16x20xf32>
    %c0_40 = arith.constant 0 : index
    %c8_41 = arith.constant 8 : index
    %c5_42 = arith.constant 5 : index
    %42 = vector.load %arg1[%c0_40, %c8_41, %c5_42] : memref<1x32x26xbf16, #tpu.memory_space<vmem>>, vector<1x8x20xbf16>
    %43 = vector.shape_cast %42 : vector<1x8x20xbf16> to vector<8x20xbf16>
    %c7 = arith.constant 7 : index
    %c0_43 = arith.constant 0 : index
    %c0_44 = arith.constant 0 : index
    %44 = vector.load %arg2[%c7, %c0_43, %c0_44] : memref<9x16x8xbf16, #tpu.memory_space<vmem>>, vector<1x16x8xbf16>
    %45 = vector.shape_cast %44 : vector<1x16x8xbf16> to vector<16x8xbf16>
    %cst_45 = arith.constant dense<0.000000e+00> : vector<16x20xf32>
    %46 = tpu.matmul %45, %43, %cst_45 {dimension_numbers = #tpu.dot_dimension_numbers<[1], [0], [0], [1], [0, 0, 1, 1], [], []>} : vector<16x8xbf16>, vector<8x20xbf16>, vector<16x20xf32> -> vector<16x20xf32>
    %47 = arith.addf %41, %46 : vector<16x20xf32>
    %c0_46 = arith.constant 0 : index
    %c0_47 = arith.constant 0 : index
    %c6_48 = arith.constant 6 : index
    %48 = vector.load %arg1[%c0_46, %c0_47, %c6_48] : memref<1x32x26xbf16, #tpu.memory_space<vmem>>, vector<1x8x20xbf16>
    %49 = vector.shape_cast %48 : vector<1x8x20xbf16> to vector<8x20xbf16>
    %c8_49 = arith.constant 8 : index
    %c0_50 = arith.constant 0 : index
    %c0_51 = arith.constant 0 : index
    %50 = vector.load %arg2[%c8_49, %c0_50, %c0_51] : memref<9x16x8xbf16, #tpu.memory_space<vmem>>, vector<1x16x8xbf16>
    %51 = vector.shape_cast %50 : vector<1x16x8xbf16> to vector<16x8xbf16>
    %cst_52 = arith.constant dense<0.000000e+00> : vector<16x20xf32>
    %52 = tpu.matmul %51, %49, %cst_52 {dimension_numbers = #tpu.dot_dimension_numbers<[1], [0], [0], [1], [0, 0, 1, 1], [], []>} : vector<16x8xbf16>, vector<8x20xbf16>, vector<16x20xf32> -> vector<16x20xf32>
    %53 = arith.addf %47, %52 : vector<16x20xf32>
    %54 = vector.broadcast %0 : vector<16x1xf32> to vector<16x20xf32>
    %55 = arith.addf %53, %54 : vector<16x20xf32>
    %cst_53 = arith.constant 0.000000e+00 : f32
    %56 = vector.broadcast %cst_53 : f32 to vector<16x20xf32>
    %57 = arith.maximumf %55, %56 : vector<16x20xf32>
    %58 = arith.truncf %57 : vector<16x20xf32> to vector<16x20xbf16>
    %c0_54 = arith.constant 0 : index
    %c0_55 = arith.constant 0 : index
    %c0_56 = arith.constant 0 : index
    %c0_57 = arith.constant 0 : index
    %59 = vector.load %arg4[%c0_54, %c0_55, %c0_56, %c0_57] : memref<1x1x16x20xbf16, #tpu.memory_space<vmem>>, vector<1x1x16x20xbf16>
    %60 = vector.shape_cast %59 : vector<1x1x16x20xbf16> to vector<16x20xbf16>
    %61 = vector.shape_cast %58 : vector<16x20xbf16> to vector<1x1x16x20xbf16>
    tpu.vector_store %arg4[%c0_54, %c0_55, %c0_56, %c0_57], %61 {strides = array<i32>} : memref<1x1x16x20xbf16, #tpu.memory_space<vmem>>, vector<1x1x16x20xbf16>,
    return
  }
  func.func @transform_0(%arg0: i32) -> (i32, i32, i32) {
    %c0_i32 = arith.constant 0 : i32
    %c0_i32_0 = arith.constant 0 : i32
    %c0_i32_1 = arith.constant 0 : i32
    return %arg0, %c0_i32, %c0_i32_0 : i32, i32, i32
  }
  func.func @transform_1(%arg0: i32) -> (i32, i32, i32) {
    %c0_i32 = arith.constant 0 : i32
    %c0_i32_0 = arith.constant 0 : i32
    %c0_i32_1 = arith.constant 0 : i32
    %c0_i32_2 = arith.constant 0 : i32
    return %c0_i32, %c0_i32_0, %c0_i32_1 : i32, i32, i32
  }
  func.func @transform_2(%arg0: i32) -> (i32, i32) {
    %c0_i32 = arith.constant 0 : i32
    %c0_i32_0 = arith.constant 0 : i32
    %c0_i32_1 = arith.constant 0 : i32
    return %c0_i32, %c0_i32_0 : i32, i32
  }
  func.func @transform_3(%arg0: i32) -> (i32, i32, i32, i32) {
    %c0_i32 = arith.constant 0 : i32
    %c0_i32_0 = arith.constant 0 : i32
    %c0_i32_1 = arith.constant 0 : i32
    %c0_i32_2 = arith.constant 0 : i32
    return %arg0, %c0_i32, %c0_i32_0, %c0_i32_1 : i32, i32, i32, i32
  }
}

module attributes {stable_mosaic.version = 11 : i64} {
  func.func @_tap_matmul_kernel(%arg0: i32, %arg1: memref<1x16x38xbf16, #tpu.memory_space<vmem>>, %arg2: memref<9x16x16xbf16, #tpu.memory_space<vmem>>, %arg3: memref<16x1xf32, #tpu.memory_space<vmem>>, %arg4: memref<1x1x16x24xbf16, #tpu.memory_space<vmem>>) attributes {dimension_semantics = [#tpu.dimension_semantics<parallel>], iteration_bounds = array<i64: 2>, scalar_prefetch = 0 : i64, scratch_operands = 0 : i64, tpu.core_type = #tpu.core_type<tc>, window_params = [{transform_indices = @transform_0, window_bounds = array<i64: 1, 16, 38>}, {pipeline_mode = #tpu.pipeline_mode<synchronous>, transform_indices = @transform_1, window_bounds = array<i64: 9, 16, 16>}, {pipeline_mode = #tpu.pipeline_mode<synchronous>, transform_indices = @transform_2, window_bounds = array<i64: 16, 1>}, {transform_indices = @transform_3, window_bounds = array<i64: 1, 1, 16, 24>}]} {
    %c0 = arith.constant 0 : index
    %c0_0 = arith.constant 0 : index
    %0 = vector.load %arg3[%c0, %c0_0] : memref<16x1xf32, #tpu.memory_space<vmem>>, vector<16x1xf32>
    %c0_1 = arith.constant 0 : index
    %c0_2 = arith.constant 0 : index
    %c0_3 = arith.constant 0 : index
    %1 = vector.load %arg1[%c0_1, %c0_2, %c0_3] : memref<1x16x38xbf16, #tpu.memory_space<vmem>>, vector<1x16x24xbf16>
    %2 = vector.shape_cast %1 : vector<1x16x24xbf16> to vector<16x24xbf16>
    %c0_4 = arith.constant 0 : index
    %c0_5 = arith.constant 0 : index
    %c0_6 = arith.constant 0 : index
    %3 = vector.load %arg2[%c0_4, %c0_5, %c0_6] : memref<9x16x16xbf16, #tpu.memory_space<vmem>>, vector<1x16x16xbf16>
    %4 = vector.shape_cast %3 : vector<1x16x16xbf16> to vector<16x16xbf16>
    %cst = arith.constant dense<0.000000e+00> : vector<16x24xf32>
    %5 = tpu.matmul %4, %2, %cst {dimension_numbers = #tpu.dot_dimension_numbers<[1], [0], [0], [1], [0, 0, 1, 1], [], []>} : vector<16x16xbf16>, vector<16x24xbf16>, vector<16x24xf32> -> vector<16x24xf32>
    %c0_7 = arith.constant 0 : index
    %c0_8 = arith.constant 0 : index
    %c1 = arith.constant 1 : index
    %6 = vector.load %arg1[%c0_7, %c0_8, %c1] : memref<1x16x38xbf16, #tpu.memory_space<vmem>>, vector<1x16x24xbf16>
    %7 = vector.shape_cast %6 : vector<1x16x24xbf16> to vector<16x24xbf16>
    %c1_9 = arith.constant 1 : index
    %c0_10 = arith.constant 0 : index
    %c0_11 = arith.constant 0 : index
    %8 = vector.load %arg2[%c1_9, %c0_10, %c0_11] : memref<9x16x16xbf16, #tpu.memory_space<vmem>>, vector<1x16x16xbf16>
    %9 = vector.shape_cast %8 : vector<1x16x16xbf16> to vector<16x16xbf16>
    %cst_12 = arith.constant dense<0.000000e+00> : vector<16x24xf32>
    %10 = tpu.matmul %9, %7, %cst_12 {dimension_numbers = #tpu.dot_dimension_numbers<[1], [0], [0], [1], [0, 0, 1, 1], [], []>} : vector<16x16xbf16>, vector<16x24xbf16>, vector<16x24xf32> -> vector<16x24xf32>
    %11 = arith.addf %5, %10 : vector<16x24xf32>
    %c0_13 = arith.constant 0 : index
    %c0_14 = arith.constant 0 : index
    %c2 = arith.constant 2 : index
    %12 = vector.load %arg1[%c0_13, %c0_14, %c2] : memref<1x16x38xbf16, #tpu.memory_space<vmem>>, vector<1x16x24xbf16>
    %13 = vector.shape_cast %12 : vector<1x16x24xbf16> to vector<16x24xbf16>
    %c2_15 = arith.constant 2 : index
    %c0_16 = arith.constant 0 : index
    %c0_17 = arith.constant 0 : index
    %14 = vector.load %arg2[%c2_15, %c0_16, %c0_17] : memref<9x16x16xbf16, #tpu.memory_space<vmem>>, vector<1x16x16xbf16>
    %15 = vector.shape_cast %14 : vector<1x16x16xbf16> to vector<16x16xbf16>
    %cst_18 = arith.constant dense<0.000000e+00> : vector<16x24xf32>
    %16 = tpu.matmul %15, %13, %cst_18 {dimension_numbers = #tpu.dot_dimension_numbers<[1], [0], [0], [1], [0, 0, 1, 1], [], []>} : vector<16x16xbf16>, vector<16x24xbf16>, vector<16x24xf32> -> vector<16x24xf32>
    %17 = arith.addf %11, %16 : vector<16x24xf32>
    %c0_19 = arith.constant 0 : index
    %c0_20 = arith.constant 0 : index
    %c6 = arith.constant 6 : index
    %18 = vector.load %arg1[%c0_19, %c0_20, %c6] : memref<1x16x38xbf16, #tpu.memory_space<vmem>>, vector<1x16x24xbf16>
    %19 = vector.shape_cast %18 : vector<1x16x24xbf16> to vector<16x24xbf16>
    %c3 = arith.constant 3 : index
    %c0_21 = arith.constant 0 : index
    %c0_22 = arith.constant 0 : index
    %20 = vector.load %arg2[%c3, %c0_21, %c0_22] : memref<9x16x16xbf16, #tpu.memory_space<vmem>>, vector<1x16x16xbf16>
    %21 = vector.shape_cast %20 : vector<1x16x16xbf16> to vector<16x16xbf16>
    %cst_23 = arith.constant dense<0.000000e+00> : vector<16x24xf32>
    %22 = tpu.matmul %21, %19, %cst_23 {dimension_numbers = #tpu.dot_dimension_numbers<[1], [0], [0], [1], [0, 0, 1, 1], [], []>} : vector<16x16xbf16>, vector<16x24xbf16>, vector<16x24xf32> -> vector<16x24xf32>
    %23 = arith.addf %17, %22 : vector<16x24xf32>
    %c0_24 = arith.constant 0 : index
    %c0_25 = arith.constant 0 : index
    %c7 = arith.constant 7 : index
    %24 = vector.load %arg1[%c0_24, %c0_25, %c7] : memref<1x16x38xbf16, #tpu.memory_space<vmem>>, vector<1x16x24xbf16>
    %25 = vector.shape_cast %24 : vector<1x16x24xbf16> to vector<16x24xbf16>
    %c4 = arith.constant 4 : index
    %c0_26 = arith.constant 0 : index
    %c0_27 = arith.constant 0 : index
    %26 = vector.load %arg2[%c4, %c0_26, %c0_27] : memref<9x16x16xbf16, #tpu.memory_space<vmem>>, vector<1x16x16xbf16>
    %27 = vector.shape_cast %26 : vector<1x16x16xbf16> to vector<16x16xbf16>
    %cst_28 = arith.constant dense<0.000000e+00> : vector<16x24xf32>
    %28 = tpu.matmul %27, %25, %cst_28 {dimension_numbers = #tpu.dot_dimension_numbers<[1], [0], [0], [1], [0, 0, 1, 1], [], []>} : vector<16x16xbf16>, vector<16x24xbf16>, vector<16x24xf32> -> vector<16x24xf32>
    %29 = arith.addf %23, %28 : vector<16x24xf32>
    %c0_29 = arith.constant 0 : index
    %c0_30 = arith.constant 0 : index
    %c8 = arith.constant 8 : index
    %30 = vector.load %arg1[%c0_29, %c0_30, %c8] : memref<1x16x38xbf16, #tpu.memory_space<vmem>>, vector<1x16x24xbf16>
    %31 = vector.shape_cast %30 : vector<1x16x24xbf16> to vector<16x24xbf16>
    %c5 = arith.constant 5 : index
    %c0_31 = arith.constant 0 : index
    %c0_32 = arith.constant 0 : index
    %32 = vector.load %arg2[%c5, %c0_31, %c0_32] : memref<9x16x16xbf16, #tpu.memory_space<vmem>>, vector<1x16x16xbf16>
    %33 = vector.shape_cast %32 : vector<1x16x16xbf16> to vector<16x16xbf16>
    %cst_33 = arith.constant dense<0.000000e+00> : vector<16x24xf32>
    %34 = tpu.matmul %33, %31, %cst_33 {dimension_numbers = #tpu.dot_dimension_numbers<[1], [0], [0], [1], [0, 0, 1, 1], [], []>} : vector<16x16xbf16>, vector<16x24xbf16>, vector<16x24xf32> -> vector<16x24xf32>
    %35 = arith.addf %29, %34 : vector<16x24xf32>
    %c0_34 = arith.constant 0 : index
    %c0_35 = arith.constant 0 : index
    %c12 = arith.constant 12 : index
    %36 = vector.load %arg1[%c0_34, %c0_35, %c12] : memref<1x16x38xbf16, #tpu.memory_space<vmem>>, vector<1x16x24xbf16>
    %37 = vector.shape_cast %36 : vector<1x16x24xbf16> to vector<16x24xbf16>
    %c6_36 = arith.constant 6 : index
    %c0_37 = arith.constant 0 : index
    %c0_38 = arith.constant 0 : index
    %38 = vector.load %arg2[%c6_36, %c0_37, %c0_38] : memref<9x16x16xbf16, #tpu.memory_space<vmem>>, vector<1x16x16xbf16>
    %39 = vector.shape_cast %38 : vector<1x16x16xbf16> to vector<16x16xbf16>
    %cst_39 = arith.constant dense<0.000000e+00> : vector<16x24xf32>
    %40 = tpu.matmul %39, %37, %cst_39 {dimension_numbers = #tpu.dot_dimension_numbers<[1], [0], [0], [1], [0, 0, 1, 1], [], []>} : vector<16x16xbf16>, vector<16x24xbf16>, vector<16x24xf32> -> vector<16x24xf32>
    %41 = arith.addf %35, %40 : vector<16x24xf32>
    %c0_40 = arith.constant 0 : index
    %c0_41 = arith.constant 0 : index
    %c13 = arith.constant 13 : index
    %42 = vector.load %arg1[%c0_40, %c0_41, %c13] : memref<1x16x38xbf16, #tpu.memory_space<vmem>>, vector<1x16x24xbf16>
    %43 = vector.shape_cast %42 : vector<1x16x24xbf16> to vector<16x24xbf16>
    %c7_42 = arith.constant 7 : index
    %c0_43 = arith.constant 0 : index
    %c0_44 = arith.constant 0 : index
    %44 = vector.load %arg2[%c7_42, %c0_43, %c0_44] : memref<9x16x16xbf16, #tpu.memory_space<vmem>>, vector<1x16x16xbf16>
    %45 = vector.shape_cast %44 : vector<1x16x16xbf16> to vector<16x16xbf16>
    %cst_45 = arith.constant dense<0.000000e+00> : vector<16x24xf32>
    %46 = tpu.matmul %45, %43, %cst_45 {dimension_numbers = #tpu.dot_dimension_numbers<[1], [0], [0], [1], [0, 0, 1, 1], [], []>} : vector<16x16xbf16>, vector<16x24xbf16>, vector<16x24xf32> -> vector<16x24xf32>
    %47 = arith.addf %41, %46 : vector<16x24xf32>
    %c0_46 = arith.constant 0 : index
    %c0_47 = arith.constant 0 : index
    %c14 = arith.constant 14 : index
    %48 = vector.load %arg1[%c0_46, %c0_47, %c14] : memref<1x16x38xbf16, #tpu.memory_space<vmem>>, vector<1x16x24xbf16>
    %49 = vector.shape_cast %48 : vector<1x16x24xbf16> to vector<16x24xbf16>
    %c8_48 = arith.constant 8 : index
    %c0_49 = arith.constant 0 : index
    %c0_50 = arith.constant 0 : index
    %50 = vector.load %arg2[%c8_48, %c0_49, %c0_50] : memref<9x16x16xbf16, #tpu.memory_space<vmem>>, vector<1x16x16xbf16>
    %51 = vector.shape_cast %50 : vector<1x16x16xbf16> to vector<16x16xbf16>
    %cst_51 = arith.constant dense<0.000000e+00> : vector<16x24xf32>
    %52 = tpu.matmul %51, %49, %cst_51 {dimension_numbers = #tpu.dot_dimension_numbers<[1], [0], [0], [1], [0, 0, 1, 1], [], []>} : vector<16x16xbf16>, vector<16x24xbf16>, vector<16x24xf32> -> vector<16x24xf32>
    %53 = arith.addf %47, %52 : vector<16x24xf32>
    %54 = vector.broadcast %0 : vector<16x1xf32> to vector<16x24xf32>
    %55 = arith.addf %53, %54 : vector<16x24xf32>
    %cst_52 = arith.constant 0.000000e+00 : f32
    %56 = vector.broadcast %cst_52 : f32 to vector<16x24xf32>
    %57 = arith.maximumf %55, %56 : vector<16x24xf32>
    %58 = arith.truncf %57 : vector<16x24xf32> to vector<16x24xbf16>
    %c0_53 = arith.constant 0 : index
    %c0_54 = arith.constant 0 : index
    %c0_55 = arith.constant 0 : index
    %c0_56 = arith.constant 0 : index
    %59 = vector.load %arg4[%c0_53, %c0_54, %c0_55, %c0_56] : memref<1x1x16x24xbf16, #tpu.memory_space<vmem>>, vector<1x1x16x24xbf16>
    %60 = vector.shape_cast %59 : vector<1x1x16x24xbf16> to vector<16x24xbf16>
    %61 = vector.shape_cast %58 : vector<16x24xbf16> to vector<1x1x16x24xbf16>
    tpu.vector_store %arg4[%c0_53, %c0_54, %c0_55, %c0_56], %61 {strides = array<i32>} : memref<1x1x16x24xbf16, #tpu.memory_space<vmem>>, vector<1x1x16x24xbf16>,
    return
  }
  func.func @transform_0(%arg0: i32) -> (i32, i32, i32) {
    %c0_i32 = arith.constant 0 : i32
    %c0_i32_0 = arith.constant 0 : i32
    %c0_i32_1 = arith.constant 0 : i32
    return %arg0, %c0_i32, %c0_i32_0 : i32, i32, i32
  }
  func.func @transform_1(%arg0: i32) -> (i32, i32, i32) {
    %c0_i32 = arith.constant 0 : i32
    %c0_i32_0 = arith.constant 0 : i32
    %c0_i32_1 = arith.constant 0 : i32
    %c0_i32_2 = arith.constant 0 : i32
    return %c0_i32, %c0_i32_0, %c0_i32_1 : i32, i32, i32
  }
  func.func @transform_2(%arg0: i32) -> (i32, i32) {
    %c0_i32 = arith.constant 0 : i32
    %c0_i32_0 = arith.constant 0 : i32
    %c0_i32_1 = arith.constant 0 : i32
    return %c0_i32, %c0_i32_0 : i32, i32
  }
  func.func @transform_3(%arg0: i32) -> (i32, i32, i32, i32) {
    %c0_i32 = arith.constant 0 : i32
    %c0_i32_0 = arith.constant 0 : i32
    %c0_i32_1 = arith.constant 0 : i32
    %c0_i32_2 = arith.constant 0 : i32
    return %arg0, %c0_i32, %c0_i32_0, %c0_i32_1 : i32, i32, i32, i32
  }
}

module attributes {stable_mosaic.version = 11 : i64} {
  func.func @_tap_matmul_kernel(%arg0: i32, %arg1: memref<1x16x26xbf16, #tpu.memory_space<vmem>>, %arg2: memref<9x8x16xbf16, #tpu.memory_space<vmem>>, %arg3: memref<8x1xf32, #tpu.memory_space<vmem>>, %arg4: memref<1x4x8x20xbf16, #tpu.memory_space<vmem>>) attributes {dimension_semantics = [#tpu.dimension_semantics<parallel>], iteration_bounds = array<i64: 2>, scalar_prefetch = 0 : i64, scratch_operands = 0 : i64, tpu.core_type = #tpu.core_type<tc>, window_params = [{transform_indices = @transform_0, window_bounds = array<i64: 1, 16, 26>}, {pipeline_mode = #tpu.pipeline_mode<synchronous>, transform_indices = @transform_1, window_bounds = array<i64: 9, 8, 16>}, {pipeline_mode = #tpu.pipeline_mode<synchronous>, transform_indices = @transform_2, window_bounds = array<i64: 8, 1>}, {transform_indices = @transform_3, window_bounds = array<i64: 1, 4, 8, 20>}]} {
    %c0 = arith.constant 0 : index
    %c0_0 = arith.constant 0 : index
    %0 = vector.load %arg3[%c0, %c0_0] : memref<8x1xf32, #tpu.memory_space<vmem>>, vector<8x1xf32>
    %c0_1 = arith.constant 0 : index
    %c0_2 = arith.constant 0 : index
    %c0_3 = arith.constant 0 : index
    %1 = vector.load %arg1[%c0_1, %c0_2, %c0_3] : memref<1x16x26xbf16, #tpu.memory_space<vmem>>, vector<1x16x20xbf16>
    %2 = vector.shape_cast %1 : vector<1x16x20xbf16> to vector<16x20xbf16>
    %c0_4 = arith.constant 0 : index
    %c0_5 = arith.constant 0 : index
    %c0_6 = arith.constant 0 : index
    %3 = vector.load %arg2[%c0_4, %c0_5, %c0_6] : memref<9x8x16xbf16, #tpu.memory_space<vmem>>, vector<1x8x16xbf16>
    %4 = vector.shape_cast %3 : vector<1x8x16xbf16> to vector<8x16xbf16>
    %cst = arith.constant dense<0.000000e+00> : vector<8x20xf32>
    %5 = tpu.matmul %4, %2, %cst {dimension_numbers = #tpu.dot_dimension_numbers<[1], [0], [0], [1], [0, 0, 1, 1], [], []>} : vector<8x16xbf16>, vector<16x20xbf16>, vector<8x20xf32> -> vector<8x20xf32>
    %6 = vector.broadcast %0 : vector<8x1xf32> to vector<8x20xf32>
    %7 = arith.addf %5, %6 : vector<8x20xf32>
    %cst_7 = arith.constant 0.000000e+00 : f32
    %8 = vector.broadcast %cst_7 : f32 to vector<8x20xf32>
    %9 = arith.maximumf %7, %8 : vector<8x20xf32>
    %10 = arith.truncf %9 : vector<8x20xf32> to vector<8x20xbf16>
    %c0_8 = arith.constant 0 : index
    %c0_9 = arith.constant 0 : index
    %c0_10 = arith.constant 0 : index
    %c0_11 = arith.constant 0 : index
    %11 = vector.load %arg4[%c0_8, %c0_9, %c0_10, %c0_11] : memref<1x4x8x20xbf16, #tpu.memory_space<vmem>>, vector<1x1x8x20xbf16>
    %12 = vector.shape_cast %11 : vector<1x1x8x20xbf16> to vector<8x20xbf16>
    %13 = vector.shape_cast %10 : vector<8x20xbf16> to vector<1x1x8x20xbf16>
    tpu.vector_store %arg4[%c0_8, %c0_9, %c0_10, %c0_11], %13 {strides = array<i32>} : memref<1x4x8x20xbf16, #tpu.memory_space<vmem>>, vector<1x1x8x20xbf16>,
    %c0_12 = arith.constant 0 : index
    %c0_13 = arith.constant 0 : index
    %c0_14 = arith.constant 0 : index
    %14 = vector.load %arg1[%c0_12, %c0_13, %c0_14] : memref<1x16x26xbf16, #tpu.memory_space<vmem>>, vector<1x16x20xbf16>
    %15 = vector.shape_cast %14 : vector<1x16x20xbf16> to vector<16x20xbf16>
    %c1 = arith.constant 1 : index
    %c0_15 = arith.constant 0 : index
    %c0_16 = arith.constant 0 : index
    %16 = vector.load %arg2[%c1, %c0_15, %c0_16] : memref<9x8x16xbf16, #tpu.memory_space<vmem>>, vector<1x8x16xbf16>
    %17 = vector.shape_cast %16 : vector<1x8x16xbf16> to vector<8x16xbf16>
    %cst_17 = arith.constant dense<0.000000e+00> : vector<8x20xf32>
    %18 = tpu.matmul %17, %15, %cst_17 {dimension_numbers = #tpu.dot_dimension_numbers<[1], [0], [0], [1], [0, 0, 1, 1], [], []>} : vector<8x16xbf16>, vector<16x20xbf16>, vector<8x20xf32> -> vector<8x20xf32>
    %c0_18 = arith.constant 0 : index
    %c0_19 = arith.constant 0 : index
    %c1_20 = arith.constant 1 : index
    %19 = vector.load %arg1[%c0_18, %c0_19, %c1_20] : memref<1x16x26xbf16, #tpu.memory_space<vmem>>, vector<1x16x20xbf16>
    %20 = vector.shape_cast %19 : vector<1x16x20xbf16> to vector<16x20xbf16>
    %c2 = arith.constant 2 : index
    %c0_21 = arith.constant 0 : index
    %c0_22 = arith.constant 0 : index
    %21 = vector.load %arg2[%c2, %c0_21, %c0_22] : memref<9x8x16xbf16, #tpu.memory_space<vmem>>, vector<1x8x16xbf16>
    %22 = vector.shape_cast %21 : vector<1x8x16xbf16> to vector<8x16xbf16>
    %cst_23 = arith.constant dense<0.000000e+00> : vector<8x20xf32>
    %23 = tpu.matmul %22, %20, %cst_23 {dimension_numbers = #tpu.dot_dimension_numbers<[1], [0], [0], [1], [0, 0, 1, 1], [], []>} : vector<8x16xbf16>, vector<16x20xbf16>, vector<8x20xf32> -> vector<8x20xf32>
    %24 = arith.addf %18, %23 : vector<8x20xf32>
    %25 = vector.broadcast %0 : vector<8x1xf32> to vector<8x20xf32>
    %26 = arith.addf %24, %25 : vector<8x20xf32>
    %cst_24 = arith.constant 0.000000e+00 : f32
    %27 = vector.broadcast %cst_24 : f32 to vector<8x20xf32>
    %28 = arith.maximumf %26, %27 : vector<8x20xf32>
    %29 = arith.truncf %28 : vector<8x20xf32> to vector<8x20xbf16>
    %c0_25 = arith.constant 0 : index
    %c1_26 = arith.constant 1 : index
    %c0_27 = arith.constant 0 : index
    %c0_28 = arith.constant 0 : index
    %30 = vector.load %arg4[%c0_25, %c1_26, %c0_27, %c0_28] : memref<1x4x8x20xbf16, #tpu.memory_space<vmem>>, vector<1x1x8x20xbf16>
    %31 = vector.shape_cast %30 : vector<1x1x8x20xbf16> to vector<8x20xbf16>
    %32 = vector.shape_cast %29 : vector<8x20xbf16> to vector<1x1x8x20xbf16>
    tpu.vector_store %arg4[%c0_25, %c1_26, %c0_27, %c0_28], %32 {strides = array<i32>} : memref<1x4x8x20xbf16, #tpu.memory_space<vmem>>, vector<1x1x8x20xbf16>,
    %c0_29 = arith.constant 0 : index
    %c0_30 = arith.constant 0 : index
    %c0_31 = arith.constant 0 : index
    %33 = vector.load %arg1[%c0_29, %c0_30, %c0_31] : memref<1x16x26xbf16, #tpu.memory_space<vmem>>, vector<1x16x20xbf16>
    %34 = vector.shape_cast %33 : vector<1x16x20xbf16> to vector<16x20xbf16>
    %c3 = arith.constant 3 : index
    %c0_32 = arith.constant 0 : index
    %c0_33 = arith.constant 0 : index
    %35 = vector.load %arg2[%c3, %c0_32, %c0_33] : memref<9x8x16xbf16, #tpu.memory_space<vmem>>, vector<1x8x16xbf16>
    %36 = vector.shape_cast %35 : vector<1x8x16xbf16> to vector<8x16xbf16>
    %cst_34 = arith.constant dense<0.000000e+00> : vector<8x20xf32>
    %37 = tpu.matmul %36, %34, %cst_34 {dimension_numbers = #tpu.dot_dimension_numbers<[1], [0], [0], [1], [0, 0, 1, 1], [], []>} : vector<8x16xbf16>, vector<16x20xbf16>, vector<8x20xf32> -> vector<8x20xf32>
    %c0_35 = arith.constant 0 : index
    %c0_36 = arith.constant 0 : index
    %c5 = arith.constant 5 : index
    %38 = vector.load %arg1[%c0_35, %c0_36, %c5] : memref<1x16x26xbf16, #tpu.memory_space<vmem>>, vector<1x16x20xbf16>
    %39 = vector.shape_cast %38 : vector<1x16x20xbf16> to vector<16x20xbf16>
    %c4 = arith.constant 4 : index
    %c0_37 = arith.constant 0 : index
    %c0_38 = arith.constant 0 : index
    %40 = vector.load %arg2[%c4, %c0_37, %c0_38] : memref<9x8x16xbf16, #tpu.memory_space<vmem>>, vector<1x8x16xbf16>
    %41 = vector.shape_cast %40 : vector<1x8x16xbf16> to vector<8x16xbf16>
    %cst_39 = arith.constant dense<0.000000e+00> : vector<8x20xf32>
    %42 = tpu.matmul %41, %39, %cst_39 {dimension_numbers = #tpu.dot_dimension_numbers<[1], [0], [0], [1], [0, 0, 1, 1], [], []>} : vector<8x16xbf16>, vector<16x20xbf16>, vector<8x20xf32> -> vector<8x20xf32>
    %43 = arith.addf %37, %42 : vector<8x20xf32>
    %44 = vector.broadcast %0 : vector<8x1xf32> to vector<8x20xf32>
    %45 = arith.addf %43, %44 : vector<8x20xf32>
    %cst_40 = arith.constant 0.000000e+00 : f32
    %46 = vector.broadcast %cst_40 : f32 to vector<8x20xf32>
    %47 = arith.maximumf %45, %46 : vector<8x20xf32>
    %48 = arith.truncf %47 : vector<8x20xf32> to vector<8x20xbf16>
    %c0_41 = arith.constant 0 : index
    %c2_42 = arith.constant 2 : index
    %c0_43 = arith.constant 0 : index
    %c0_44 = arith.constant 0 : index
    %49 = vector.load %arg4[%c0_41, %c2_42, %c0_43, %c0_44] : memref<1x4x8x20xbf16, #tpu.memory_space<vmem>>, vector<1x1x8x20xbf16>
    %50 = vector.shape_cast %49 : vector<1x1x8x20xbf16> to vector<8x20xbf16>
    %51 = vector.shape_cast %48 : vector<8x20xbf16> to vector<1x1x8x20xbf16>
    tpu.vector_store %arg4[%c0_41, %c2_42, %c0_43, %c0_44], %51 {strides = array<i32>} : memref<1x4x8x20xbf16, #tpu.memory_space<vmem>>, vector<1x1x8x20xbf16>,
    %c0_45 = arith.constant 0 : index
    %c0_46 = arith.constant 0 : index
    %c0_47 = arith.constant 0 : index
    %52 = vector.load %arg1[%c0_45, %c0_46, %c0_47] : memref<1x16x26xbf16, #tpu.memory_space<vmem>>, vector<1x16x20xbf16>
    %53 = vector.shape_cast %52 : vector<1x16x20xbf16> to vector<16x20xbf16>
    %c5_48 = arith.constant 5 : index
    %c0_49 = arith.constant 0 : index
    %c0_50 = arith.constant 0 : index
    %54 = vector.load %arg2[%c5_48, %c0_49, %c0_50] : memref<9x8x16xbf16, #tpu.memory_space<vmem>>, vector<1x8x16xbf16>
    %55 = vector.shape_cast %54 : vector<1x8x16xbf16> to vector<8x16xbf16>
    %cst_51 = arith.constant dense<0.000000e+00> : vector<8x20xf32>
    %56 = tpu.matmul %55, %53, %cst_51 {dimension_numbers = #tpu.dot_dimension_numbers<[1], [0], [0], [1], [0, 0, 1, 1], [], []>} : vector<8x16xbf16>, vector<16x20xbf16>, vector<8x20xf32> -> vector<8x20xf32>
    %c0_52 = arith.constant 0 : index
    %c0_53 = arith.constant 0 : index
    %c1_54 = arith.constant 1 : index
    %57 = vector.load %arg1[%c0_52, %c0_53, %c1_54] : memref<1x16x26xbf16, #tpu.memory_space<vmem>>, vector<1x16x20xbf16>
    %58 = vector.shape_cast %57 : vector<1x16x20xbf16> to vector<16x20xbf16>
    %c6 = arith.constant 6 : index
    %c0_55 = arith.constant 0 : index
    %c0_56 = arith.constant 0 : index
    %59 = vector.load %arg2[%c6, %c0_55, %c0_56] : memref<9x8x16xbf16, #tpu.memory_space<vmem>>, vector<1x8x16xbf16>
    %60 = vector.shape_cast %59 : vector<1x8x16xbf16> to vector<8x16xbf16>
    %cst_57 = arith.constant dense<0.000000e+00> : vector<8x20xf32>
    %61 = tpu.matmul %60, %58, %cst_57 {dimension_numbers = #tpu.dot_dimension_numbers<[1], [0], [0], [1], [0, 0, 1, 1], [], []>} : vector<8x16xbf16>, vector<16x20xbf16>, vector<8x20xf32> -> vector<8x20xf32>
    %62 = arith.addf %56, %61 : vector<8x20xf32>
    %c0_58 = arith.constant 0 : index
    %c0_59 = arith.constant 0 : index
    %c5_60 = arith.constant 5 : index
    %63 = vector.load %arg1[%c0_58, %c0_59, %c5_60] : memref<1x16x26xbf16, #tpu.memory_space<vmem>>, vector<1x16x20xbf16>
    %64 = vector.shape_cast %63 : vector<1x16x20xbf16> to vector<16x20xbf16>
    %c7 = arith.constant 7 : index
    %c0_61 = arith.constant 0 : index
    %c0_62 = arith.constant 0 : index
    %65 = vector.load %arg2[%c7, %c0_61, %c0_62] : memref<9x8x16xbf16, #tpu.memory_space<vmem>>, vector<1x8x16xbf16>
    %66 = vector.shape_cast %65 : vector<1x8x16xbf16> to vector<8x16xbf16>
    %cst_63 = arith.constant dense<0.000000e+00> : vector<8x20xf32>
    %67 = tpu.matmul %66, %64, %cst_63 {dimension_numbers = #tpu.dot_dimension_numbers<[1], [0], [0], [1], [0, 0, 1, 1], [], []>} : vector<8x16xbf16>, vector<16x20xbf16>, vector<8x20xf32> -> vector<8x20xf32>
    %68 = arith.addf %62, %67 : vector<8x20xf32>
    %c0_64 = arith.constant 0 : index
    %c0_65 = arith.constant 0 : index
    %c6_66 = arith.constant 6 : index
    %69 = vector.load %arg1[%c0_64, %c0_65, %c6_66] : memref<1x16x26xbf16, #tpu.memory_space<vmem>>, vector<1x16x20xbf16>
    %70 = vector.shape_cast %69 : vector<1x16x20xbf16> to vector<16x20xbf16>
    %c8 = arith.constant 8 : index
    %c0_67 = arith.constant 0 : index
    %c0_68 = arith.constant 0 : index
    %71 = vector.load %arg2[%c8, %c0_67, %c0_68] : memref<9x8x16xbf16, #tpu.memory_space<vmem>>, vector<1x8x16xbf16>
    %72 = vector.shape_cast %71 : vector<1x8x16xbf16> to vector<8x16xbf16>
    %cst_69 = arith.constant dense<0.000000e+00> : vector<8x20xf32>
    %73 = tpu.matmul %72, %70, %cst_69 {dimension_numbers = #tpu.dot_dimension_numbers<[1], [0], [0], [1], [0, 0, 1, 1], [], []>} : vector<8x16xbf16>, vector<16x20xbf16>, vector<8x20xf32> -> vector<8x20xf32>
    %74 = arith.addf %68, %73 : vector<8x20xf32>
    %75 = vector.broadcast %0 : vector<8x1xf32> to vector<8x20xf32>
    %76 = arith.addf %74, %75 : vector<8x20xf32>
    %cst_70 = arith.constant 0.000000e+00 : f32
    %77 = vector.broadcast %cst_70 : f32 to vector<8x20xf32>
    %78 = arith.maximumf %76, %77 : vector<8x20xf32>
    %79 = arith.truncf %78 : vector<8x20xf32> to vector<8x20xbf16>
    %c0_71 = arith.constant 0 : index
    %c3_72 = arith.constant 3 : index
    %c0_73 = arith.constant 0 : index
    %c0_74 = arith.constant 0 : index
    %80 = vector.load %arg4[%c0_71, %c3_72, %c0_73, %c0_74] : memref<1x4x8x20xbf16, #tpu.memory_space<vmem>>, vector<1x1x8x20xbf16>
    %81 = vector.shape_cast %80 : vector<1x1x8x20xbf16> to vector<8x20xbf16>
    %82 = vector.shape_cast %79 : vector<8x20xbf16> to vector<1x1x8x20xbf16>
    tpu.vector_store %arg4[%c0_71, %c3_72, %c0_73, %c0_74], %82 {strides = array<i32>} : memref<1x4x8x20xbf16, #tpu.memory_space<vmem>>, vector<1x1x8x20xbf16>,
    return
  }
  func.func @transform_0(%arg0: i32) -> (i32, i32, i32) {
    %c0_i32 = arith.constant 0 : i32
    %c0_i32_0 = arith.constant 0 : i32
    %c0_i32_1 = arith.constant 0 : i32
    return %arg0, %c0_i32, %c0_i32_0 : i32, i32, i32
  }
  func.func @transform_1(%arg0: i32) -> (i32, i32, i32) {
    %c0_i32 = arith.constant 0 : i32
    %c0_i32_0 = arith.constant 0 : i32
    %c0_i32_1 = arith.constant 0 : i32
    %c0_i32_2 = arith.constant 0 : i32
    return %c0_i32, %c0_i32_0, %c0_i32_1 : i32, i32, i32
  }
  func.func @transform_2(%arg0: i32) -> (i32, i32) {
    %c0_i32 = arith.constant 0 : i32
    %c0_i32_0 = arith.constant 0 : i32
    %c0_i32_1 = arith.constant 0 : i32
    return %c0_i32, %c0_i32_0 : i32, i32
  }
  func.func @transform_3(%arg0: i32) -> (i32, i32, i32, i32) {
    %c0_i32 = arith.constant 0 : i32
    %c0_i32_0 = arith.constant 0 : i32
    %c0_i32_1 = arith.constant 0 : i32
    %c0_i32_2 = arith.constant 0 : i32
    return %arg0, %c0_i32, %c0_i32_0, %c0_i32_1 : i32, i32, i32, i32
  }
}

module attributes {stable_mosaic.version = 11 : i64} {
  func.func @_tap_matmul_kernel(%arg0: i32, %arg1: memref<1x16x102xbf16, #tpu.memory_space<vmem>>, %arg2: memref<9x8x16xbf16, #tpu.memory_space<vmem>>, %arg3: memref<8x1xf32, #tpu.memory_space<vmem>>, %arg4: memref<1x1x8x80xbf16, #tpu.memory_space<vmem>>) attributes {dimension_semantics = [#tpu.dimension_semantics<parallel>], iteration_bounds = array<i64: 2>, scalar_prefetch = 0 : i64, scratch_operands = 0 : i64, tpu.core_type = #tpu.core_type<tc>, window_params = [{transform_indices = @transform_0, window_bounds = array<i64: 1, 16, 102>}, {pipeline_mode = #tpu.pipeline_mode<synchronous>, transform_indices = @transform_1, window_bounds = array<i64: 9, 8, 16>}, {pipeline_mode = #tpu.pipeline_mode<synchronous>, transform_indices = @transform_2, window_bounds = array<i64: 8, 1>}, {transform_indices = @transform_3, window_bounds = array<i64: 1, 1, 8, 80>}]} {
    %c0 = arith.constant 0 : index
    %c0_0 = arith.constant 0 : index
    %0 = vector.load %arg3[%c0, %c0_0] : memref<8x1xf32, #tpu.memory_space<vmem>>, vector<8x1xf32>
    %c0_1 = arith.constant 0 : index
    %c0_2 = arith.constant 0 : index
    %c0_3 = arith.constant 0 : index
    %1 = vector.load %arg1[%c0_1, %c0_2, %c0_3] : memref<1x16x102xbf16, #tpu.memory_space<vmem>>, vector<1x16x80xbf16>
    %2 = vector.shape_cast %1 : vector<1x16x80xbf16> to vector<16x80xbf16>
    %c0_4 = arith.constant 0 : index
    %c0_5 = arith.constant 0 : index
    %c0_6 = arith.constant 0 : index
    %3 = vector.load %arg2[%c0_4, %c0_5, %c0_6] : memref<9x8x16xbf16, #tpu.memory_space<vmem>>, vector<1x8x16xbf16>
    %4 = vector.shape_cast %3 : vector<1x8x16xbf16> to vector<8x16xbf16>
    %cst = arith.constant dense<0.000000e+00> : vector<8x80xf32>
    %5 = tpu.matmul %4, %2, %cst {dimension_numbers = #tpu.dot_dimension_numbers<[1], [0], [0], [1], [0, 0, 1, 1], [], []>} : vector<8x16xbf16>, vector<16x80xbf16>, vector<8x80xf32> -> vector<8x80xf32>
    %c0_7 = arith.constant 0 : index
    %c0_8 = arith.constant 0 : index
    %c1 = arith.constant 1 : index
    %6 = vector.load %arg1[%c0_7, %c0_8, %c1] : memref<1x16x102xbf16, #tpu.memory_space<vmem>>, vector<1x16x80xbf16>
    %7 = vector.shape_cast %6 : vector<1x16x80xbf16> to vector<16x80xbf16>
    %c1_9 = arith.constant 1 : index
    %c0_10 = arith.constant 0 : index
    %c0_11 = arith.constant 0 : index
    %8 = vector.load %arg2[%c1_9, %c0_10, %c0_11] : memref<9x8x16xbf16, #tpu.memory_space<vmem>>, vector<1x8x16xbf16>
    %9 = vector.shape_cast %8 : vector<1x8x16xbf16> to vector<8x16xbf16>
    %cst_12 = arith.constant dense<0.000000e+00> : vector<8x80xf32>
    %10 = tpu.matmul %9, %7, %cst_12 {dimension_numbers = #tpu.dot_dimension_numbers<[1], [0], [0], [1], [0, 0, 1, 1], [], []>} : vector<8x16xbf16>, vector<16x80xbf16>, vector<8x80xf32> -> vector<8x80xf32>
    %11 = arith.addf %5, %10 : vector<8x80xf32>
    %c0_13 = arith.constant 0 : index
    %c0_14 = arith.constant 0 : index
    %c2 = arith.constant 2 : index
    %12 = vector.load %arg1[%c0_13, %c0_14, %c2] : memref<1x16x102xbf16, #tpu.memory_space<vmem>>, vector<1x16x80xbf16>
    %13 = vector.shape_cast %12 : vector<1x16x80xbf16> to vector<16x80xbf16>
    %c2_15 = arith.constant 2 : index
    %c0_16 = arith.constant 0 : index
    %c0_17 = arith.constant 0 : index
    %14 = vector.load %arg2[%c2_15, %c0_16, %c0_17] : memref<9x8x16xbf16, #tpu.memory_space<vmem>>, vector<1x8x16xbf16>
    %15 = vector.shape_cast %14 : vector<1x8x16xbf16> to vector<8x16xbf16>
    %cst_18 = arith.constant dense<0.000000e+00> : vector<8x80xf32>
    %16 = tpu.matmul %15, %13, %cst_18 {dimension_numbers = #tpu.dot_dimension_numbers<[1], [0], [0], [1], [0, 0, 1, 1], [], []>} : vector<8x16xbf16>, vector<16x80xbf16>, vector<8x80xf32> -> vector<8x80xf32>
    %17 = arith.addf %11, %16 : vector<8x80xf32>
    %c0_19 = arith.constant 0 : index
    %c0_20 = arith.constant 0 : index
    %c10 = arith.constant 10 : index
    %18 = vector.load %arg1[%c0_19, %c0_20, %c10] : memref<1x16x102xbf16, #tpu.memory_space<vmem>>, vector<1x16x80xbf16>
    %19 = vector.shape_cast %18 : vector<1x16x80xbf16> to vector<16x80xbf16>
    %c3 = arith.constant 3 : index
    %c0_21 = arith.constant 0 : index
    %c0_22 = arith.constant 0 : index
    %20 = vector.load %arg2[%c3, %c0_21, %c0_22] : memref<9x8x16xbf16, #tpu.memory_space<vmem>>, vector<1x8x16xbf16>
    %21 = vector.shape_cast %20 : vector<1x8x16xbf16> to vector<8x16xbf16>
    %cst_23 = arith.constant dense<0.000000e+00> : vector<8x80xf32>
    %22 = tpu.matmul %21, %19, %cst_23 {dimension_numbers = #tpu.dot_dimension_numbers<[1], [0], [0], [1], [0, 0, 1, 1], [], []>} : vector<8x16xbf16>, vector<16x80xbf16>, vector<8x80xf32> -> vector<8x80xf32>
    %23 = arith.addf %17, %22 : vector<8x80xf32>
    %c0_24 = arith.constant 0 : index
    %c0_25 = arith.constant 0 : index
    %c11 = arith.constant 11 : index
    %24 = vector.load %arg1[%c0_24, %c0_25, %c11] : memref<1x16x102xbf16, #tpu.memory_space<vmem>>, vector<1x16x80xbf16>
    %25 = vector.shape_cast %24 : vector<1x16x80xbf16> to vector<16x80xbf16>
    %c4 = arith.constant 4 : index
    %c0_26 = arith.constant 0 : index
    %c0_27 = arith.constant 0 : index
    %26 = vector.load %arg2[%c4, %c0_26, %c0_27] : memref<9x8x16xbf16, #tpu.memory_space<vmem>>, vector<1x8x16xbf16>
    %27 = vector.shape_cast %26 : vector<1x8x16xbf16> to vector<8x16xbf16>
    %cst_28 = arith.constant dense<0.000000e+00> : vector<8x80xf32>
    %28 = tpu.matmul %27, %25, %cst_28 {dimension_numbers = #tpu.dot_dimension_numbers<[1], [0], [0], [1], [0, 0, 1, 1], [], []>} : vector<8x16xbf16>, vector<16x80xbf16>, vector<8x80xf32> -> vector<8x80xf32>
    %29 = arith.addf %23, %28 : vector<8x80xf32>
    %c0_29 = arith.constant 0 : index
    %c0_30 = arith.constant 0 : index
    %c12 = arith.constant 12 : index
    %30 = vector.load %arg1[%c0_29, %c0_30, %c12] : memref<1x16x102xbf16, #tpu.memory_space<vmem>>, vector<1x16x80xbf16>
    %31 = vector.shape_cast %30 : vector<1x16x80xbf16> to vector<16x80xbf16>
    %c5 = arith.constant 5 : index
    %c0_31 = arith.constant 0 : index
    %c0_32 = arith.constant 0 : index
    %32 = vector.load %arg2[%c5, %c0_31, %c0_32] : memref<9x8x16xbf16, #tpu.memory_space<vmem>>, vector<1x8x16xbf16>
    %33 = vector.shape_cast %32 : vector<1x8x16xbf16> to vector<8x16xbf16>
    %cst_33 = arith.constant dense<0.000000e+00> : vector<8x80xf32>
    %34 = tpu.matmul %33, %31, %cst_33 {dimension_numbers = #tpu.dot_dimension_numbers<[1], [0], [0], [1], [0, 0, 1, 1], [], []>} : vector<8x16xbf16>, vector<16x80xbf16>, vector<8x80xf32> -> vector<8x80xf32>
    %35 = arith.addf %29, %34 : vector<8x80xf32>
    %c0_34 = arith.constant 0 : index
    %c0_35 = arith.constant 0 : index
    %c20 = arith.constant 20 : index
    %36 = vector.load %arg1[%c0_34, %c0_35, %c20] : memref<1x16x102xbf16, #tpu.memory_space<vmem>>, vector<1x16x80xbf16>
    %37 = vector.shape_cast %36 : vector<1x16x80xbf16> to vector<16x80xbf16>
    %c6 = arith.constant 6 : index
    %c0_36 = arith.constant 0 : index
    %c0_37 = arith.constant 0 : index
    %38 = vector.load %arg2[%c6, %c0_36, %c0_37] : memref<9x8x16xbf16, #tpu.memory_space<vmem>>, vector<1x8x16xbf16>
    %39 = vector.shape_cast %38 : vector<1x8x16xbf16> to vector<8x16xbf16>
    %cst_38 = arith.constant dense<0.000000e+00> : vector<8x80xf32>
    %40 = tpu.matmul %39, %37, %cst_38 {dimension_numbers = #tpu.dot_dimension_numbers<[1], [0], [0], [1], [0, 0, 1, 1], [], []>} : vector<8x16xbf16>, vector<16x80xbf16>, vector<8x80xf32> -> vector<8x80xf32>
    %41 = arith.addf %35, %40 : vector<8x80xf32>
    %c0_39 = arith.constant 0 : index
    %c0_40 = arith.constant 0 : index
    %c21 = arith.constant 21 : index
    %42 = vector.load %arg1[%c0_39, %c0_40, %c21] : memref<1x16x102xbf16, #tpu.memory_space<vmem>>, vector<1x16x80xbf16>
    %43 = vector.shape_cast %42 : vector<1x16x80xbf16> to vector<16x80xbf16>
    %c7 = arith.constant 7 : index
    %c0_41 = arith.constant 0 : index
    %c0_42 = arith.constant 0 : index
    %44 = vector.load %arg2[%c7, %c0_41, %c0_42] : memref<9x8x16xbf16, #tpu.memory_space<vmem>>, vector<1x8x16xbf16>
    %45 = vector.shape_cast %44 : vector<1x8x16xbf16> to vector<8x16xbf16>
    %cst_43 = arith.constant dense<0.000000e+00> : vector<8x80xf32>
    %46 = tpu.matmul %45, %43, %cst_43 {dimension_numbers = #tpu.dot_dimension_numbers<[1], [0], [0], [1], [0, 0, 1, 1], [], []>} : vector<8x16xbf16>, vector<16x80xbf16>, vector<8x80xf32> -> vector<8x80xf32>
    %47 = arith.addf %41, %46 : vector<8x80xf32>
    %c0_44 = arith.constant 0 : index
    %c0_45 = arith.constant 0 : index
    %c22 = arith.constant 22 : index
    %48 = vector.load %arg1[%c0_44, %c0_45, %c22] : memref<1x16x102xbf16, #tpu.memory_space<vmem>>, vector<1x16x80xbf16>
    %49 = vector.shape_cast %48 : vector<1x16x80xbf16> to vector<16x80xbf16>
    %c8 = arith.constant 8 : index
    %c0_46 = arith.constant 0 : index
    %c0_47 = arith.constant 0 : index
    %50 = vector.load %arg2[%c8, %c0_46, %c0_47] : memref<9x8x16xbf16, #tpu.memory_space<vmem>>, vector<1x8x16xbf16>
    %51 = vector.shape_cast %50 : vector<1x8x16xbf16> to vector<8x16xbf16>
    %cst_48 = arith.constant dense<0.000000e+00> : vector<8x80xf32>
    %52 = tpu.matmul %51, %49, %cst_48 {dimension_numbers = #tpu.dot_dimension_numbers<[1], [0], [0], [1], [0, 0, 1, 1], [], []>} : vector<8x16xbf16>, vector<16x80xbf16>, vector<8x80xf32> -> vector<8x80xf32>
    %53 = arith.addf %47, %52 : vector<8x80xf32>
    %54 = vector.broadcast %0 : vector<8x1xf32> to vector<8x80xf32>
    %55 = arith.addf %53, %54 : vector<8x80xf32>
    %cst_49 = arith.constant 0.000000e+00 : f32
    %56 = vector.broadcast %cst_49 : f32 to vector<8x80xf32>
    %57 = arith.maximumf %55, %56 : vector<8x80xf32>
    %58 = arith.truncf %57 : vector<8x80xf32> to vector<8x80xbf16>
    %c0_50 = arith.constant 0 : index
    %c0_51 = arith.constant 0 : index
    %c0_52 = arith.constant 0 : index
    %c0_53 = arith.constant 0 : index
    %59 = vector.load %arg4[%c0_50, %c0_51, %c0_52, %c0_53] : memref<1x1x8x80xbf16, #tpu.memory_space<vmem>>, vector<1x1x8x80xbf16>
    %60 = vector.shape_cast %59 : vector<1x1x8x80xbf16> to vector<8x80xbf16>
    %61 = vector.shape_cast %58 : vector<8x80xbf16> to vector<1x1x8x80xbf16>
    tpu.vector_store %arg4[%c0_50, %c0_51, %c0_52, %c0_53], %61 {strides = array<i32>} : memref<1x1x8x80xbf16, #tpu.memory_space<vmem>>, vector<1x1x8x80xbf16>,
    return
  }
  func.func @transform_0(%arg0: i32) -> (i32, i32, i32) {
    %c0_i32 = arith.constant 0 : i32
    %c0_i32_0 = arith.constant 0 : i32
    %c0_i32_1 = arith.constant 0 : i32
    return %arg0, %c0_i32, %c0_i32_0 : i32, i32, i32
  }
  func.func @transform_1(%arg0: i32) -> (i32, i32, i32) {
    %c0_i32 = arith.constant 0 : i32
    %c0_i32_0 = arith.constant 0 : i32
    %c0_i32_1 = arith.constant 0 : i32
    %c0_i32_2 = arith.constant 0 : i32
    return %c0_i32, %c0_i32_0, %c0_i32_1 : i32, i32, i32
  }
  func.func @transform_2(%arg0: i32) -> (i32, i32) {
    %c0_i32 = arith.constant 0 : i32
    %c0_i32_0 = arith.constant 0 : i32
    %c0_i32_1 = arith.constant 0 : i32
    return %c0_i32, %c0_i32_0 : i32, i32
  }
  func.func @transform_3(%arg0: i32) -> (i32, i32, i32, i32) {
    %c0_i32 = arith.constant 0 : i32
    %c0_i32_0 = arith.constant 0 : i32
    %c0_i32_1 = arith.constant 0 : i32
    %c0_i32_2 = arith.constant 0 : i32
    return %arg0, %c0_i32, %c0_i32_0, %c0_i32_1 : i32, i32, i32, i32
  }
}

module attributes {stable_mosaic.version = 11 : i64} {
  func.func @_tap_matmul_kernel(%arg0: i32, %arg1: memref<1x8x82xbf16, #tpu.memory_space<vmem>>, %arg2: memref<9x4x8xbf16, #tpu.memory_space<vmem>>, %arg3: memref<4x1xf32, #tpu.memory_space<vmem>>, %arg4: memref<1x4x4x72xbf16, #tpu.memory_space<vmem>>) attributes {dimension_semantics = [#tpu.dimension_semantics<parallel>], iteration_bounds = array<i64: 2>, scalar_prefetch = 0 : i64, scratch_operands = 0 : i64, tpu.core_type = #tpu.core_type<tc>, window_params = [{transform_indices = @transform_0, window_bounds = array<i64: 1, 8, 82>}, {pipeline_mode = #tpu.pipeline_mode<synchronous>, transform_indices = @transform_1, window_bounds = array<i64: 9, 4, 8>}, {pipeline_mode = #tpu.pipeline_mode<synchronous>, transform_indices = @transform_2, window_bounds = array<i64: 4, 1>}, {transform_indices = @transform_3, window_bounds = array<i64: 1, 4, 4, 72>}]} {
    %c0 = arith.constant 0 : index
    %c0_0 = arith.constant 0 : index
    %0 = vector.load %arg3[%c0, %c0_0] : memref<4x1xf32, #tpu.memory_space<vmem>>, vector<4x1xf32>
    %c0_1 = arith.constant 0 : index
    %c0_2 = arith.constant 0 : index
    %c0_3 = arith.constant 0 : index
    %1 = vector.load %arg1[%c0_1, %c0_2, %c0_3] : memref<1x8x82xbf16, #tpu.memory_space<vmem>>, vector<1x8x72xbf16>
    %2 = vector.shape_cast %1 : vector<1x8x72xbf16> to vector<8x72xbf16>
    %c0_4 = arith.constant 0 : index
    %c0_5 = arith.constant 0 : index
    %c0_6 = arith.constant 0 : index
    %3 = vector.load %arg2[%c0_4, %c0_5, %c0_6] : memref<9x4x8xbf16, #tpu.memory_space<vmem>>, vector<1x4x8xbf16>
    %4 = vector.shape_cast %3 : vector<1x4x8xbf16> to vector<4x8xbf16>
    %cst = arith.constant dense<0.000000e+00> : vector<4x72xf32>
    %5 = tpu.matmul %4, %2, %cst {dimension_numbers = #tpu.dot_dimension_numbers<[1], [0], [0], [1], [0, 0, 1, 1], [], []>} : vector<4x8xbf16>, vector<8x72xbf16>, vector<4x72xf32> -> vector<4x72xf32>
    %6 = vector.broadcast %0 : vector<4x1xf32> to vector<4x72xf32>
    %7 = arith.addf %5, %6 : vector<4x72xf32>
    %cst_7 = arith.constant 0.000000e+00 : f32
    %8 = vector.broadcast %cst_7 : f32 to vector<4x72xf32>
    %9 = arith.maximumf %7, %8 : vector<4x72xf32>
    %10 = arith.truncf %9 : vector<4x72xf32> to vector<4x72xbf16>
    %c0_8 = arith.constant 0 : index
    %c0_9 = arith.constant 0 : index
    %c0_10 = arith.constant 0 : index
    %c0_11 = arith.constant 0 : index
    %11 = vector.load %arg4[%c0_8, %c0_9, %c0_10, %c0_11] : memref<1x4x4x72xbf16, #tpu.memory_space<vmem>>, vector<1x1x4x72xbf16>
    %12 = vector.shape_cast %11 : vector<1x1x4x72xbf16> to vector<4x72xbf16>
    %13 = vector.shape_cast %10 : vector<4x72xbf16> to vector<1x1x4x72xbf16>
    tpu.vector_store %arg4[%c0_8, %c0_9, %c0_10, %c0_11], %13 {strides = array<i32>} : memref<1x4x4x72xbf16, #tpu.memory_space<vmem>>, vector<1x1x4x72xbf16>,
    %c0_12 = arith.constant 0 : index
    %c0_13 = arith.constant 0 : index
    %c0_14 = arith.constant 0 : index
    %14 = vector.load %arg1[%c0_12, %c0_13, %c0_14] : memref<1x8x82xbf16, #tpu.memory_space<vmem>>, vector<1x8x72xbf16>
    %15 = vector.shape_cast %14 : vector<1x8x72xbf16> to vector<8x72xbf16>
    %c1 = arith.constant 1 : index
    %c0_15 = arith.constant 0 : index
    %c0_16 = arith.constant 0 : index
    %16 = vector.load %arg2[%c1, %c0_15, %c0_16] : memref<9x4x8xbf16, #tpu.memory_space<vmem>>, vector<1x4x8xbf16>
    %17 = vector.shape_cast %16 : vector<1x4x8xbf16> to vector<4x8xbf16>
    %cst_17 = arith.constant dense<0.000000e+00> : vector<4x72xf32>
    %18 = tpu.matmul %17, %15, %cst_17 {dimension_numbers = #tpu.dot_dimension_numbers<[1], [0], [0], [1], [0, 0, 1, 1], [], []>} : vector<4x8xbf16>, vector<8x72xbf16>, vector<4x72xf32> -> vector<4x72xf32>
    %c0_18 = arith.constant 0 : index
    %c0_19 = arith.constant 0 : index
    %c1_20 = arith.constant 1 : index
    %19 = vector.load %arg1[%c0_18, %c0_19, %c1_20] : memref<1x8x82xbf16, #tpu.memory_space<vmem>>, vector<1x8x72xbf16>
    %20 = vector.shape_cast %19 : vector<1x8x72xbf16> to vector<8x72xbf16>
    %c2 = arith.constant 2 : index
    %c0_21 = arith.constant 0 : index
    %c0_22 = arith.constant 0 : index
    %21 = vector.load %arg2[%c2, %c0_21, %c0_22] : memref<9x4x8xbf16, #tpu.memory_space<vmem>>, vector<1x4x8xbf16>
    %22 = vector.shape_cast %21 : vector<1x4x8xbf16> to vector<4x8xbf16>
    %cst_23 = arith.constant dense<0.000000e+00> : vector<4x72xf32>
    %23 = tpu.matmul %22, %20, %cst_23 {dimension_numbers = #tpu.dot_dimension_numbers<[1], [0], [0], [1], [0, 0, 1, 1], [], []>} : vector<4x8xbf16>, vector<8x72xbf16>, vector<4x72xf32> -> vector<4x72xf32>
    %24 = arith.addf %18, %23 : vector<4x72xf32>
    %25 = vector.broadcast %0 : vector<4x1xf32> to vector<4x72xf32>
    %26 = arith.addf %24, %25 : vector<4x72xf32>
    %cst_24 = arith.constant 0.000000e+00 : f32
    %27 = vector.broadcast %cst_24 : f32 to vector<4x72xf32>
    %28 = arith.maximumf %26, %27 : vector<4x72xf32>
    %29 = arith.truncf %28 : vector<4x72xf32> to vector<4x72xbf16>
    %c0_25 = arith.constant 0 : index
    %c1_26 = arith.constant 1 : index
    %c0_27 = arith.constant 0 : index
    %c0_28 = arith.constant 0 : index
    %30 = vector.load %arg4[%c0_25, %c1_26, %c0_27, %c0_28] : memref<1x4x4x72xbf16, #tpu.memory_space<vmem>>, vector<1x1x4x72xbf16>
    %31 = vector.shape_cast %30 : vector<1x1x4x72xbf16> to vector<4x72xbf16>
    %32 = vector.shape_cast %29 : vector<4x72xbf16> to vector<1x1x4x72xbf16>
    tpu.vector_store %arg4[%c0_25, %c1_26, %c0_27, %c0_28], %32 {strides = array<i32>} : memref<1x4x4x72xbf16, #tpu.memory_space<vmem>>, vector<1x1x4x72xbf16>,
    %c0_29 = arith.constant 0 : index
    %c0_30 = arith.constant 0 : index
    %c0_31 = arith.constant 0 : index
    %33 = vector.load %arg1[%c0_29, %c0_30, %c0_31] : memref<1x8x82xbf16, #tpu.memory_space<vmem>>, vector<1x8x72xbf16>
    %34 = vector.shape_cast %33 : vector<1x8x72xbf16> to vector<8x72xbf16>
    %c3 = arith.constant 3 : index
    %c0_32 = arith.constant 0 : index
    %c0_33 = arith.constant 0 : index
    %35 = vector.load %arg2[%c3, %c0_32, %c0_33] : memref<9x4x8xbf16, #tpu.memory_space<vmem>>, vector<1x4x8xbf16>
    %36 = vector.shape_cast %35 : vector<1x4x8xbf16> to vector<4x8xbf16>
    %cst_34 = arith.constant dense<0.000000e+00> : vector<4x72xf32>
    %37 = tpu.matmul %36, %34, %cst_34 {dimension_numbers = #tpu.dot_dimension_numbers<[1], [0], [0], [1], [0, 0, 1, 1], [], []>} : vector<4x8xbf16>, vector<8x72xbf16>, vector<4x72xf32> -> vector<4x72xf32>
    %c0_35 = arith.constant 0 : index
    %c0_36 = arith.constant 0 : index
    %c9 = arith.constant 9 : index
    %38 = vector.load %arg1[%c0_35, %c0_36, %c9] : memref<1x8x82xbf16, #tpu.memory_space<vmem>>, vector<1x8x72xbf16>
    %39 = vector.shape_cast %38 : vector<1x8x72xbf16> to vector<8x72xbf16>
    %c4 = arith.constant 4 : index
    %c0_37 = arith.constant 0 : index
    %c0_38 = arith.constant 0 : index
    %40 = vector.load %arg2[%c4, %c0_37, %c0_38] : memref<9x4x8xbf16, #tpu.memory_space<vmem>>, vector<1x4x8xbf16>
    %41 = vector.shape_cast %40 : vector<1x4x8xbf16> to vector<4x8xbf16>
    %cst_39 = arith.constant dense<0.000000e+00> : vector<4x72xf32>
    %42 = tpu.matmul %41, %39, %cst_39 {dimension_numbers = #tpu.dot_dimension_numbers<[1], [0], [0], [1], [0, 0, 1, 1], [], []>} : vector<4x8xbf16>, vector<8x72xbf16>, vector<4x72xf32> -> vector<4x72xf32>
    %43 = arith.addf %37, %42 : vector<4x72xf32>
    %44 = vector.broadcast %0 : vector<4x1xf32> to vector<4x72xf32>
    %45 = arith.addf %43, %44 : vector<4x72xf32>
    %cst_40 = arith.constant 0.000000e+00 : f32
    %46 = vector.broadcast %cst_40 : f32 to vector<4x72xf32>
    %47 = arith.maximumf %45, %46 : vector<4x72xf32>
    %48 = arith.truncf %47 : vector<4x72xf32> to vector<4x72xbf16>
    %c0_41 = arith.constant 0 : index
    %c2_42 = arith.constant 2 : index
    %c0_43 = arith.constant 0 : index
    %c0_44 = arith.constant 0 : index
    %49 = vector.load %arg4[%c0_41, %c2_42, %c0_43, %c0_44] : memref<1x4x4x72xbf16, #tpu.memory_space<vmem>>, vector<1x1x4x72xbf16>
    %50 = vector.shape_cast %49 : vector<1x1x4x72xbf16> to vector<4x72xbf16>
    %51 = vector.shape_cast %48 : vector<4x72xbf16> to vector<1x1x4x72xbf16>
    tpu.vector_store %arg4[%c0_41, %c2_42, %c0_43, %c0_44], %51 {strides = array<i32>} : memref<1x4x4x72xbf16, #tpu.memory_space<vmem>>, vector<1x1x4x72xbf16>,
    %c0_45 = arith.constant 0 : index
    %c0_46 = arith.constant 0 : index
    %c0_47 = arith.constant 0 : index
    %52 = vector.load %arg1[%c0_45, %c0_46, %c0_47] : memref<1x8x82xbf16, #tpu.memory_space<vmem>>, vector<1x8x72xbf16>
    %53 = vector.shape_cast %52 : vector<1x8x72xbf16> to vector<8x72xbf16>
    %c5 = arith.constant 5 : index
    %c0_48 = arith.constant 0 : index
    %c0_49 = arith.constant 0 : index
    %54 = vector.load %arg2[%c5, %c0_48, %c0_49] : memref<9x4x8xbf16, #tpu.memory_space<vmem>>, vector<1x4x8xbf16>
    %55 = vector.shape_cast %54 : vector<1x4x8xbf16> to vector<4x8xbf16>
    %cst_50 = arith.constant dense<0.000000e+00> : vector<4x72xf32>
    %56 = tpu.matmul %55, %53, %cst_50 {dimension_numbers = #tpu.dot_dimension_numbers<[1], [0], [0], [1], [0, 0, 1, 1], [], []>} : vector<4x8xbf16>, vector<8x72xbf16>, vector<4x72xf32> -> vector<4x72xf32>
    %c0_51 = arith.constant 0 : index
    %c0_52 = arith.constant 0 : index
    %c1_53 = arith.constant 1 : index
    %57 = vector.load %arg1[%c0_51, %c0_52, %c1_53] : memref<1x8x82xbf16, #tpu.memory_space<vmem>>, vector<1x8x72xbf16>
    %58 = vector.shape_cast %57 : vector<1x8x72xbf16> to vector<8x72xbf16>
    %c6 = arith.constant 6 : index
    %c0_54 = arith.constant 0 : index
    %c0_55 = arith.constant 0 : index
    %59 = vector.load %arg2[%c6, %c0_54, %c0_55] : memref<9x4x8xbf16, #tpu.memory_space<vmem>>, vector<1x4x8xbf16>
    %60 = vector.shape_cast %59 : vector<1x4x8xbf16> to vector<4x8xbf16>
    %cst_56 = arith.constant dense<0.000000e+00> : vector<4x72xf32>
    %61 = tpu.matmul %60, %58, %cst_56 {dimension_numbers = #tpu.dot_dimension_numbers<[1], [0], [0], [1], [0, 0, 1, 1], [], []>} : vector<4x8xbf16>, vector<8x72xbf16>, vector<4x72xf32> -> vector<4x72xf32>
    %62 = arith.addf %56, %61 : vector<4x72xf32>
    %c0_57 = arith.constant 0 : index
    %c0_58 = arith.constant 0 : index
    %c9_59 = arith.constant 9 : index
    %63 = vector.load %arg1[%c0_57, %c0_58, %c9_59] : memref<1x8x82xbf16, #tpu.memory_space<vmem>>, vector<1x8x72xbf16>
    %64 = vector.shape_cast %63 : vector<1x8x72xbf16> to vector<8x72xbf16>
    %c7 = arith.constant 7 : index
    %c0_60 = arith.constant 0 : index
    %c0_61 = arith.constant 0 : index
    %65 = vector.load %arg2[%c7, %c0_60, %c0_61] : memref<9x4x8xbf16, #tpu.memory_space<vmem>>, vector<1x4x8xbf16>
    %66 = vector.shape_cast %65 : vector<1x4x8xbf16> to vector<4x8xbf16>
    %cst_62 = arith.constant dense<0.000000e+00> : vector<4x72xf32>
    %67 = tpu.matmul %66, %64, %cst_62 {dimension_numbers = #tpu.dot_dimension_numbers<[1], [0], [0], [1], [0, 0, 1, 1], [], []>} : vector<4x8xbf16>, vector<8x72xbf16>, vector<4x72xf32> -> vector<4x72xf32>
    %68 = arith.addf %62, %67 : vector<4x72xf32>
    %c0_63 = arith.constant 0 : index
    %c0_64 = arith.constant 0 : index
    %c10 = arith.constant 10 : index
    %69 = vector.load %arg1[%c0_63, %c0_64, %c10] : memref<1x8x82xbf16, #tpu.memory_space<vmem>>, vector<1x8x72xbf16>
    %70 = vector.shape_cast %69 : vector<1x8x72xbf16> to vector<8x72xbf16>
    %c8 = arith.constant 8 : index
    %c0_65 = arith.constant 0 : index
    %c0_66 = arith.constant 0 : index
    %71 = vector.load %arg2[%c8, %c0_65, %c0_66] : memref<9x4x8xbf16, #tpu.memory_space<vmem>>, vector<1x4x8xbf16>
    %72 = vector.shape_cast %71 : vector<1x4x8xbf16> to vector<4x8xbf16>
    %cst_67 = arith.constant dense<0.000000e+00> : vector<4x72xf32>
    %73 = tpu.matmul %72, %70, %cst_67 {dimension_numbers = #tpu.dot_dimension_numbers<[1], [0], [0], [1], [0, 0, 1, 1], [], []>} : vector<4x8xbf16>, vector<8x72xbf16>, vector<4x72xf32> -> vector<4x72xf32>
    %74 = arith.addf %68, %73 : vector<4x72xf32>
    %75 = vector.broadcast %0 : vector<4x1xf32> to vector<4x72xf32>
    %76 = arith.addf %74, %75 : vector<4x72xf32>
    %cst_68 = arith.constant 0.000000e+00 : f32
    %77 = vector.broadcast %cst_68 : f32 to vector<4x72xf32>
    %78 = arith.maximumf %76, %77 : vector<4x72xf32>
    %79 = arith.truncf %78 : vector<4x72xf32> to vector<4x72xbf16>
    %c0_69 = arith.constant 0 : index
    %c3_70 = arith.constant 3 : index
    %c0_71 = arith.constant 0 : index
    %c0_72 = arith.constant 0 : index
    %80 = vector.load %arg4[%c0_69, %c3_70, %c0_71, %c0_72] : memref<1x4x4x72xbf16, #tpu.memory_space<vmem>>, vector<1x1x4x72xbf16>
    %81 = vector.shape_cast %80 : vector<1x1x4x72xbf16> to vector<4x72xbf16>
    %82 = vector.shape_cast %79 : vector<4x72xbf16> to vector<1x1x4x72xbf16>
    tpu.vector_store %arg4[%c0_69, %c3_70, %c0_71, %c0_72], %82 {strides = array<i32>} : memref<1x4x4x72xbf16, #tpu.memory_space<vmem>>, vector<1x1x4x72xbf16>,
    return
  }
  func.func @transform_0(%arg0: i32) -> (i32, i32, i32) {
    %c0_i32 = arith.constant 0 : i32
    %c0_i32_0 = arith.constant 0 : i32
    %c0_i32_1 = arith.constant 0 : i32
    return %arg0, %c0_i32, %c0_i32_0 : i32, i32, i32
  }
  func.func @transform_1(%arg0: i32) -> (i32, i32, i32) {
    %c0_i32 = arith.constant 0 : i32
    %c0_i32_0 = arith.constant 0 : i32
    %c0_i32_1 = arith.constant 0 : i32
    %c0_i32_2 = arith.constant 0 : i32
    return %c0_i32, %c0_i32_0, %c0_i32_1 : i32, i32, i32
  }
  func.func @transform_2(%arg0: i32) -> (i32, i32) {
    %c0_i32 = arith.constant 0 : i32
    %c0_i32_0 = arith.constant 0 : i32
    %c0_i32_1 = arith.constant 0 : i32
    return %c0_i32, %c0_i32_0 : i32, i32
  }
  func.func @transform_3(%arg0: i32) -> (i32, i32, i32, i32) {
    %c0_i32 = arith.constant 0 : i32
    %c0_i32_0 = arith.constant 0 : i32
    %c0_i32_1 = arith.constant 0 : i32
    %c0_i32_2 = arith.constant 0 : i32
    return %arg0, %c0_i32, %c0_i32_0, %c0_i32_1 : i32, i32, i32, i32
  }
}

module attributes {stable_mosaic.version = 11 : i64} {
  func.func @_tap_matmul_kernel(%arg0: i32, %arg1: memref<1x8x326xbf16, #tpu.memory_space<vmem>>, %arg2: memref<9x4x8xbf16, #tpu.memory_space<vmem>>, %arg3: memref<4x1xf32, #tpu.memory_space<vmem>>, %arg4: memref<1x1x4x288xbf16, #tpu.memory_space<vmem>>) attributes {dimension_semantics = [#tpu.dimension_semantics<parallel>], iteration_bounds = array<i64: 2>, scalar_prefetch = 0 : i64, scratch_operands = 0 : i64, tpu.core_type = #tpu.core_type<tc>, window_params = [{transform_indices = @transform_0, window_bounds = array<i64: 1, 8, 326>}, {pipeline_mode = #tpu.pipeline_mode<synchronous>, transform_indices = @transform_1, window_bounds = array<i64: 9, 4, 8>}, {pipeline_mode = #tpu.pipeline_mode<synchronous>, transform_indices = @transform_2, window_bounds = array<i64: 4, 1>}, {transform_indices = @transform_3, window_bounds = array<i64: 1, 1, 4, 288>}]} {
    %c0 = arith.constant 0 : index
    %c0_0 = arith.constant 0 : index
    %0 = vector.load %arg3[%c0, %c0_0] : memref<4x1xf32, #tpu.memory_space<vmem>>, vector<4x1xf32>
    %c0_1 = arith.constant 0 : index
    %c0_2 = arith.constant 0 : index
    %c0_3 = arith.constant 0 : index
    %1 = vector.load %arg1[%c0_1, %c0_2, %c0_3] : memref<1x8x326xbf16, #tpu.memory_space<vmem>>, vector<1x8x288xbf16>
    %2 = vector.shape_cast %1 : vector<1x8x288xbf16> to vector<8x288xbf16>
    %c0_4 = arith.constant 0 : index
    %c0_5 = arith.constant 0 : index
    %c0_6 = arith.constant 0 : index
    %3 = vector.load %arg2[%c0_4, %c0_5, %c0_6] : memref<9x4x8xbf16, #tpu.memory_space<vmem>>, vector<1x4x8xbf16>
    %4 = vector.shape_cast %3 : vector<1x4x8xbf16> to vector<4x8xbf16>
    %cst = arith.constant dense<0.000000e+00> : vector<4x288xf32>
    %5 = tpu.matmul %4, %2, %cst {dimension_numbers = #tpu.dot_dimension_numbers<[1], [0], [0], [1], [0, 0, 1, 1], [], []>} : vector<4x8xbf16>, vector<8x288xbf16>, vector<4x288xf32> -> vector<4x288xf32>
    %c0_7 = arith.constant 0 : index
    %c0_8 = arith.constant 0 : index
    %c1 = arith.constant 1 : index
    %6 = vector.load %arg1[%c0_7, %c0_8, %c1] : memref<1x8x326xbf16, #tpu.memory_space<vmem>>, vector<1x8x288xbf16>
    %7 = vector.shape_cast %6 : vector<1x8x288xbf16> to vector<8x288xbf16>
    %c1_9 = arith.constant 1 : index
    %c0_10 = arith.constant 0 : index
    %c0_11 = arith.constant 0 : index
    %8 = vector.load %arg2[%c1_9, %c0_10, %c0_11] : memref<9x4x8xbf16, #tpu.memory_space<vmem>>, vector<1x4x8xbf16>
    %9 = vector.shape_cast %8 : vector<1x4x8xbf16> to vector<4x8xbf16>
    %cst_12 = arith.constant dense<0.000000e+00> : vector<4x288xf32>
    %10 = tpu.matmul %9, %7, %cst_12 {dimension_numbers = #tpu.dot_dimension_numbers<[1], [0], [0], [1], [0, 0, 1, 1], [], []>} : vector<4x8xbf16>, vector<8x288xbf16>, vector<4x288xf32> -> vector<4x288xf32>
    %11 = arith.addf %5, %10 : vector<4x288xf32>
    %c0_13 = arith.constant 0 : index
    %c0_14 = arith.constant 0 : index
    %c2 = arith.constant 2 : index
    %12 = vector.load %arg1[%c0_13, %c0_14, %c2] : memref<1x8x326xbf16, #tpu.memory_space<vmem>>, vector<1x8x288xbf16>
    %13 = vector.shape_cast %12 : vector<1x8x288xbf16> to vector<8x288xbf16>
    %c2_15 = arith.constant 2 : index
    %c0_16 = arith.constant 0 : index
    %c0_17 = arith.constant 0 : index
    %14 = vector.load %arg2[%c2_15, %c0_16, %c0_17] : memref<9x4x8xbf16, #tpu.memory_space<vmem>>, vector<1x4x8xbf16>
    %15 = vector.shape_cast %14 : vector<1x4x8xbf16> to vector<4x8xbf16>
    %cst_18 = arith.constant dense<0.000000e+00> : vector<4x288xf32>
    %16 = tpu.matmul %15, %13, %cst_18 {dimension_numbers = #tpu.dot_dimension_numbers<[1], [0], [0], [1], [0, 0, 1, 1], [], []>} : vector<4x8xbf16>, vector<8x288xbf16>, vector<4x288xf32> -> vector<4x288xf32>
    %17 = arith.addf %11, %16 : vector<4x288xf32>
    %c0_19 = arith.constant 0 : index
    %c0_20 = arith.constant 0 : index
    %c18 = arith.constant 18 : index
    %18 = vector.load %arg1[%c0_19, %c0_20, %c18] : memref<1x8x326xbf16, #tpu.memory_space<vmem>>, vector<1x8x288xbf16>
    %19 = vector.shape_cast %18 : vector<1x8x288xbf16> to vector<8x288xbf16>
    %c3 = arith.constant 3 : index
    %c0_21 = arith.constant 0 : index
    %c0_22 = arith.constant 0 : index
    %20 = vector.load %arg2[%c3, %c0_21, %c0_22] : memref<9x4x8xbf16, #tpu.memory_space<vmem>>, vector<1x4x8xbf16>
    %21 = vector.shape_cast %20 : vector<1x4x8xbf16> to vector<4x8xbf16>
    %cst_23 = arith.constant dense<0.000000e+00> : vector<4x288xf32>
    %22 = tpu.matmul %21, %19, %cst_23 {dimension_numbers = #tpu.dot_dimension_numbers<[1], [0], [0], [1], [0, 0, 1, 1], [], []>} : vector<4x8xbf16>, vector<8x288xbf16>, vector<4x288xf32> -> vector<4x288xf32>
    %23 = arith.addf %17, %22 : vector<4x288xf32>
    %c0_24 = arith.constant 0 : index
    %c0_25 = arith.constant 0 : index
    %c19 = arith.constant 19 : index
    %24 = vector.load %arg1[%c0_24, %c0_25, %c19] : memref<1x8x326xbf16, #tpu.memory_space<vmem>>, vector<1x8x288xbf16>
    %25 = vector.shape_cast %24 : vector<1x8x288xbf16> to vector<8x288xbf16>
    %c4 = arith.constant 4 : index
    %c0_26 = arith.constant 0 : index
    %c0_27 = arith.constant 0 : index
    %26 = vector.load %arg2[%c4, %c0_26, %c0_27] : memref<9x4x8xbf16, #tpu.memory_space<vmem>>, vector<1x4x8xbf16>
    %27 = vector.shape_cast %26 : vector<1x4x8xbf16> to vector<4x8xbf16>
    %cst_28 = arith.constant dense<0.000000e+00> : vector<4x288xf32>
    %28 = tpu.matmul %27, %25, %cst_28 {dimension_numbers = #tpu.dot_dimension_numbers<[1], [0], [0], [1], [0, 0, 1, 1], [], []>} : vector<4x8xbf16>, vector<8x288xbf16>, vector<4x288xf32> -> vector<4x288xf32>
    %29 = arith.addf %23, %28 : vector<4x288xf32>
    %c0_29 = arith.constant 0 : index
    %c0_30 = arith.constant 0 : index
    %c20 = arith.constant 20 : index
    %30 = vector.load %arg1[%c0_29, %c0_30, %c20] : memref<1x8x326xbf16, #tpu.memory_space<vmem>>, vector<1x8x288xbf16>
    %31 = vector.shape_cast %30 : vector<1x8x288xbf16> to vector<8x288xbf16>
    %c5 = arith.constant 5 : index
    %c0_31 = arith.constant 0 : index
    %c0_32 = arith.constant 0 : index
    %32 = vector.load %arg2[%c5, %c0_31, %c0_32] : memref<9x4x8xbf16, #tpu.memory_space<vmem>>, vector<1x4x8xbf16>
    %33 = vector.shape_cast %32 : vector<1x4x8xbf16> to vector<4x8xbf16>
    %cst_33 = arith.constant dense<0.000000e+00> : vector<4x288xf32>
    %34 = tpu.matmul %33, %31, %cst_33 {dimension_numbers = #tpu.dot_dimension_numbers<[1], [0], [0], [1], [0, 0, 1, 1], [], []>} : vector<4x8xbf16>, vector<8x288xbf16>, vector<4x288xf32> -> vector<4x288xf32>
    %35 = arith.addf %29, %34 : vector<4x288xf32>
    %c0_34 = arith.constant 0 : index
    %c0_35 = arith.constant 0 : index
    %c36 = arith.constant 36 : index
    %36 = vector.load %arg1[%c0_34, %c0_35, %c36] : memref<1x8x326xbf16, #tpu.memory_space<vmem>>, vector<1x8x288xbf16>
    %37 = vector.shape_cast %36 : vector<1x8x288xbf16> to vector<8x288xbf16>
    %c6 = arith.constant 6 : index
    %c0_36 = arith.constant 0 : index
    %c0_37 = arith.constant 0 : index
    %38 = vector.load %arg2[%c6, %c0_36, %c0_37] : memref<9x4x8xbf16, #tpu.memory_space<vmem>>, vector<1x4x8xbf16>
    %39 = vector.shape_cast %38 : vector<1x4x8xbf16> to vector<4x8xbf16>
    %cst_38 = arith.constant dense<0.000000e+00> : vector<4x288xf32>
    %40 = tpu.matmul %39, %37, %cst_38 {dimension_numbers = #tpu.dot_dimension_numbers<[1], [0], [0], [1], [0, 0, 1, 1], [], []>} : vector<4x8xbf16>, vector<8x288xbf16>, vector<4x288xf32> -> vector<4x288xf32>
    %41 = arith.addf %35, %40 : vector<4x288xf32>
    %c0_39 = arith.constant 0 : index
    %c0_40 = arith.constant 0 : index
    %c37 = arith.constant 37 : index
    %42 = vector.load %arg1[%c0_39, %c0_40, %c37] : memref<1x8x326xbf16, #tpu.memory_space<vmem>>, vector<1x8x288xbf16>
    %43 = vector.shape_cast %42 : vector<1x8x288xbf16> to vector<8x288xbf16>
    %c7 = arith.constant 7 : index
    %c0_41 = arith.constant 0 : index
    %c0_42 = arith.constant 0 : index
    %44 = vector.load %arg2[%c7, %c0_41, %c0_42] : memref<9x4x8xbf16, #tpu.memory_space<vmem>>, vector<1x4x8xbf16>
    %45 = vector.shape_cast %44 : vector<1x4x8xbf16> to vector<4x8xbf16>
    %cst_43 = arith.constant dense<0.000000e+00> : vector<4x288xf32>
    %46 = tpu.matmul %45, %43, %cst_43 {dimension_numbers = #tpu.dot_dimension_numbers<[1], [0], [0], [1], [0, 0, 1, 1], [], []>} : vector<4x8xbf16>, vector<8x288xbf16>, vector<4x288xf32> -> vector<4x288xf32>
    %47 = arith.addf %41, %46 : vector<4x288xf32>
    %c0_44 = arith.constant 0 : index
    %c0_45 = arith.constant 0 : index
    %c38 = arith.constant 38 : index
    %48 = vector.load %arg1[%c0_44, %c0_45, %c38] : memref<1x8x326xbf16, #tpu.memory_space<vmem>>, vector<1x8x288xbf16>
    %49 = vector.shape_cast %48 : vector<1x8x288xbf16> to vector<8x288xbf16>
    %c8 = arith.constant 8 : index
    %c0_46 = arith.constant 0 : index
    %c0_47 = arith.constant 0 : index
    %50 = vector.load %arg2[%c8, %c0_46, %c0_47] : memref<9x4x8xbf16, #tpu.memory_space<vmem>>, vector<1x4x8xbf16>
    %51 = vector.shape_cast %50 : vector<1x4x8xbf16> to vector<4x8xbf16>
    %cst_48 = arith.constant dense<0.000000e+00> : vector<4x288xf32>
    %52 = tpu.matmul %51, %49, %cst_48 {dimension_numbers = #tpu.dot_dimension_numbers<[1], [0], [0], [1], [0, 0, 1, 1], [], []>} : vector<4x8xbf16>, vector<8x288xbf16>, vector<4x288xf32> -> vector<4x288xf32>
    %53 = arith.addf %47, %52 : vector<4x288xf32>
    %54 = vector.broadcast %0 : vector<4x1xf32> to vector<4x288xf32>
    %55 = arith.addf %53, %54 : vector<4x288xf32>
    %cst_49 = arith.constant 0.000000e+00 : f32
    %56 = vector.broadcast %cst_49 : f32 to vector<4x288xf32>
    %57 = arith.maximumf %55, %56 : vector<4x288xf32>
    %58 = arith.truncf %57 : vector<4x288xf32> to vector<4x288xbf16>
    %c0_50 = arith.constant 0 : index
    %c0_51 = arith.constant 0 : index
    %c0_52 = arith.constant 0 : index
    %c0_53 = arith.constant 0 : index
    %59 = vector.load %arg4[%c0_50, %c0_51, %c0_52, %c0_53] : memref<1x1x4x288xbf16, #tpu.memory_space<vmem>>, vector<1x1x4x288xbf16>
    %60 = vector.shape_cast %59 : vector<1x1x4x288xbf16> to vector<4x288xbf16>
    %61 = vector.shape_cast %58 : vector<4x288xbf16> to vector<1x1x4x288xbf16>
    tpu.vector_store %arg4[%c0_50, %c0_51, %c0_52, %c0_53], %61 {strides = array<i32>} : memref<1x1x4x288xbf16, #tpu.memory_space<vmem>>, vector<1x1x4x288xbf16>,
    return
  }
  func.func @transform_0(%arg0: i32) -> (i32, i32, i32) {
    %c0_i32 = arith.constant 0 : i32
    %c0_i32_0 = arith.constant 0 : i32
    %c0_i32_1 = arith.constant 0 : i32
    return %arg0, %c0_i32, %c0_i32_0 : i32, i32, i32
  }
  func.func @transform_1(%arg0: i32) -> (i32, i32, i32) {
    %c0_i32 = arith.constant 0 : i32
    %c0_i32_0 = arith.constant 0 : i32
    %c0_i32_1 = arith.constant 0 : i32
    %c0_i32_2 = arith.constant 0 : i32
    return %c0_i32, %c0_i32_0, %c0_i32_1 : i32, i32, i32
  }
  func.func @transform_2(%arg0: i32) -> (i32, i32) {
    %c0_i32 = arith.constant 0 : i32
    %c0_i32_0 = arith.constant 0 : i32
    %c0_i32_1 = arith.constant 0 : i32
    return %c0_i32, %c0_i32_0 : i32, i32
  }
  func.func @transform_3(%arg0: i32) -> (i32, i32, i32, i32) {
    %c0_i32 = arith.constant 0 : i32
    %c0_i32_0 = arith.constant 0 : i32
    %c0_i32_1 = arith.constant 0 : i32
    %c0_i32_2 = arith.constant 0 : i32
    return %arg0, %c0_i32, %c0_i32_0, %c0_i32_1 : i32, i32, i32, i32
  }
}

module attributes {stable_mosaic.version = 11 : i64} {
  func.func @_tap_matmul_kernel(%arg0: i32, %arg1: memref<1x4x326xbf16, #tpu.memory_space<vmem>>, %arg2: memref<9x3x4xbf16, #tpu.memory_space<vmem>>, %arg3: memref<3x1xf32, #tpu.memory_space<vmem>>, %arg4: memref<1x1x3x288xf32, #tpu.memory_space<vmem>>) attributes {dimension_semantics = [#tpu.dimension_semantics<parallel>], iteration_bounds = array<i64: 2>, scalar_prefetch = 0 : i64, scratch_operands = 0 : i64, tpu.core_type = #tpu.core_type<tc>, window_params = [{transform_indices = @transform_0, window_bounds = array<i64: 1, 4, 326>}, {pipeline_mode = #tpu.pipeline_mode<synchronous>, transform_indices = @transform_1, window_bounds = array<i64: 9, 3, 4>}, {pipeline_mode = #tpu.pipeline_mode<synchronous>, transform_indices = @transform_2, window_bounds = array<i64: 3, 1>}, {transform_indices = @transform_3, window_bounds = array<i64: 1, 1, 3, 288>}]} {
    %c0 = arith.constant 0 : index
    %c0_0 = arith.constant 0 : index
    %0 = vector.load %arg3[%c0, %c0_0] : memref<3x1xf32, #tpu.memory_space<vmem>>, vector<3x1xf32>
    %c0_1 = arith.constant 0 : index
    %c0_2 = arith.constant 0 : index
    %c0_3 = arith.constant 0 : index
    %1 = vector.load %arg1[%c0_1, %c0_2, %c0_3] : memref<1x4x326xbf16, #tpu.memory_space<vmem>>, vector<1x4x288xbf16>
    %2 = vector.shape_cast %1 : vector<1x4x288xbf16> to vector<4x288xbf16>
    %c0_4 = arith.constant 0 : index
    %c0_5 = arith.constant 0 : index
    %c0_6 = arith.constant 0 : index
    %3 = vector.load %arg2[%c0_4, %c0_5, %c0_6] : memref<9x3x4xbf16, #tpu.memory_space<vmem>>, vector<1x3x4xbf16>
    %4 = vector.shape_cast %3 : vector<1x3x4xbf16> to vector<3x4xbf16>
    %cst = arith.constant dense<0.000000e+00> : vector<3x288xf32>
    %5 = tpu.matmul %4, %2, %cst {dimension_numbers = #tpu.dot_dimension_numbers<[1], [0], [0], [1], [0, 0, 1, 1], [], []>} : vector<3x4xbf16>, vector<4x288xbf16>, vector<3x288xf32> -> vector<3x288xf32>
    %c0_7 = arith.constant 0 : index
    %c0_8 = arith.constant 0 : index
    %c1 = arith.constant 1 : index
    %6 = vector.load %arg1[%c0_7, %c0_8, %c1] : memref<1x4x326xbf16, #tpu.memory_space<vmem>>, vector<1x4x288xbf16>
    %7 = vector.shape_cast %6 : vector<1x4x288xbf16> to vector<4x288xbf16>
    %c1_9 = arith.constant 1 : index
    %c0_10 = arith.constant 0 : index
    %c0_11 = arith.constant 0 : index
    %8 = vector.load %arg2[%c1_9, %c0_10, %c0_11] : memref<9x3x4xbf16, #tpu.memory_space<vmem>>, vector<1x3x4xbf16>
    %9 = vector.shape_cast %8 : vector<1x3x4xbf16> to vector<3x4xbf16>
    %cst_12 = arith.constant dense<0.000000e+00> : vector<3x288xf32>
    %10 = tpu.matmul %9, %7, %cst_12 {dimension_numbers = #tpu.dot_dimension_numbers<[1], [0], [0], [1], [0, 0, 1, 1], [], []>} : vector<3x4xbf16>, vector<4x288xbf16>, vector<3x288xf32> -> vector<3x288xf32>
    %11 = arith.addf %5, %10 : vector<3x288xf32>
    %c0_13 = arith.constant 0 : index
    %c0_14 = arith.constant 0 : index
    %c2 = arith.constant 2 : index
    %12 = vector.load %arg1[%c0_13, %c0_14, %c2] : memref<1x4x326xbf16, #tpu.memory_space<vmem>>, vector<1x4x288xbf16>
    %13 = vector.shape_cast %12 : vector<1x4x288xbf16> to vector<4x288xbf16>
    %c2_15 = arith.constant 2 : index
    %c0_16 = arith.constant 0 : index
    %c0_17 = arith.constant 0 : index
    %14 = vector.load %arg2[%c2_15, %c0_16, %c0_17] : memref<9x3x4xbf16, #tpu.memory_space<vmem>>, vector<1x3x4xbf16>
    %15 = vector.shape_cast %14 : vector<1x3x4xbf16> to vector<3x4xbf16>
    %cst_18 = arith.constant dense<0.000000e+00> : vector<3x288xf32>
    %16 = tpu.matmul %15, %13, %cst_18 {dimension_numbers = #tpu.dot_dimension_numbers<[1], [0], [0], [1], [0, 0, 1, 1], [], []>} : vector<3x4xbf16>, vector<4x288xbf16>, vector<3x288xf32> -> vector<3x288xf32>
    %17 = arith.addf %11, %16 : vector<3x288xf32>
    %c0_19 = arith.constant 0 : index
    %c0_20 = arith.constant 0 : index
    %c18 = arith.constant 18 : index
    %18 = vector.load %arg1[%c0_19, %c0_20, %c18] : memref<1x4x326xbf16, #tpu.memory_space<vmem>>, vector<1x4x288xbf16>
    %19 = vector.shape_cast %18 : vector<1x4x288xbf16> to vector<4x288xbf16>
    %c3 = arith.constant 3 : index
    %c0_21 = arith.constant 0 : index
    %c0_22 = arith.constant 0 : index
    %20 = vector.load %arg2[%c3, %c0_21, %c0_22] : memref<9x3x4xbf16, #tpu.memory_space<vmem>>, vector<1x3x4xbf16>
    %21 = vector.shape_cast %20 : vector<1x3x4xbf16> to vector<3x4xbf16>
    %cst_23 = arith.constant dense<0.000000e+00> : vector<3x288xf32>
    %22 = tpu.matmul %21, %19, %cst_23 {dimension_numbers = #tpu.dot_dimension_numbers<[1], [0], [0], [1], [0, 0, 1, 1], [], []>} : vector<3x4xbf16>, vector<4x288xbf16>, vector<3x288xf32> -> vector<3x288xf32>
    %23 = arith.addf %17, %22 : vector<3x288xf32>
    %c0_24 = arith.constant 0 : index
    %c0_25 = arith.constant 0 : index
    %c19 = arith.constant 19 : index
    %24 = vector.load %arg1[%c0_24, %c0_25, %c19] : memref<1x4x326xbf16, #tpu.memory_space<vmem>>, vector<1x4x288xbf16>
    %25 = vector.shape_cast %24 : vector<1x4x288xbf16> to vector<4x288xbf16>
    %c4 = arith.constant 4 : index
    %c0_26 = arith.constant 0 : index
    %c0_27 = arith.constant 0 : index
    %26 = vector.load %arg2[%c4, %c0_26, %c0_27] : memref<9x3x4xbf16, #tpu.memory_space<vmem>>, vector<1x3x4xbf16>
    %27 = vector.shape_cast %26 : vector<1x3x4xbf16> to vector<3x4xbf16>
    %cst_28 = arith.constant dense<0.000000e+00> : vector<3x288xf32>
    %28 = tpu.matmul %27, %25, %cst_28 {dimension_numbers = #tpu.dot_dimension_numbers<[1], [0], [0], [1], [0, 0, 1, 1], [], []>} : vector<3x4xbf16>, vector<4x288xbf16>, vector<3x288xf32> -> vector<3x288xf32>
    %29 = arith.addf %23, %28 : vector<3x288xf32>
    %c0_29 = arith.constant 0 : index
    %c0_30 = arith.constant 0 : index
    %c20 = arith.constant 20 : index
    %30 = vector.load %arg1[%c0_29, %c0_30, %c20] : memref<1x4x326xbf16, #tpu.memory_space<vmem>>, vector<1x4x288xbf16>
    %31 = vector.shape_cast %30 : vector<1x4x288xbf16> to vector<4x288xbf16>
    %c5 = arith.constant 5 : index
    %c0_31 = arith.constant 0 : index
    %c0_32 = arith.constant 0 : index
    %32 = vector.load %arg2[%c5, %c0_31, %c0_32] : memref<9x3x4xbf16, #tpu.memory_space<vmem>>, vector<1x3x4xbf16>
    %33 = vector.shape_cast %32 : vector<1x3x4xbf16> to vector<3x4xbf16>
    %cst_33 = arith.constant dense<0.000000e+00> : vector<3x288xf32>
    %34 = tpu.matmul %33, %31, %cst_33 {dimension_numbers = #tpu.dot_dimension_numbers<[1], [0], [0], [1], [0, 0, 1, 1], [], []>} : vector<3x4xbf16>, vector<4x288xbf16>, vector<3x288xf32> -> vector<3x288xf32>
    %35 = arith.addf %29, %34 : vector<3x288xf32>
    %c0_34 = arith.constant 0 : index
    %c0_35 = arith.constant 0 : index
    %c36 = arith.constant 36 : index
    %36 = vector.load %arg1[%c0_34, %c0_35, %c36] : memref<1x4x326xbf16, #tpu.memory_space<vmem>>, vector<1x4x288xbf16>
    %37 = vector.shape_cast %36 : vector<1x4x288xbf16> to vector<4x288xbf16>
    %c6 = arith.constant 6 : index
    %c0_36 = arith.constant 0 : index
    %c0_37 = arith.constant 0 : index
    %38 = vector.load %arg2[%c6, %c0_36, %c0_37] : memref<9x3x4xbf16, #tpu.memory_space<vmem>>, vector<1x3x4xbf16>
    %39 = vector.shape_cast %38 : vector<1x3x4xbf16> to vector<3x4xbf16>
    %cst_38 = arith.constant dense<0.000000e+00> : vector<3x288xf32>
    %40 = tpu.matmul %39, %37, %cst_38 {dimension_numbers = #tpu.dot_dimension_numbers<[1], [0], [0], [1], [0, 0, 1, 1], [], []>} : vector<3x4xbf16>, vector<4x288xbf16>, vector<3x288xf32> -> vector<3x288xf32>
    %41 = arith.addf %35, %40 : vector<3x288xf32>
    %c0_39 = arith.constant 0 : index
    %c0_40 = arith.constant 0 : index
    %c37 = arith.constant 37 : index
    %42 = vector.load %arg1[%c0_39, %c0_40, %c37] : memref<1x4x326xbf16, #tpu.memory_space<vmem>>, vector<1x4x288xbf16>
    %43 = vector.shape_cast %42 : vector<1x4x288xbf16> to vector<4x288xbf16>
    %c7 = arith.constant 7 : index
    %c0_41 = arith.constant 0 : index
    %c0_42 = arith.constant 0 : index
    %44 = vector.load %arg2[%c7, %c0_41, %c0_42] : memref<9x3x4xbf16, #tpu.memory_space<vmem>>, vector<1x3x4xbf16>
    %45 = vector.shape_cast %44 : vector<1x3x4xbf16> to vector<3x4xbf16>
    %cst_43 = arith.constant dense<0.000000e+00> : vector<3x288xf32>
    %46 = tpu.matmul %45, %43, %cst_43 {dimension_numbers = #tpu.dot_dimension_numbers<[1], [0], [0], [1], [0, 0, 1, 1], [], []>} : vector<3x4xbf16>, vector<4x288xbf16>, vector<3x288xf32> -> vector<3x288xf32>
    %47 = arith.addf %41, %46 : vector<3x288xf32>
    %c0_44 = arith.constant 0 : index
    %c0_45 = arith.constant 0 : index
    %c38 = arith.constant 38 : index
    %48 = vector.load %arg1[%c0_44, %c0_45, %c38] : memref<1x4x326xbf16, #tpu.memory_space<vmem>>, vector<1x4x288xbf16>
    %49 = vector.shape_cast %48 : vector<1x4x288xbf16> to vector<4x288xbf16>
    %c8 = arith.constant 8 : index
    %c0_46 = arith.constant 0 : index
    %c0_47 = arith.constant 0 : index
    %50 = vector.load %arg2[%c8, %c0_46, %c0_47] : memref<9x3x4xbf16, #tpu.memory_space<vmem>>, vector<1x3x4xbf16>
    %51 = vector.shape_cast %50 : vector<1x3x4xbf16> to vector<3x4xbf16>
    %cst_48 = arith.constant dense<0.000000e+00> : vector<3x288xf32>
    %52 = tpu.matmul %51, %49, %cst_48 {dimension_numbers = #tpu.dot_dimension_numbers<[1], [0], [0], [1], [0, 0, 1, 1], [], []>} : vector<3x4xbf16>, vector<4x288xbf16>, vector<3x288xf32> -> vector<3x288xf32>
    %53 = arith.addf %47, %52 : vector<3x288xf32>
    %54 = vector.broadcast %0 : vector<3x1xf32> to vector<3x288xf32>
    %55 = arith.addf %53, %54 : vector<3x288xf32>
    %c0_49 = arith.constant 0 : index
    %c0_50 = arith.constant 0 : index
    %c0_51 = arith.constant 0 : index
    %c0_52 = arith.constant 0 : index
    %56 = vector.load %arg4[%c0_49, %c0_50, %c0_51, %c0_52] : memref<1x1x3x288xf32, #tpu.memory_space<vmem>>, vector<1x1x3x288xf32>
    %57 = vector.shape_cast %56 : vector<1x1x3x288xf32> to vector<3x288xf32>
    %58 = vector.shape_cast %55 : vector<3x288xf32> to vector<1x1x3x288xf32>
    tpu.vector_store %arg4[%c0_49, %c0_50, %c0_51, %c0_52], %58 {strides = array<i32>} : memref<1x1x3x288xf32, #tpu.memory_space<vmem>>, vector<1x1x3x288xf32>,
    return
  }
  func.func @transform_0(%arg0: i32) -> (i32, i32, i32) {
    %c0_i32 = arith.constant 0 : i32
    %c0_i32_0 = arith.constant 0 : i32
    %c0_i32_1 = arith.constant 0 : i32
    return %arg0, %c0_i32, %c0_i32_0 : i32, i32, i32
  }
  func.func @transform_1(%arg0: i32) -> (i32, i32, i32) {
    %c0_i32 = arith.constant 0 : i32
    %c0_i32_0 = arith.constant 0 : i32
    %c0_i32_1 = arith.constant 0 : i32
    %c0_i32_2 = arith.constant 0 : i32
    return %c0_i32, %c0_i32_0, %c0_i32_1 : i32, i32, i32
  }
  func.func @transform_2(%arg0: i32) -> (i32, i32) {
    %c0_i32 = arith.constant 0 : i32
    %c0_i32_0 = arith.constant 0 : i32
    %c0_i32_1 = arith.constant 0 : i32
    return %c0_i32, %c0_i32_0 : i32, i32
  }
  func.func @transform_3(%arg0: i32) -> (i32, i32, i32, i32) {
    %c0_i32 = arith.constant 0 : i32
    %c0_i32_0 = arith.constant 0 : i32
    %c0_i32_1 = arith.constant 0 : i32
    %c0_i32_2 = arith.constant 0 : i32
    return %arg0, %c0_i32, %c0_i32_0, %c0_i32_1 : i32, i32, i32, i32
  }
}

</mosaic_0001>

<bundles_post_ra>
// kernel: unet_forward.9
= control target key start
LH: loop header
LB: loop body
LE: loop exit
PB: predicated region body
PF: predicated region fallthrough
CT: control target
= control target key end

     0   :  { %s1547_s12 = smov 0   ;;  %s1730_s0 = inlined_call_operand.vmem [shape: bf16[2,4,326], index: 0, kind: input, shape index: {}]   ;;  %s1731_s1 = inlined_call_operand.vmem [shape: bf16[9,4,4], index: 1, kind: input, shape index: {}]   ;;  %s1732_s2 = inlined_call_operand.vmem [shape: f32[4,1], index: 2, kind: input, shape index: {}]   ;;  %s1733_s3 = inlined_call_operand.vmem [shape: bf16[2,1,4,288], index: 3, kind: output, shape index: {}]  }
   0x1 LB: > { %s1360_s13 = sadd.s32 4294967295, %s1513_s12   ;;  %p1364_p0 = scmp.ge.s32.totalorder %s1513_s12, 1  ;;  %s1513_s12 = sphi %s1547_s12, %s13_s12  }
   0x2   : > { %p137_p1 = scmp.lt.s32.totalorder %s1513_s12, 3 }
   0x4   : > { %p138_p2 = pnand %p1364_p0, %p137_p1 }
   0x5   : > { %p161_p3 = scmp.lt.s32.totalorder (!%p138_p2), %s1360_s13, 1  ;;  %v182_v0 = vlaneseq (!%p138_p2)  ;;  %v1515_v1 = vmov (!%p138_p2), 1983009808   ;;  %v1516_v3 = vmov (!%p138_p2), 0.0   ;;  %vm1517_vm0 = vmmov (!%p138_p2), 0   ;;  %s1519_s18 = smov (!%p138_p2), 127  }
   0x6   : > { %141 = sbr.rel (%p138_p2) target bundleno = 434 (0x1b2), region = 32  ;;  %v180_v2 = vunpack.c.l.s4 (!%p138_p2), %v1515_v1  ;;  %1423 = vmatprep.subr.bf16.mxu1 (!%p138_p2), %v1516_v3  ;;  %1425 = vmatprep.mubr.msk.bf16.mxu1 (!%p138_p2), %vm1517_vm0, %v1516_v3  ;;  %v1518_v6 = vmov (!%p138_p2), 0   ;;  %s1520_s19 = smov (!%p138_p2), 126   ;;  %v172_v48 = vld [vmem:[%s1732_s2] sm:$0xf] (!%p138_p2)  ;;  %vm207_vm1 = vcmask (!%p138_p2), 1041408  }
   0x7   : > { %v183_v4 = vshrl.u32 (!%p138_p2), %v182_v0, 7  ;;  %249 = vmatprep.mubr.bf16.mxu0 (!%p138_p2), %v1518_v6  ;;  %1498 = vset.pattern.permute.xlu0 (!%p138_p2), %v1518_v6  ;;  %s1521_s20 = smov (!%p138_p2), 110   ;;  %s1522_s21 = smov (!%p138_p2), 109   ;;  %vm200_vm2 = vcmask (!%p138_p2), 1039360   ;;  %v1367_v53 = vld [vmem:[%s1731_s1 + $0x2] sm:$0x3] (!%p138_p2) }
   0x8   : > { %v181_v5 = vunpack.c.0.s8 (!%p138_p2), %v180_v2  ;;  %s1523_s22 = smov (!%p138_p2), 108   ;;  %s1524_s23 = smov (!%p138_p2), 92   ;;  %vm203_vm3 = vcmask (!%p138_p2), 31744   ;;  %vm417_vm4 = vcmask (!%p138_p2), 1031168   ;;  %v174_v63 = vld [vmem:[%s1731_s1] sm:$0x3] (!%p138_p2) }
   0x9   : > { %s1525_s24 = smov (!%p138_p2), 91   ;;  %s1526_s25 = smov (!%p138_p2), 90   ;;  %vm542_vm5 = vcmask (!%p138_p2), 900096   ;;  %vm667_vm6 = vcmask (!%p138_p2), 891904   ;;  %vm792_vm7 = vcmask (!%p138_p2), 883712   ;;  %vm917_vm8 = vcmask (!%p138_p2), 752640  }
   0xa   : > { %v1563_v7 = vsub.s32 (!%p138_p2), %v181_v5, %v183_v4  ;;  %vm1042_vm9 = vcmask (!%p138_p2), 744448   ;;  %vm1167_vm10 = vcmask (!%p138_p2), 736256   ;;  %vm1300_vm11 = vcmask (!%p138_p2), 1043458  }
   0xb   : > { %vm1301_vm12 = vmor (!%p138_p2), %vm1300_vm11, %vm207_vm1  ;;  %vm1302_vm13 = vcmask (!%p138_p2), 259076  }
   0xc   : > { %vm1303_vm14 = vmor (!%p138_p2), %vm1302_vm13, %vm1301_vm12 }
   0xd   : > { %s1735_s13 = smov (!%p161_p3, %s1360_s13), 1 }
   0xe   : > { %s1477_s14 = smul.u32 6, %s1735_s13 }
  0x10   : > { %s1570_s17 = scalar_lea.vmem %s1730_s0, %s1477_s14 }
  0x11   : > { %v173_v8 = vld [vmem:[%s1570_s17] sm:$0x3f] }
  0x12   : > { %v1574_v9 = vrot.slane %v173_v8, %v1563_v7  ;;  %v178_v10 = vcombine.high %v173_v8, %v173_v8  ;;  %v391_v11 = vld [vmem:[%s1570_s17] sm:$0x3f] }
  0x13   : > { %v402_v14 = vrot.slane %v391_v11, %v1563_v7  ;;  %v395_v15 = vcombine.high %v391_v11, %v391_v11  ;;  %v516_v17 = vld [vmem:[%s1570_s17] sm:$0x3f] }
  0x14   : > { %194 = vrot.lane.b32.xlu0 %v1574_v9, %s1519_s18  ;;  %v1579_v12 = vrot.slane %v178_v10, %v1563_v7  ;;  %v1583_v13 = vcombine.high %v1574_v9, %v1574_v9  ;;  %v527_v19 = vrot.slane %v516_v17, %v1563_v7  ;;  %v520_v20 = vcombine.high %v516_v17, %v516_v17  ;;  %v641_v22 = vld [vmem:[%s1570_s17] sm:$0x3f] }
  0x15   : > { %v410_v16 = vcombine.high %v402_v14, %v402_v14  ;;  %v409_v18 = vrot.slane %v395_v15, %v1563_v7  ;;  %v652_v24 = vrot.slane %v641_v22, %v1563_v7  ;;  %v645_v25 = vcombine.high %v641_v22, %v641_v22  ;;  %v766_v27 = vld [vmem:[%s1570_s17] sm:$0x3f] }
  0x16   : > { %198 = vrot.lane.b32.xlu1 %v1579_v12, %s1519_s18  ;;  %v535_v21 = vcombine.high %v527_v19, %v527_v19  ;;  %v534_v23 = vrot.slane %v520_v20, %v1563_v7  ;;  %v777_v29 = vrot.slane %v766_v27, %v1563_v7  ;;  %v770_v30 = vcombine.high %v766_v27, %v766_v27  ;;  %v891_v32 = vld [vmem:[%s1570_s17] sm:$0x3f]  ;;  %v1378_v20 = vld [vmem:[%s1731_s1 + $0x6] sm:$0x3] }
  0x17   : > { %v660_v26 = vcombine.high %v652_v24, %v652_v24  ;;  %v659_v28 = vrot.slane %v645_v25, %v1563_v7  ;;  %v902_v34 = vrot.slane %v891_v32, %v1563_v7  ;;  %v895_v35 = vcombine.high %v891_v32, %v891_v32  ;;  %v1016_v37 = vld [vmem:[%s1570_s17] sm:$0x3f] }
  0x18   : > { %196 = vrot.lane.b32.xlu0 %v1583_v13, %s1519_s18  ;;  %v785_v31 = vcombine.high %v777_v29, %v777_v29  ;;  %v784_v33 = vrot.slane %v770_v30, %v1563_v7  ;;  %v1027_v39 = vrot.slane %v1016_v37, %v1563_v7  ;;  %v1020_v40 = vcombine.high %v1016_v37, %v1016_v37  ;;  %v1141_v42 = vld [vmem:[%s1570_s17] sm:$0x3f] }
  0x19   : > { %v910_v36 = vcombine.high %v902_v34, %v902_v34  ;;  %v909_v38 = vrot.slane %v895_v35, %v1563_v7  ;;  %v1152_v44 = vrot.slane %v1141_v42, %v1563_v7  ;;  %v1145_v45 = vcombine.high %v1141_v42, %v1141_v42  ;;  %v1374_v11 = vld [vmem:[%s1731_s1 + $0x4] sm:$0x3] }
  0x1a   : > { %411 = vrot.lane.b32.xlu1 %v402_v14, %s1520_s19  ;;  %v1035_v41 = vcombine.high %v1027_v39, %v1027_v39  ;;  %v1034_v43 = vrot.slane %v1020_v40, %v1563_v7  ;;  %v308_v56 = vsel %vm207_vm1, %v1579_v12, 0  ;;  %v302_v59 = vsel %vm207_vm1, %v1574_v9, 0 }
  0x1b   : > { %v1160_v46 = vcombine.high %v1152_v44, %v1152_v44  ;;  %v1159_v47 = vrot.slane %v1145_v45, %v1563_v7 }
  0x1c   : > { %413 = vrot.lane.b32.xlu0 %v410_v16, %s1520_s19 }
  0x1e   : > { %415 = vrot.lane.b32.xlu1 %v409_v18, %s1520_s19 }
  0x20   : > { %536 = vrot.lane.b32.xlu0 %v527_v19, %s1521_s20 }
  0x22   : > { %538 = vrot.lane.b32.xlu1 %v535_v21, %s1521_s20 }
  0x24   : > { %540 = vrot.lane.b32.xlu0 %v534_v23, %s1521_s20 }
  0x26   : > { %661 = vrot.lane.b32.xlu1 %v652_v24, %s1522_s21 }
  0x28   : > { %663 = vrot.lane.b32.xlu0 %v660_v26, %s1522_s21 }
  0x2a   : > { %665 = vrot.lane.b32.xlu1 %v659_v28, %s1522_s21  ;;  %v1382_v28 = vld [vmem:[%s1731_s1 + $0x8] sm:$0x3] }
  0x2c   : > { %786 = vrot.lane.b32.xlu0 %v777_v29, %s1523_s22 }
  0x2e   : > { %788 = vrot.lane.b32.xlu1 %v785_v31, %s1523_s22 }
  0x30   : > { %790 = vrot.lane.b32.xlu0 %v784_v33, %s1523_s22 }
  0x32   : > { %911 = vrot.lane.b32.xlu1 %v902_v34, %s1524_s23 }
  0x34   : > { %913 = vrot.lane.b32.xlu0 %v910_v36, %s1524_s23  ;;  %v1386_v36 = vld [vmem:[%s1731_s1 + $0xa] sm:$0x3] }
  0x36   : > { %915 = vrot.lane.b32.xlu1 %v909_v38, %s1524_s23 }
  0x38   : > { %1036 = vrot.lane.b32.xlu0 %v1027_v39, %s1525_s24 }
  0x3a   : > { %1038 = vrot.lane.b32.xlu1 %v1035_v41, %s1525_s24 }
  0x3c   : > { %1040 = vrot.lane.b32.xlu0 %v1034_v43, %s1525_s24  ;;  %v1390_v43 = vld [vmem:[%s1731_s1 + $0xc] sm:$0x3]  ;;  %s170_s24 = scalar_lea.vmem %s1733_s3, %s1477_s14 }
  0x3e   : > { %1161 = vrot.lane.b32.xlu1 %v1152_v44, %s1526_s25 }
  0x40   : > { %1163 = vrot.lane.b32.xlu0 %v1160_v46, %s1526_s25 }
  0x42   : > { %1165 = vrot.lane.b32.xlu1 %v1159_v47, %s1526_s25 }
  0x44   : > { %1268 = vperm.xlu0 %1498, %v172_v48  }
  0x86   : > { %v195_v49 = vpop.permute.xlu0 %194 }
  0x88   : > { %v199_v50 = vpop.permute.xlu1 %198 }
  0x89   : > { %v215_v51 = vsel %vm207_vm1, %v199_v50, 0 }
  0x8a   : > { %v197_v52 = vpop.permute.xlu0 %196  ;;  %1424 = vmatpush3.bf16.msra.mxu1 %v215_v51 }
  0x8b   : > { %v202_v54 = vsel %vm200_vm2, %v197_v52, %v199_v50  ;;  %v201_v55 = vsel %vm200_vm2, %v195_v49, %v197_v52  ;;  %1429 = vmatprep.subr.bf16.mxu1 %v1516_v3  ;;  %v1394_v50 = vld [vmem:[%s1731_s1 + $0xe] sm:$0x3] }
  0x8c   : > { %1368 = vmatprep.subr.msk.bf16.mxu0 %vm207_vm1, %v202_v54  ;;  %v209_v57 = vsel %vm207_vm1, %v201_v55, 0  ;;  %v412_v58 = vpop.permute.xlu1 %411  ;;  %v1398_v54 = vld [vmem:[%s1731_s1 + $0x10] sm:$0x3] }
  0x8d   : > { %218 = vmatpush1.bf16.msra.mxu0 %v209_v57  ;;  %1426 = vmatmul.mubr.msk.bf16.vlgmr.msra.gmra.mrb[0].mxu1 %vm203_vm3, %v1367_v53 }
  0x8e   : > { %1371 = vmatprep.subr.msk.bf16.mxu0 %vm207_vm1, %v1583_v13  ;;  %v414_v60 = vpop.permute.xlu0 %413  ;;  %1430 = vmatpush3.bf16.msra.mxu1 %v308_v56 }
  0x8f   : > { %1431 = vmatprep.mubr.msk.bf16.mxu1 %vm1517_vm0, %v1516_v3  ;;  %1435 = vmatprep.subr.bf16.mxu1 %v1516_v3  ;;  %v418_v1 = vsel %vm417_vm4, %v412_v58, %v414_v60 }
  0x90   : > { %1369 = vmatmul.mubr.msk.bf16.vlgmr.msra.gmra.mrb[0].mxu0 %vm203_vm3, %v1367_v53  ;;  %v416_v61 = vpop.permute.xlu1 %415  ;;  %v424_v5 = vsel %vm207_vm1, %v418_v1, 0 }
  0x91   : > { %311 = vmatpush1.bf16.msra.mxu0 %v302_v59  ;;  %v419_v62 = vsel %vm417_vm4, %v414_v60, %v416_v61  ;;  %342 = vmatprep.mubr.bf16.mxu0 %v1518_v6  ;;  %v430_v2 = vsel %vm207_vm1, %v416_v61, 0 }
  0x92   : > { %1375 = vmatprep.subr.msk.bf16.mxu0 %vm207_vm1, %v419_v62  ;;  %v537_v0 = vpop.permute.xlu0 %536 }
  0x94   : > { %v539_v4 = vpop.permute.xlu1 %538 }
  0x95   : > { %1432 = vmatmul.mubr.msk.bf16.vlgmr.msra.gmra.mrb[4].mxu1 %vm203_vm3, %v174_v63  ;;  %v543_v13 = vsel %vm542_vm5, %v537_v0, %v539_v4 }
  0x96   : > { %1436 = vmatpush3.bf16.msra.mxu1 %v430_v2  ;;  %1437 = vmatprep.mubr.msk.bf16.mxu1 %vm1517_vm0, %v1516_v3  ;;  %v541_v8 = vpop.permute.xlu0 %540  ;;  %v549_v16 = vsel %vm207_vm1, %v543_v13, 0 }
  0x97   : > { %v544_v9 = vsel %vm542_vm5, %v539_v4, %v541_v8  ;;  %1441 = vmatprep.subr.bf16.mxu1 %v1516_v3  ;;  %v555_v14 = vsel %vm207_vm1, %v541_v8, 0 }
  0x98   : > { %1372 = vmatmul.mubr.msk.bf16.vlgmr.msra.gmra.mrb[4].mxu0 %vm203_vm3, %v174_v63  ;;  %v662_v10 = vpop.permute.xlu1 %661 }
  0x99   : > { %433 = vmatpush1.bf16.msra.mxu0 %v424_v5  ;;  %464 = vmatprep.mubr.bf16.mxu0 %v1518_v6 }
  0x9a   : > { %1379 = vmatprep.subr.msk.bf16.mxu0 %vm207_vm1, %v544_v9  ;;  %v664_v12 = vpop.permute.xlu0 %663 }
  0x9b   : > { %v668_v21 = vsel %vm667_vm6, %v662_v10, %v664_v12 }
  0x9c   : > { %v666_v15 = vpop.permute.xlu1 %665  ;;  %v674_v24 = vsel %vm207_vm1, %v668_v21, 0 }
  0x9d   : > { %1438 = vmatmul.mubr.msk.bf16.vlgmr.msra.gmra.mrb[8].mxu1 %vm203_vm3, %v1374_v11  ;;  %v669_v18 = vsel %vm667_vm6, %v664_v12, %v666_v15  ;;  %v680_v22 = vsel %vm207_vm1, %v666_v15, 0 }
  0x9e   : > { %1442 = vmatpush3.bf16.msra.mxu1 %v555_v14  ;;  %1443 = vmatprep.mubr.msk.bf16.mxu1 %vm1517_vm0, %v1516_v3  ;;  %v787_v17 = vpop.permute.xlu0 %786 }
  0x9f   : > { %1447 = vmatprep.subr.bf16.mxu1 %v1516_v3 }
  0xa0   : > { %1376 = vmatmul.mubr.msk.bf16.vlgmr.msra.gmra.mrb[8].mxu0 %vm203_vm3, %v1374_v11  ;;  %v789_v19 = vpop.permute.xlu1 %788 }
  0xa1   : > { %558 = vmatpush1.bf16.msra.mxu0 %v549_v16  ;;  %589 = vmatprep.mubr.bf16.mxu0 %v1518_v6  ;;  %v793_v29 = vsel %vm792_vm7, %v787_v17, %v789_v19 }
  0xa2   : > { %1383 = vmatprep.subr.msk.bf16.mxu0 %vm207_vm1, %v669_v18  ;;  %v791_v23 = vpop.permute.xlu0 %790  ;;  %v799_v32 = vsel %vm207_vm1, %v793_v29, 0 }
  0xa3   : > { %v794_v26 = vsel %vm792_vm7, %v789_v19, %v791_v23  ;;  %v805_v30 = vsel %vm207_vm1, %v791_v23, 0 }
  0xa4   : > { %v912_v25 = vpop.permute.xlu1 %911 }
  0xa5   : > { %1444 = vmatmul.mubr.msk.bf16.vlgmr.msra.gmra.mrb[12].mxu1 %vm203_vm3, %v1378_v20 }
  0xa6   : > { %1448 = vmatpush3.bf16.msra.mxu1 %v680_v22  ;;  %1449 = vmatprep.mubr.msk.bf16.mxu1 %vm1517_vm0, %v1516_v3  ;;  %v914_v27 = vpop.permute.xlu0 %913 }
  0xa7   : > { %1453 = vmatprep.subr.bf16.mxu1 %v1516_v3  ;;  %v918_v37 = vsel %vm917_vm8, %v912_v25, %v914_v27 }
  0xa8   : > { %1380 = vmatmul.mubr.msk.bf16.vlgmr.msra.gmra.mrb[12].mxu0 %vm203_vm3, %v1378_v20  ;;  %v916_v31 = vpop.permute.xlu1 %915  ;;  %v924_v40 = vsel %vm207_vm1, %v918_v37, 0 }
  0xa9   : > { %683 = vmatpush1.bf16.msra.mxu0 %v674_v24  ;;  %714 = vmatprep.mubr.bf16.mxu0 %v1518_v6  ;;  %v919_v34 = vsel %vm917_vm8, %v914_v27, %v916_v31  ;;  %v930_v38 = vsel %vm207_vm1, %v916_v31, 0 }
  0xaa   : > { %1387 = vmatprep.subr.msk.bf16.mxu0 %vm207_vm1, %v794_v26  ;;  %v1037_v33 = vpop.permute.xlu0 %1036 }
  0xac   : > { %v1039_v35 = vpop.permute.xlu1 %1038 }
  0xad   : > { %1450 = vmatmul.mubr.msk.bf16.vlgmr.msra.gmra.mrb[16].mxu1 %vm203_vm3, %v1382_v28  ;;  %v1043_v44 = vsel %vm1042_vm9, %v1037_v33, %v1039_v35 }
  0xae   : > { %1454 = vmatpush3.bf16.msra.mxu1 %v805_v30  ;;  %1455 = vmatprep.mubr.msk.bf16.mxu1 %vm1517_vm0, %v1516_v3  ;;  %v1041_v39 = vpop.permute.xlu0 %1040  ;;  %v1049_v48 = vsel %vm207_vm1, %v1043_v44, 0 }
  0xaf   : > { %1459 = vmatprep.subr.bf16.mxu1 %v1516_v3  ;;  %v1044_v42 = vsel %vm1042_vm9, %v1039_v35, %v1041_v39  ;;  %v1055_v45 = vsel %vm207_vm1, %v1041_v39, 0 }
  0xb0   : > { %1384 = vmatmul.mubr.msk.bf16.vlgmr.msra.gmra.mrb[16].mxu0 %vm203_vm3, %v1382_v28  ;;  %v1162_v41 = vpop.permute.xlu1 %1161 }
  0xb1   : > { %808 = vmatpush1.bf16.msra.mxu0 %v799_v32  ;;  %839 = vmatprep.mubr.bf16.mxu0 %v1518_v6 }
  0xb2   : > { %1391 = vmatprep.subr.msk.bf16.mxu0 %vm207_vm1, %v919_v34  ;;  %v1164_v46 = vpop.permute.xlu0 %1163 }
  0xb3   : > { %v1168_v51 = vsel %vm1167_vm10, %v1162_v41, %v1164_v46 }
  0xb4   : > { %v1166_v47 = vpop.permute.xlu1 %1165  ;;  %v1174_v53 = vsel %vm207_vm1, %v1168_v51, 0 }
  0xb5   : > { %1456 = vmatmul.mubr.msk.bf16.vlgmr.msra.gmra.mrb[20].mxu1 %vm203_vm3, %v1386_v36  ;;  %v1169_v49 = vsel %vm1167_vm10, %v1164_v46, %v1166_v47  ;;  %v1180_v52 = vsel %vm207_vm1, %v1166_v47, 0 }
  0xb6   : > { %1460 = vmatpush3.bf16.msra.mxu1 %v930_v38  ;;  %1461 = vmatprep.mubr.msk.bf16.mxu1 %vm1517_vm0, %v1516_v3 }
  0xb7   : > { %1465 = vmatprep.subr.bf16.mxu1 %v1516_v3 }
  0xb8   : > { %1388 = vmatmul.mubr.msk.bf16.vlgmr.msra.gmra.mrb[20].mxu0 %vm203_vm3, %v1386_v36 }
  0xb9   : > { %933 = vmatpush1.bf16.msra.mxu0 %v924_v40  ;;  %964 = vmatprep.mubr.bf16.mxu0 %v1518_v6 }
  0xba   : > { %1395 = vmatprep.subr.msk.bf16.mxu0 %vm207_vm1, %v1044_v42 }
  0xbd   : > { %1462 = vmatmul.mubr.msk.bf16.vlgmr.msra.gmra.mrb[24].mxu1 %vm203_vm3, %v1390_v43 }
  0xbe   : > { %1466 = vmatpush3.bf16.msra.mxu1 %v1055_v45  ;;  %1467 = vmatprep.mubr.msk.bf16.mxu1 %vm1517_vm0, %v1516_v3 }
  0xbf   : > { %1471 = vmatprep.subr.bf16.mxu1 %v1516_v3 }
  0xc0   : > { %1392 = vmatmul.mubr.msk.bf16.vlgmr.msra.gmra.mrb[24].mxu0 %vm203_vm3, %v1390_v43 }
  0xc1   : > { %1058 = vmatpush1.bf16.msra.mxu0 %v1049_v48  ;;  %1089 = vmatprep.mubr.bf16.mxu0 %v1518_v6 }
  0xc2   : > { %1399 = vmatprep.subr.msk.bf16.mxu0 %vm207_vm1, %v1169_v49 }
  0xc5   : > { %1468 = vmatmul.mubr.msk.bf16.vlgmr.msra.gmra.mrb[28].mxu1 %vm203_vm3, %v1394_v50 }
  0xc6   : > { %1472 = vmatpush3.bf16.msra.mxu1 %v1180_v52  ;;  %1473 = vmatprep.mubr.msk.bf16.mxu1 %vm1517_vm0, %v1516_v3 }
  0xc8   : > { %1396 = vmatmul.mubr.msk.bf16.vlgmr.msra.gmra.mrb[28].mxu0 %vm203_vm3, %v1394_v50 }
  0xc9   : > { %1183 = vmatpush1.bf16.msra.mxu0 %v1174_v53  ;;  %1214 = vmatprep.mubr.bf16.mxu0 %v1518_v6 }
  0xcd   : > { %1474 = vmatmul.mubr.msk.bf16.vlgmr.msra.gmra.mrb[32].mxu1 %vm203_vm3, %v1398_v54 }
  0xd0   : > { %1400 = vmatmul.mubr.msk.bf16.vlgmr.msra.gmra.mrb[32].mxu0 %vm203_vm3, %v1398_v54 }
 0x160   : > { %v292_v55 = vpop.f32.mrb[0].mxu1 }
 0x161   : > { %v1427_v56 = vpop.f32.mrb[1].mxu1 }
 0x162   : > { %v295_v57 = vpop.f32.mrb[2].mxu1 }
 0x163   : > { %v251_v58 = vpop.f32.mrb[0].mxu0  ;;  %v1428_v59 = vpop.f32.mrb[3].mxu1 }
 0x164   : > { %v253_v60 = vpop.f32.mrb[1].mxu0 }
 0x165   : > { %v255_v3 = vpop.f32.mrb[2].mxu0 }
 0x166   : > { %v256_v61 = vpop.f32.mrb[3].mxu0 }
 0x168   : > { %v385_v62 = vpop.f32.mrb[4].mxu1 }
 0x169   : > { %v386_v63 = vadd.f32 %v385_v62, %v292_v55  ;;  %v1433_v0 = vpop.f32.mrb[5].mxu1 }
 0x16a   : > { %v388_v6 = vpop.f32.mrb[6].mxu1 }
 0x16b   : > { %v344_v1 = vpop.f32.mrb[4].mxu0  ;;  %v1434_v2 = vpop.f32.mrb[7].mxu1 }
 0x16c   : > { %v345_v4 = vadd.f32 %v344_v1, %v251_v58  ;;  %v346_v5 = vpop.f32.mrb[5].mxu0 }
 0x16d   : > { %v347_v8 = vadd.f32 %v346_v5, %v253_v60  ;;  %v348_v9 = vpop.f32.mrb[6].mxu0 }
 0x16e   : > { %v349_v10 = vpop.f32.mrb[7].mxu0 }
 0x170   : > { %v507_v11 = vpop.f32.mrb[8].mxu1 }
 0x171   : > { %v515_v12 = vadd.f32 %v507_v11, %v386_v63  ;;  %v1439_v13 = vpop.f32.mrb[9].mxu1 }
 0x172   : > { %v510_v14 = vpop.f32.mrb[10].mxu1 }
 0x173   : > { %v466_v15 = vpop.f32.mrb[8].mxu0  ;;  %v1440_v16 = vpop.f32.mrb[11].mxu1 }
 0x174   : > { %v513_v17 = vadd.f32 %v466_v15, %v345_v4  ;;  %v468_v18 = vpop.f32.mrb[9].mxu0  ;;  %v1269_v15 = vpop.permute.xlu0 %1268 }
 0x175   : > { %v514_v19 = vadd.f32 %v468_v18, %v347_v8  ;;  %v470_v20 = vpop.f32.mrb[10].mxu0 }
 0x176   : > { %v471_v21 = vpop.f32.mrb[11].mxu0 }
 0x178   : > { %v632_v22 = vpop.f32.mrb[12].mxu1 }
 0x179   : > { %v640_v23 = vadd.f32 %v632_v22, %v515_v12  ;;  %v1445_v24 = vpop.f32.mrb[13].mxu1 }
 0x17a   : > { %v635_v25 = vpop.f32.mrb[14].mxu1 }
 0x17b   : > { %v591_v26 = vpop.f32.mrb[12].mxu0  ;;  %v1446_v27 = vpop.f32.mrb[15].mxu1 }
 0x17c   : > { %v638_v28 = vadd.f32 %v591_v26, %v513_v17  ;;  %v593_v29 = vpop.f32.mrb[13].mxu0 }
 0x17d   : > { %v639_v30 = vadd.f32 %v593_v29, %v514_v19  ;;  %v595_v31 = vpop.f32.mrb[14].mxu0 }
 0x17e   : > { %v596_v32 = vpop.f32.mrb[15].mxu0 }
 0x180   : > { %v757_v33 = vpop.f32.mrb[16].mxu1 }
 0x181   : > { %v765_v34 = vadd.f32 %v757_v33, %v640_v23  ;;  %v1451_v35 = vpop.f32.mrb[17].mxu1 }
 0x182   : > { %v760_v36 = vpop.f32.mrb[18].mxu1 }
 0x183   : > { %v716_v37 = vpop.f32.mrb[16].mxu0  ;;  %v1452_v38 = vpop.f32.mrb[19].mxu1 }
 0x184   : > { %v763_v39 = vadd.f32 %v716_v37, %v638_v28  ;;  %v718_v40 = vpop.f32.mrb[17].mxu0 }
 0x185   : > { %v764_v41 = vadd.f32 %v718_v40, %v639_v30  ;;  %v720_v42 = vpop.f32.mrb[18].mxu0 }
 0x186   : > { %v721_v43 = vpop.f32.mrb[19].mxu0 }
 0x188   : > { %v882_v44 = vpop.f32.mrb[20].mxu1 }
 0x189   : > { %v890_v45 = vadd.f32 %v882_v44, %v765_v34  ;;  %v1457_v46 = vpop.f32.mrb[21].mxu1 }
 0x18a   : > { %v885_v47 = vpop.f32.mrb[22].mxu1 }
 0x18b   : > { %v841_v48 = vpop.f32.mrb[20].mxu0  ;;  %v1458_v49 = vpop.f32.mrb[23].mxu1 }
 0x18c   : > { %v888_v50 = vadd.f32 %v841_v48, %v763_v39  ;;  %v843_v51 = vpop.f32.mrb[21].mxu0 }
 0x18d   : > { %v889_v52 = vadd.f32 %v843_v51, %v764_v41  ;;  %v845_v53 = vpop.f32.mrb[22].mxu0 }
 0x18e   : > { %v846_v54 = vpop.f32.mrb[23].mxu0 }
 0x190   : > { %v1007_v55 = vpop.f32.mrb[24].mxu1 }
 0x191   : > { %v1015_v56 = vadd.f32 %v1007_v55, %v890_v45  ;;  %v1463_v57 = vpop.f32.mrb[25].mxu1 }
 0x192   : > { %v1010_v58 = vpop.f32.mrb[26].mxu1 }
 0x193   : > { %v966_v59 = vpop.f32.mrb[24].mxu0  ;;  %v1464_v60 = vpop.f32.mrb[27].mxu1 }
 0x194   : > { %v1013_v3 = vadd.f32 %v966_v59, %v888_v50  ;;  %v968_v61 = vpop.f32.mrb[25].mxu0 }
 0x195   : > { %v1014_v62 = vadd.f32 %v968_v61, %v889_v52  ;;  %v970_v63 = vpop.f32.mrb[26].mxu0 }
 0x196   : > { %v971_v0 = vpop.f32.mrb[27].mxu0 }
 0x198   : > { %v1132_v6 = vpop.f32.mrb[28].mxu1 }
 0x199   : > { %v1140_v1 = vadd.f32 %v1132_v6, %v1015_v56  ;;  %v1469_v2 = vpop.f32.mrb[29].mxu1 }
 0x19a   : > { %v1135_v4 = vpop.f32.mrb[30].mxu1 }
 0x19b   : > { %v1091_v5 = vpop.f32.mrb[28].mxu0  ;;  %v1470_v8 = vpop.f32.mrb[31].mxu1 }
 0x19c   : > { %v1138_v9 = vadd.f32 %v1091_v5, %v1013_v3  ;;  %v1093_v10 = vpop.f32.mrb[29].mxu0 }
 0x19d   : > { %v1139_v11 = vadd.f32 %v1093_v10, %v1014_v62  ;;  %v1095_v12 = vpop.f32.mrb[30].mxu0 }
 0x19e   : > { %v1096_v13 = vpop.f32.mrb[31].mxu0 }
 0x1a0   : > { %v1257_v14 = vpop.f32.mrb[32].mxu1 }
 0x1a1   : > { %v1265_v16 = vadd.f32 %v1257_v14, %v1140_v1  ;;  %v1475_v17 = vpop.f32.mrb[33].mxu1 }
 0x1a2   : > { %v1260_v18 = vpop.f32.mrb[34].mxu1 }
 0x1a3   : > { %v1273_v19 = vadd.f32 %v1269_v15, %v1265_v16  ;;  %v1216_v20 = vpop.f32.mrb[32].mxu0  ;;  %v1476_v21 = vpop.f32.mrb[35].mxu1 }
 0x1a4   : > { %v1263_v22 = vadd.f32 %v1216_v20, %v1138_v9  ;;  %v1218_v23 = vpop.f32.mrb[33].mxu0 }
 0x1a5   : > { %v1276_v24 = vmax.f32 %v1273_v19, 0.0  ;;  %v1264_v25 = vadd.f32 %v1218_v23, %v1139_v11  ;;  %v1220_v26 = vpop.f32.mrb[34].mxu0 }
 0x1a6   : > { %v1271_v27 = vadd.f32 %v1269_v15, %v1263_v22  ;;  %v1221_v28 = vpop.f32.mrb[35].mxu0 }
 0x1a7   : > { %v1272_v29 = vadd.f32 %v1269_v15, %v1264_v25  ;;  %v1279_v31 = vpack.c.bf16 %v1276_v24, %v1276_v24 }
 0x1a8   : > { %v1274_v30 = vmax.f32 %v1271_v27, 0.0 }
 0x1a9   : > { %v1275_v32 = vmax.f32 %v1272_v29, 0.0  ;;  %v1297_v34 = vrot.slane %v1279_v31, %v1563_v7 }
 0x1ab   : > { %v1402_v33 = vpack.c.bf16 %v1275_v32, %v1274_v30 }
 0x1ad   : > { %v1290_v35 = vrot.slane %v1402_v33, %v1563_v7 }
 0x1af   : > { %v1298_v36 = vcombine.low %v1290_v35, %v1297_v34 }
 0x1b1   : > { %1304 = vst.msk [vmem:[%s170_s24] sm:$0x3f] %vm1303_vm14, %v1298_v36 }
 0x1b2 PF: > { %s13_s12 = sadd.s32 1, %s1513_s12  }
 0x1b3   : > { %p10_p4 = scmp.ge.s32.totalorder %s13_s12, 4  }
 0x1b5   :  { %12 = sbr.rel (!%p10_p4) target bundleno = 1 (0x1), region = 70 }

// kernel: unet_forward.10
= control target key start
LH: loop header
LB: loop body
LE: loop exit
PB: predicated region body
PF: predicated region fallthrough
CT: control target
= control target key end

     0   :  { %s860_s12 = smov 0   ;;  %s962_s0 = inlined_call_operand.vmem [shape: bf16[2,16,82], index: 0, kind: input, shape index: {}]   ;;  %s963_s1 = inlined_call_operand.vmem [shape: bf16[9,8,4], index: 1, kind: input, shape index: {}]   ;;  %s964_s2 = inlined_call_operand.vmem [shape: f32[8,1], index: 2, kind: input, shape index: {}]   ;;  %s965_s3 = inlined_call_operand.vmem [shape: bf16[2,1,8,72], index: 3, kind: output, shape index: {}]  }
   0x1 LB: > { %s702_s13 = sadd.s32 4294967295, %s832_s12   ;;  %p706_p0 = scmp.ge.s32.totalorder %s832_s12, 1  ;;  %s832_s12 = sphi %s860_s12, %s13_s12  }
   0x2   : > { %p137_p1 = scmp.lt.s32.totalorder %s832_s12, 3 }
   0x4   : > { %p138_p2 = pnand %p706_p0, %p137_p1 }
   0x5   : > { %p160_p3 = scmp.lt.s32.totalorder (!%p138_p2), %s702_s13, 1  ;;  %v834_v0 = vmov (!%p138_p2), 0.0   ;;  %vm835_vm0 = vmmov (!%p138_p2), 0   ;;  %vm184_vm1 = vcmask (!%p138_p2), 1041408   ;;  %v172_v6 = vld [vmem:[%s963_s1] sm:$0xf] (!%p138_p2) }
   0x6   : > { %141 = sbr.rel (%p138_p2) target bundleno = 383 (0x17f), region = 32  ;;  %752 = vmatprep.subr.bf16.mxu0 (!%p138_p2), %v834_v0  ;;  %758 = vmatprep.subr.bf16.mxu1 (!%p138_p2), %v834_v0  ;;  %s836_s20 = smov (!%p138_p2), 127   ;;  %vm180_vm2 = vcmask (!%p138_p2), 31744   ;;  %v710_v11 = vld [vmem:[%s963_s1 + $0x4] sm:$0xf] (!%p138_p2)  ;;  %v839_v14 = vmov (!%p138_p2), 0  }
   0x7   : > { %754 = vmatprep.mubr.msk.bf16.mxu0 (!%p138_p2), %vm835_vm0, %v834_v0  ;;  %760 = vmatprep.mubr.msk.bf16.mxu1 (!%p138_p2), %vm835_vm0, %v834_v0  ;;  %s837_s21 = smov (!%p138_p2), 119   ;;  %v717_v12 = vld [vmem:[%s963_s1 + $0xc] sm:$0xf] (!%p138_p2)  ;;  %s838_s26 = smov (!%p138_p2), 118   ;;  %v170_v13 = vld [vmem:[%s964_s2] sm:$0xff] (!%p138_p2)  ;;  %vm647_vm3 = vcmask (!%p138_p2), 584704  }
   0x8   : > { %820 = vset.pattern.permute.xlu1 (!%p138_p2), %v839_v14  ;;  %821 = vset.pattern.permute.xlu0 (!%p138_p2), %v839_v14  ;;  %v714_v20 = vld [vmem:[%s963_s1 + $0x8] sm:$0xf] (!%p138_p2)  ;;  %v722_v25 = vld [vmem:[%s963_s1 + $0x14] sm:$0xf] (!%p138_p2)  ;;  %v719_v27 = vld [vmem:[%s963_s1 + $0x10] sm:$0xf] (!%p138_p2) }
   0x9   : > { %v727_v29 = vld [vmem:[%s963_s1 + $0x1c] sm:$0xf] (!%p138_p2)  ;;  %v725_v31 = vld [vmem:[%s963_s1 + $0x18] sm:$0xf] (!%p138_p2)  ;;  %v729_v33 = vld [vmem:[%s963_s1 + $0x20] sm:$0xf] (!%p138_p2) }
   0xd   : > { %s967_s13 = smov (!%p160_p3, %s702_s13), 1 }
   0xe   : > { %s733_s14 = sshll.u32 %s967_s13, 3  ;;  %s709_s16 = sshll.u32 %s967_s13, 2 }
   0xf   : > { %s880_s17 = scalar_lea.vmem %s962_s0, %s733_s14  ;;  %s168_s19 = scalar_lea.vmem %s965_s3, %s709_s16 }
  0x10   : > { %v171_v1 = vld [vmem:[%s880_s17] sm:$0x3]  ;;  %v328_v2 = vld [vmem:[%s880_s17 + $0x4] sm:$0x3] }
  0x11   : > { %v715_v3 = vcombine.low %v171_v1, %v171_v1  ;;  %v824_v4 = vld [vmem:[%s880_s17] ss:$0 sps:$4 sm:$0xcc]   ;;  %v232_v5 = vsel %vm184_vm1, %v171_v1, 0  ;;  %v723_v7 = vcombine.low %v328_v2, %v328_v2  ;;  %v335_v9 = vsel %vm184_vm1, %v328_v2, 0 }
  0x12   : > { %759 = vmatpush3.bf16.msra.mxu1 %v232_v5  ;;  %v179_v8 = vrot.slane %v824_v4, 2  ;;  %v825_v15 = vld [vmem:[%s880_s17 + $0x4] ss:$0 sps:$4 sm:$0xcc]  }
  0x13   : > { %279 = vrot.lane.b32.xlu0 %v715_v3, %s836_s20  ;;  %488 = vrot.lane.b32.xlu1 %v715_v3, %s837_s21  ;;  %v384_v16 = vrot.slane %v825_v15, 2 }
  0x14   : > { %770 = vmatprep.subr.bf16.mxu1 %v834_v0  ;;  %v186_v10 = vsel %vm184_vm1, %v179_v8, 0 }
  0x15   : > { %761 = vmatmul.mubr.msk.bf16.vlgmr.msra.gmra.mrb[0].mxu1 %vm180_vm2, %v172_v6  ;;  %753 = vmatpush3.bf16.msra.mxu0 %v186_v10  ;;  %v389_v21 = vsel %vm184_vm1, %v384_v16, 0 }
  0x16   : > { %771 = vmatpush3.bf16.msra.mxu1 %v335_v9  ;;  %764 = vmatprep.subr.bf16.mxu0 %v834_v0 }
  0x17   : > { %437 = vrot.lane.b32.xlu0 %v723_v7, %s836_s20  ;;  %539 = vrot.lane.b32.xlu1 %v179_v8, %s837_s21 }
  0x18   : > { %772 = vmatprep.mubr.msk.bf16.mxu1 %vm835_vm0, %v834_v0  ;;  %755 = vmatmul.mubr.msk.bf16.vlgmr.msra.gmra.mrb[0].mxu0 %vm180_vm2, %v710_v11 }
  0x19   : > { %782 = vmatprep.subr.bf16.mxu1 %v834_v0  ;;  %766 = vmatprep.mubr.msk.bf16.mxu0 %vm835_vm0, %v834_v0 }
  0x1b   : > { %590 = vrot.lane.b32.xlu0 %v715_v3, %s838_s26  ;;  %641 = vperm.xlu1 %820, %v170_v13  }
  0x1d   : > { %773 = vmatmul.mubr.msk.bf16.vlgmr.msra.gmra.mrb[4].mxu1 %vm180_vm2, %v717_v12 }
  0x1e   : > { %784 = vmatprep.mubr.msk.bf16.mxu1 %vm835_vm0, %v834_v0 }
  0x85   : > { %v280_v17 = vpop.permute.xlu0 %279  ;;  %v489_v18 = vpop.permute.xlu1 %488 }
  0x86   : > { %v285_v19 = vsel %vm184_vm1, %v280_v17, 0  ;;  %v494_v28 = vsel %vm184_vm1, %v489_v18, 0 }
  0x87   : > { %765 = vmatpush3.bf16.msra.mxu0 %v285_v19 }
  0x88   : > { %776 = vmatprep.subr.bf16.mxu0 %v834_v0 }
  0x89   : > { %v438_v22 = vpop.permute.xlu0 %437  ;;  %v540_v24 = vpop.permute.xlu1 %539 }
  0x8a   : > { %767 = vmatmul.mubr.msk.bf16.vlgmr.msra.gmra.mrb[4].mxu0 %vm180_vm2, %v714_v20  ;;  %v443_v23 = vsel %vm184_vm1, %v438_v22, 0  ;;  %v545_v26 = vsel %vm184_vm1, %v540_v24, 0 }
  0x8b   : > { %777 = vmatpush3.bf16.msra.mxu0 %v389_v21  ;;  %778 = vmatprep.mubr.msk.bf16.mxu0 %vm835_vm0, %v834_v0 }
  0x8c   : > { %783 = vmatpush3.bf16.msra.mxu1 %v443_v23  ;;  %788 = vmatprep.subr.bf16.mxu0 %v834_v0 }
  0x8d   : > { %794 = vmatprep.subr.bf16.mxu1 %v834_v0  ;;  %v591_v30 = vpop.permute.xlu0 %590 }
  0x8e   : > { %v596_v32 = vsel %vm184_vm1, %v591_v30, 0 }
  0x8f   : > { %785 = vmatmul.mubr.msk.bf16.vlgmr.msra.gmra.mrb[8].mxu1 %vm180_vm2, %v722_v25 }
  0x90   : > { %795 = vmatpush3.bf16.msra.mxu1 %v545_v26  ;;  %796 = vmatprep.mubr.msk.bf16.mxu1 %vm835_vm0, %v834_v0 }
  0x92   : > { %779 = vmatmul.mubr.msk.bf16.vlgmr.msra.gmra.mrb[8].mxu0 %vm180_vm2, %v719_v27 }
  0x93   : > { %789 = vmatpush3.bf16.msra.mxu0 %v494_v28  ;;  %790 = vmatprep.mubr.msk.bf16.mxu0 %vm835_vm0, %v834_v0 }
  0x94   : > { %800 = vmatprep.subr.bf16.mxu0 %v834_v0 }
  0x97   : > { %797 = vmatmul.mubr.msk.bf16.vlgmr.msra.gmra.mrb[12].mxu1 %vm180_vm2, %v727_v29 }
  0x9a   : > { %791 = vmatmul.mubr.msk.bf16.vlgmr.msra.gmra.mrb[12].mxu0 %vm180_vm2, %v725_v31  ;;  %v642_v10 = vpop.permute.xlu1 %641 }
  0x9b   : > { %801 = vmatpush3.bf16.msra.mxu0 %v596_v32  ;;  %802 = vmatprep.mubr.msk.bf16.mxu0 %vm835_vm0, %v834_v0 }
  0xa2   : > { %803 = vmatmul.mubr.msk.bf16.vlgmr.msra.gmra.mrb[16].mxu0 %vm180_vm2, %v729_v33 }
  0xe8   : > { %v268_v34 = vpop.f32.mrb[0].mxu1 }
  0xe9   : > { %v762_v35 = vpop.f32.mrb[1].mxu1 }
  0xea   : > { %v271_v36 = vpop.f32.mrb[2].mxu1 }
  0xeb   : > { %v763_v37 = vpop.f32.mrb[3].mxu1  ;;  %v222_v38 = vpop.f32.mrb[0].mxu0 }
  0xec   : > { %v756_v39 = vpop.f32.mrb[1].mxu0  ;;  %v269_v40 = vadd.f32 %v268_v34, %v222_v38 }
  0xed   : > { %v225_v41 = vpop.f32.mrb[2].mxu0 }
  0xee   : > { %v757_v42 = vpop.f32.mrb[3].mxu0 }
  0xf0   : > { %v371_v43 = vpop.f32.mrb[4].mxu1 }
  0xf1   : > { %v774_v44 = vpop.f32.mrb[5].mxu1 }
  0xf2   : > { %v374_v45 = vpop.f32.mrb[6].mxu1 }
  0xf3   : > { %v775_v46 = vpop.f32.mrb[7].mxu1 }
 0x15d   : > { %v321_v47 = vpop.f32.mrb[4].mxu0 }
 0x15e   : > { %v327_v48 = vadd.f32 %v321_v47, %v269_v40  ;;  %v768_v49 = vpop.f32.mrb[5].mxu0 }
 0x15f   : > { %v324_v50 = vpop.f32.mrb[6].mxu0 }
 0x160   : > { %v377_v51 = vadd.f32 %v371_v43, %v327_v48  ;;  %v769_v52 = vpop.f32.mrb[7].mxu0 }
 0x162   : > { %v479_v53 = vpop.f32.mrb[8].mxu1 }
 0x163   : > { %v786_v54 = vpop.f32.mrb[9].mxu1 }
 0x164   : > { %v482_v55 = vpop.f32.mrb[10].mxu1 }
 0x165   : > { %v425_v56 = vpop.f32.mrb[8].mxu0  ;;  %v787_v57 = vpop.f32.mrb[11].mxu1 }
 0x166   : > { %v431_v58 = vadd.f32 %v425_v56, %v377_v51  ;;  %v780_v59 = vpop.f32.mrb[9].mxu0 }
 0x167   : > { %v428_v60 = vpop.f32.mrb[10].mxu0 }
 0x168   : > { %v485_v61 = vadd.f32 %v479_v53, %v431_v58  ;;  %v781_v62 = vpop.f32.mrb[11].mxu0 }
 0x16a   : > { %v581_v63 = vpop.f32.mrb[12].mxu1 }
 0x16b   : > { %v798_v0 = vpop.f32.mrb[13].mxu1 }
 0x16c   : > { %v584_v1 = vpop.f32.mrb[14].mxu1 }
 0x16d   : > { %v530_v2 = vpop.f32.mrb[12].mxu0  ;;  %v799_v3 = vpop.f32.mrb[15].mxu1 }
 0x16e   : > { %v536_v4 = vadd.f32 %v530_v2, %v485_v61  ;;  %v792_v5 = vpop.f32.mrb[13].mxu0 }
 0x16f   : > { %v533_v6 = vpop.f32.mrb[14].mxu0 }
 0x170   : > { %v587_v7 = vadd.f32 %v581_v63, %v536_v4  ;;  %v793_v8 = vpop.f32.mrb[15].mxu0 }
 0x175   : > { %v632_v9 = vpop.f32.mrb[16].mxu0 }
 0x176   : > { %v638_v11 = vadd.f32 %v632_v9, %v587_v7  ;;  %v804_v12 = vpop.f32.mrb[17].mxu0 }
 0x177   : > { %v635_v13 = vpop.f32.mrb[18].mxu0 }
 0x178   : > { %v644_v14 = vadd.f32 %v642_v10, %v638_v11  ;;  %v805_v15 = vpop.f32.mrb[19].mxu0 }
 0x17a   : > { %v645_v16 = vmax.f32 %v644_v14, 0.0 }
 0x17c   : > { %v646_v17 = vpack.c.bf16 %v645_v16, %v645_v16 }
 0x17e   : > { %648 = vst.msk [vmem:[%s168_s19] sm:$0xf] %vm647_vm3, %v646_v17 }
 0x17f PF: > { %s13_s12 = sadd.s32 1, %s832_s12  }
 0x180   : > { %p10_p4 = scmp.ge.s32.totalorder %s13_s12, 4  }
 0x182   :  { %12 = sbr.rel (!%p10_p4) target bundleno = 1 (0x1), region = 70 }

// kernel: unet_forward.11
= control target key start
LH: loop header
LB: loop body
LE: loop exit
PB: predicated region body
PF: predicated region fallthrough
CT: control target
= control target key end

     0   :  { %s975_s12 = smov 0   ;;  %s1080_s0 = inlined_call_operand.vmem [shape: bf16[2,32,26], index: 0, kind: input, shape index: {}]   ;;  %s1081_s1 = inlined_call_operand.vmem [shape: bf16[9,16,8], index: 1, kind: input, shape index: {}]   ;;  %s1082_s2 = inlined_call_operand.vmem [shape: f32[16,1], index: 2, kind: input, shape index: {}]   ;;  %s1083_s3 = inlined_call_operand.vmem [shape: bf16[2,1,16,20], index: 3, kind: output, shape index: {}]  }
   0x1 LB: > { %s787_s13 = sadd.s32 4294967295, %s947_s12   ;;  %p791_p0 = scmp.ge.s32.totalorder %s947_s12, 1  ;;  %s947_s12 = sphi %s975_s12, %s13_s12  }
   0x2   : > { %p137_p1 = scmp.lt.s32.totalorder %s947_s12, 3 }
   0x4   : > { %p138_p2 = pnand %p791_p0, %p137_p1 }
   0x5   : > { %p161_p3 = scmp.lt.s32.totalorder (!%p138_p2), %s787_s13, 1  ;;  %v949_v0 = vmov (!%p138_p2), 0.0   ;;  %vm950_vm0 = vmmov (!%p138_p2), 0   ;;  %vm190_vm1 = vcmask (!%p138_p2), 1043456   ;;  %v932_v6 = vld [vmem:[%s1081_s1 + $0x8] sm:$0xff] (!%p138_p2)   ;;  %vm186_vm2 = vcmask (!%p138_p2), 64512  }
   0x6   : > { %141 = sbr.rel (%p138_p2) target bundleno = 385 (0x181), region = 32  ;;  %859 = vmatprep.subr.bf16.mxu0 (!%p138_p2), %v949_v0  ;;  %865 = vmatprep.subr.bf16.mxu1 (!%p138_p2), %v949_v0  ;;  %s951_s20 = smov (!%p138_p2), 127   ;;  %v933_v10 = vld [vmem:[%s1081_s1] sm:$0xff] (!%p138_p2)   ;;  %v935_v12 = vld [vmem:[%s1081_s1 + $0x18] sm:$0xff] (!%p138_p2)   ;;  %v173_v14 = vld [vmem:[%s1082_s2 + $0x8] sm:$0xff] (!%p138_p2)  ;;  %v954_v15 = vmov (!%p138_p2), 0  }
   0x7   : > { %861 = vmatprep.mubr.msk.bf16.mxu0 (!%p138_p2), %vm950_vm0, %v949_v0  ;;  %867 = vmatprep.mubr.msk.bf16.mxu1 (!%p138_p2), %vm950_vm0, %v949_v0  ;;  %s952_s21 = smov (!%p138_p2), 123   ;;  %s953_s24 = smov (!%p138_p2), 122   ;;  %v172_v13 = vld [vmem:[%s1082_s2] sm:$0xff] (!%p138_p2)  ;;  %v934_v20 = vld [vmem:[%s1081_s1 + $0x10] sm:$0xff] (!%p138_p2)   ;;  %v937_v25 = vld [vmem:[%s1081_s1 + $0x28] sm:$0xff] (!%p138_p2)   ;;  %vm729_vm3 = vcmask (!%p138_p2), 158720  }
   0x8   : > { %927 = vset.pattern.permute.xlu1 (!%p138_p2), %v954_v15  ;;  %928 = vset.pattern.permute.xlu0 (!%p138_p2), %v954_v15  ;;  %v936_v27 = vld [vmem:[%s1081_s1 + $0x20] sm:$0xff] (!%p138_p2)   ;;  %v939_v29 = vld [vmem:[%s1081_s1 + $0x38] sm:$0xff] (!%p138_p2)   ;;  %v938_v31 = vld [vmem:[%s1081_s1 + $0x30] sm:$0xff] (!%p138_p2)  }
   0x9   : > { %v940_v33 = vld [vmem:[%s1081_s1 + $0x40] sm:$0xff] (!%p138_p2)  }
   0xd   : > { %s1085_s13 = smov (!%p161_p3, %s787_s13), 1 }
   0xe   : > { %s837_s14 = sshll.u32 %s1085_s13, 4  ;;  %s838_s18 = sshll.u32 %s1085_s13, 3 }
   0xf   : > { %s995_s17 = scalar_lea.vmem %s1080_s0, %s837_s14 }
  0x10   : > { %v174_v1 = vld [vmem:[%s995_s17] sm:$0xf]  ;;  %v349_v2 = vld [vmem:[%s995_s17 + $0x8] sm:$0xf]  ;;  %v177_v3 = vld [vmem:[%s995_s17 + $0x4] sm:$0xf] }
  0x11   : > { %v805_v4 = vcombine.low %v174_v1, %v174_v1  ;;  %v192_v5 = vsel %vm190_vm1, %v177_v3, 0  ;;  %v244_v7 = vsel %vm190_vm1, %v174_v1, 0  ;;  %v818_v8 = vcombine.low %v349_v2, %v349_v2  ;;  %v407_v17 = vld [vmem:[%s995_s17 + $0xc] sm:$0xf] }
  0x12   : > { %860 = vmatpush3.bf16.msra.mxu0 %v192_v5  ;;  %v827_v9 = vcombine.low %v177_v3, %v177_v3  ;;  %866 = vmatpush3.bf16.msra.mxu1 %v244_v7  ;;  %v362_v11 = vsel %vm190_vm1, %v349_v2, 0  ;;  %v420_v21 = vsel %vm190_vm1, %v407_v17, 0 }
  0x13   : > { %298 = vrot.lane.b32.xlu0 %v805_v4, %s951_s20  ;;  %535 = vrot.lane.b32.xlu1 %v805_v4, %s952_s21 }
  0x14   : > { %871 = vmatprep.subr.bf16.mxu0 %v949_v0  ;;  %877 = vmatprep.subr.bf16.mxu1 %v949_v0 }
  0x15   : > { %862 = vmatmul.mubr.msk.bf16.vlgmr.msra.gmra.mrb[0].mxu0 %vm186_vm2, %v932_v6  ;;  %868 = vmatmul.mubr.msk.bf16.vlgmr.msra.gmra.mrb[0].mxu1 %vm186_vm2, %v933_v10 }
  0x16   : > { %873 = vmatprep.mubr.msk.bf16.mxu0 %vm950_vm0, %v949_v0  ;;  %878 = vmatpush3.bf16.msra.mxu1 %v362_v11 }
  0x17   : > { %476 = vrot.lane.b32.xlu0 %v818_v8, %s951_s20  ;;  %597 = vrot.lane.b32.xlu1 %v827_v9, %s952_s21  ;;  %s170_s21 = scalar_lea.vmem %s1083_s3, %s838_s18 }
  0x18   : > { %879 = vmatprep.mubr.msk.bf16.mxu1 %vm950_vm0, %v949_v0  ;;  %889 = vmatprep.subr.bf16.mxu1 %v949_v0 }
  0x1b   : > { %656 = vrot.lane.b32.xlu0 %v805_v4, %s953_s24  ;;  %709 = vperm.xlu1 %927, %v172_v13  }
  0x1d   : > { %880 = vmatmul.mubr.msk.bf16.vlgmr.msra.gmra.mrb[4].mxu1 %vm186_vm2, %v935_v12 }
  0x1e   : > { %891 = vmatprep.mubr.msk.bf16.mxu1 %vm950_vm0, %v949_v0 }
  0x1f   : > { %714 = vperm.xlu0 %928, %v173_v14  }
  0x85   : > { %v299_v16 = vpop.permute.xlu0 %298  ;;  %v536_v18 = vpop.permute.xlu1 %535 }
  0x86   : > { %v304_v19 = vsel %vm190_vm1, %v299_v16, 0  ;;  %v541_v28 = vsel %vm190_vm1, %v536_v18, 0 }
  0x87   : > { %872 = vmatpush3.bf16.msra.mxu0 %v304_v19 }
  0x88   : > { %883 = vmatprep.subr.bf16.mxu0 %v949_v0 }
  0x89   : > { %v477_v22 = vpop.permute.xlu0 %476  ;;  %v598_v24 = vpop.permute.xlu1 %597 }
  0x8a   : > { %874 = vmatmul.mubr.msk.bf16.vlgmr.msra.gmra.mrb[4].mxu0 %vm186_vm2, %v934_v20  ;;  %v482_v23 = vsel %vm190_vm1, %v477_v22, 0  ;;  %v603_v26 = vsel %vm190_vm1, %v598_v24, 0 }
  0x8b   : > { %884 = vmatpush3.bf16.msra.mxu0 %v420_v21  ;;  %885 = vmatprep.mubr.msk.bf16.mxu0 %vm950_vm0, %v949_v0 }
  0x8c   : > { %890 = vmatpush3.bf16.msra.mxu1 %v482_v23  ;;  %895 = vmatprep.subr.bf16.mxu0 %v949_v0 }
  0x8d   : > { %901 = vmatprep.subr.bf16.mxu1 %v949_v0  ;;  %v657_v30 = vpop.permute.xlu0 %656 }
  0x8e   : > { %v662_v32 = vsel %vm190_vm1, %v657_v30, 0 }
  0x8f   : > { %892 = vmatmul.mubr.msk.bf16.vlgmr.msra.gmra.mrb[8].mxu1 %vm186_vm2, %v937_v25 }
  0x90   : > { %902 = vmatpush3.bf16.msra.mxu1 %v603_v26  ;;  %903 = vmatprep.mubr.msk.bf16.mxu1 %vm950_vm0, %v949_v0 }
  0x92   : > { %886 = vmatmul.mubr.msk.bf16.vlgmr.msra.gmra.mrb[8].mxu0 %vm186_vm2, %v936_v27 }
  0x93   : > { %896 = vmatpush3.bf16.msra.mxu0 %v541_v28  ;;  %897 = vmatprep.mubr.msk.bf16.mxu0 %vm950_vm0, %v949_v0 }
  0x94   : > { %907 = vmatprep.subr.bf16.mxu0 %v949_v0 }
  0x97   : > { %904 = vmatmul.mubr.msk.bf16.vlgmr.msra.gmra.mrb[12].mxu1 %vm186_vm2, %v939_v29 }
  0x9a   : > { %898 = vmatmul.mubr.msk.bf16.vlgmr.msra.gmra.mrb[12].mxu0 %vm186_vm2, %v938_v31  ;;  %v710_v17 = vpop.permute.xlu1 %709 }
  0x9b   : > { %908 = vmatpush3.bf16.msra.mxu0 %v662_v32  ;;  %909 = vmatprep.mubr.msk.bf16.mxu0 %vm950_vm0, %v949_v0 }
  0x9e   : > { %v715_v21 = vpop.permute.xlu0 %714 }
  0xa2   : > { %910 = vmatmul.mubr.msk.bf16.vlgmr.msra.gmra.mrb[16].mxu0 %vm186_vm2, %v940_v33 }
  0xe8   : > { %v228_v34 = vpop.f32.mrb[0].mxu0  ;;  %v280_v37 = vpop.f32.mrb[0].mxu1 }
  0xe9   : > { %v863_v35 = vpop.f32.mrb[1].mxu0  ;;  %v281_v39 = vadd.f32 %v280_v37, %v228_v34  ;;  %v869_v40 = vpop.f32.mrb[1].mxu1 }
  0xea   : > { %v231_v36 = vpop.f32.mrb[2].mxu0  ;;  %v283_v41 = vpop.f32.mrb[2].mxu1 }
  0xeb   : > { %v864_v38 = vpop.f32.mrb[3].mxu0  ;;  %v284_v42 = vadd.f32 %v283_v41, %v231_v36  ;;  %v870_v43 = vpop.f32.mrb[3].mxu1 }
  0xf0   : > { %v398_v44 = vpop.f32.mrb[4].mxu1 }
  0xf1   : > { %v881_v45 = vpop.f32.mrb[5].mxu1 }
  0xf2   : > { %v401_v46 = vpop.f32.mrb[6].mxu1 }
  0xf3   : > { %v882_v47 = vpop.f32.mrb[7].mxu1 }
 0x15d   : > { %v340_v48 = vpop.f32.mrb[4].mxu0 }
 0x15e   : > { %v347_v49 = vadd.f32 %v340_v48, %v281_v39  ;;  %v875_v50 = vpop.f32.mrb[5].mxu0 }
 0x15f   : > { %v343_v51 = vpop.f32.mrb[6].mxu0 }
 0x160   : > { %v348_v52 = vadd.f32 %v343_v51, %v284_v42  ;;  %v405_v53 = vadd.f32 %v398_v44, %v347_v49  ;;  %v876_v54 = vpop.f32.mrb[7].mxu0 }
 0x162   : > { %v406_v55 = vadd.f32 %v401_v46, %v348_v52  ;;  %v518_v56 = vpop.f32.mrb[8].mxu1 }
 0x163   : > { %v893_v57 = vpop.f32.mrb[9].mxu1 }
 0x164   : > { %v521_v58 = vpop.f32.mrb[10].mxu1 }
 0x165   : > { %v456_v59 = vpop.f32.mrb[8].mxu0  ;;  %v894_v60 = vpop.f32.mrb[11].mxu1 }
 0x166   : > { %v463_v61 = vadd.f32 %v456_v59, %v405_v53  ;;  %v887_v62 = vpop.f32.mrb[9].mxu0 }
 0x167   : > { %v459_v63 = vpop.f32.mrb[10].mxu0 }
 0x168   : > { %v464_v0 = vadd.f32 %v459_v63, %v406_v55  ;;  %v525_v1 = vadd.f32 %v518_v56, %v463_v61  ;;  %v888_v2 = vpop.f32.mrb[11].mxu0 }
 0x16a   : > { %v526_v3 = vadd.f32 %v521_v58, %v464_v0  ;;  %v639_v4 = vpop.f32.mrb[12].mxu1 }
 0x16b   : > { %v905_v5 = vpop.f32.mrb[13].mxu1 }
 0x16c   : > { %v642_v6 = vpop.f32.mrb[14].mxu1 }
 0x16d   : > { %v577_v7 = vpop.f32.mrb[12].mxu0  ;;  %v906_v8 = vpop.f32.mrb[15].mxu1 }
 0x16e   : > { %v584_v9 = vadd.f32 %v577_v7, %v525_v1  ;;  %v899_v10 = vpop.f32.mrb[13].mxu0 }
 0x16f   : > { %v580_v11 = vpop.f32.mrb[14].mxu0 }
 0x170   : > { %v585_v12 = vadd.f32 %v580_v11, %v526_v3  ;;  %v646_v13 = vadd.f32 %v639_v4, %v584_v9  ;;  %v900_v14 = vpop.f32.mrb[15].mxu0 }
 0x172   : > { %v647_v15 = vadd.f32 %v642_v6, %v585_v12 }
 0x175   : > { %v698_v16 = vpop.f32.mrb[16].mxu0 }
 0x176   : > { %v705_v18 = vadd.f32 %v698_v16, %v646_v13  ;;  %v911_v19 = vpop.f32.mrb[17].mxu0 }
 0x177   : > { %v701_v20 = vpop.f32.mrb[18].mxu0 }
 0x178   : > { %v717_v22 = vadd.f32 %v710_v17, %v705_v18  ;;  %v706_v23 = vadd.f32 %v701_v20, %v647_v15  ;;  %v912_v24 = vpop.f32.mrb[19].mxu0 }
 0x17a   : > { %v719_v25 = vmax.f32 %v717_v22, 0.0  ;;  %v718_v26 = vadd.f32 %v715_v21, %v706_v23 }
 0x17c   : > { %v839_v27 = vpack.c.bf16 %v719_v25, %v719_v25  ;;  %v720_v28 = vmax.f32 %v718_v26, 0.0 }
 0x17e   : > { %730 = vst.msk [vmem:[%s170_s21] sm:$0xf] %vm729_vm3, %v839_v27  ;;  %v840_v29 = vpack.c.bf16 %v720_v28, %v720_v28 }
 0x180   : > { %731 = vst.msk [vmem:[%s170_s21 + $0x4] sm:$0xf] %vm729_vm3, %v840_v29 }
 0x181 PF: > { %s13_s12 = sadd.s32 1, %s947_s12  }
 0x182   : > { %p10_p4 = scmp.ge.s32.totalorder %s13_s12, 4  }
 0x184   :  { %12 = sbr.rel (!%p10_p4) target bundleno = 1 (0x1), region = 70 }

// kernel: unet_forward.12
= control target key start
LH: loop header
LB: loop body
LE: loop exit
PB: predicated region body
PF: predicated region fallthrough
CT: control target
= control target key end

     0   :  { %s962_s12 = smov 0   ;;  %s1055_s0 = inlined_call_operand.vmem [shape: bf16[2,16,38], index: 0, kind: input, shape index: {}]   ;;  %s1056_s1 = inlined_call_operand.vmem [shape: bf16[9,16,16], index: 1, kind: input, shape index: {}]   ;;  %s1057_s2 = inlined_call_operand.vmem [shape: f32[16,1], index: 2, kind: input, shape index: {}]   ;;  %s1058_s3 = inlined_call_operand.vmem [shape: bf16[2,1,16,24], index: 3, kind: output, shape index: {}]  }
   0x1 LB: > { %s768_s13 = sadd.s32 4294967295, %s929_s12   ;;  %p772_p0 = scmp.ge.s32.totalorder %s929_s12, 1  ;;  %s929_s12 = sphi %s962_s12, %s13_s12  }
   0x2   : > { %p137_p1 = scmp.lt.s32.totalorder %s929_s12, 3 }
   0x4   : > { %p138_p2 = pnand %p772_p0, %p137_p1 }
   0x5   : > { %p161_p3 = scmp.lt.s32.totalorder (!%p138_p2), %s768_s13, 1  ;;  %v931_v0 = vmov (!%p138_p2), 0.0   ;;  %vm932_vm0 = vmmov (!%p138_p2), 0   ;;  %v915_v2 = vld [vmem:[%s1056_s1] sm:$0xff] (!%p138_p2)   ;;  %s933_s20 = smov (!%p138_p2), 127   ;;  %vm194_vm1 = vcmask (!%p138_p2), 130048  }
   0x6   : > { %141 = sbr.rel (%p138_p2) target bundleno = 390 (0x186), region = 32  ;;  %838 = vmatprep.subr.bf16.mxu0 (!%p138_p2), %v931_v0  ;;  %844 = vmatprep.subr.bf16.mxu1 (!%p138_p2), %v931_v0  ;;  %s934_s21 = smov (!%p138_p2), 122   ;;  %v172_v3 = vld [vmem:[%s1057_s2] sm:$0xff] (!%p138_p2)  ;;  %v173_v4 = vld [vmem:[%s1057_s2 + $0x8] sm:$0xff] (!%p138_p2)  ;;  %v941_v5 = vmov (!%p138_p2), 0   ;;  %v917_v9 = vld [vmem:[%s1056_s1 + $0x18] sm:$0xff] (!%p138_p2)  }
   0x7   : > { %840 = vmatprep.mubr.msk.bf16.mxu0 (!%p138_p2), %vm932_vm0, %v931_v0  ;;  %846 = vmatprep.mubr.msk.bf16.mxu1 (!%p138_p2), %vm932_vm0, %v931_v0  ;;  %s935_s22 = smov (!%p138_p2), 126   ;;  %s936_s23 = smov (!%p138_p2), 121   ;;  %v914_v7 = vld [vmem:[%s1056_s1 + $0x8] sm:$0xff] (!%p138_p2)   ;;  %v916_v11 = vld [vmem:[%s1056_s1 + $0x10] sm:$0xff] (!%p138_p2)   ;;  %v918_v16 = vld [vmem:[%s1056_s1 + $0x20] sm:$0xff] (!%p138_p2)   ;;  %vm710_vm2 = vcmask (!%p138_p2), 191488  }
   0x8   : > { %s937_s24 = smov (!%p138_p2), 120   ;;  %s938_s25 = smov (!%p138_p2), 116   ;;  %911 = vset.pattern.permute.xlu0 (!%p138_p2), %v941_v5  ;;  %912 = vset.pattern.permute.xlu1 (!%p138_p2), %v941_v5  ;;  %v919_v13 = vld [vmem:[%s1056_s1 + $0x28] sm:$0xff] (!%p138_p2)   ;;  %v921_v17 = vld [vmem:[%s1056_s1 + $0x38] sm:$0xff] (!%p138_p2)   ;;  %v920_v19 = vld [vmem:[%s1056_s1 + $0x30] sm:$0xff] (!%p138_p2)  }
   0x9   : > { %s939_s26 = smov (!%p138_p2), 115   ;;  %s940_s27 = smov (!%p138_p2), 114   ;;  %v922_v21 = vld [vmem:[%s1056_s1 + $0x40] sm:$0xff] (!%p138_p2)  }
   0xd   : > { %s1060_s13 = smov (!%p161_p3, %s768_s13), 1 }
   0xe   : > { %s816_s14 = sshll.u32 %s1060_s13, 3 }
   0xf   : > { %s165_s17 = scalar_lea.vmem %s1055_s0, %s816_s14 }
  0x10   : > { %v913_v1 = vld [vmem:[%s165_s17] sm:$0xff]  }
  0x11   : > { %191 = vrot.lane.b32.xlu0 %v913_v1, %s933_s20  ;;  %354 = vrot.lane.b32.xlu1 %v913_v1, %s934_s21 }
  0x12   : > { %845 = vmatpush3.bf16.msra.mxu1 %v913_v1 }
  0x13   : > { %856 = vmatprep.subr.bf16.mxu1 %v931_v0 }
  0x15   : > { %297 = vrot.lane.b32.xlu0 %v913_v1, %s935_s22  ;;  %411 = vrot.lane.b32.xlu1 %v913_v1, %s936_s23 }
  0x16   : > { %847 = vmatmul.mubr.msk.bf16.vlgmr.msra.gmra.mrb[0].mxu1 %vm194_vm1, %v915_v2 }
  0x17   : > { %858 = vmatprep.mubr.msk.bf16.mxu1 %vm932_vm0, %v931_v0 }
  0x19   : > { %468 = vrot.lane.b32.xlu0 %v913_v1, %s937_s24  ;;  %525 = vrot.lane.b32.xlu1 %v913_v1, %s938_s25 }
  0x1d   : > { %582 = vrot.lane.b32.xlu0 %v913_v1, %s939_s26  ;;  %639 = vrot.lane.b32.xlu1 %v913_v1, %s940_s27  ;;  %s170_s26 = scalar_lea.vmem %s1058_s3, %s816_s14 }
  0x21   : > { %690 = vperm.xlu0 %911, %v172_v3   ;;  %695 = vperm.xlu1 %912, %v173_v4  }
  0x83   : > { %v192_v6 = vpop.permute.xlu0 %191  ;;  %v355_v8 = vpop.permute.xlu1 %354 }
  0x84   : > { %839 = vmatpush3.bf16.msra.mxu0 %v192_v6  ;;  %857 = vmatpush3.bf16.msra.mxu1 %v355_v8 }
  0x85   : > { %850 = vmatprep.subr.bf16.mxu0 %v931_v0  ;;  %868 = vmatprep.subr.bf16.mxu1 %v931_v0 }
  0x87   : > { %841 = vmatmul.mubr.msk.bf16.vlgmr.msra.gmra.mrb[0].mxu0 %vm194_vm1, %v914_v7  ;;  %v298_v10 = vpop.permute.xlu0 %297  ;;  %859 = vmatmul.mubr.msk.bf16.vlgmr.msra.gmra.mrb[4].mxu1 %vm194_vm1, %v917_v9  ;;  %v412_v14 = vpop.permute.xlu1 %411 }
  0x88   : > { %851 = vmatpush3.bf16.msra.mxu0 %v298_v10  ;;  %852 = vmatprep.mubr.msk.bf16.mxu0 %vm932_vm0, %v931_v0 }
  0x89   : > { %862 = vmatprep.subr.bf16.mxu0 %v931_v0  ;;  %870 = vmatprep.mubr.msk.bf16.mxu1 %vm932_vm0, %v931_v0 }
  0x8b   : > { %v469_v12 = vpop.permute.xlu0 %468  ;;  %v526_v18 = vpop.permute.xlu1 %525 }
  0x8c   : > { %869 = vmatpush3.bf16.msra.mxu1 %v469_v12 }
  0x8d   : > { %880 = vmatprep.subr.bf16.mxu1 %v931_v0 }
  0x8f   : > { %853 = vmatmul.mubr.msk.bf16.vlgmr.msra.gmra.mrb[4].mxu0 %vm194_vm1, %v916_v11  ;;  %871 = vmatmul.mubr.msk.bf16.vlgmr.msra.gmra.mrb[8].mxu1 %vm194_vm1, %v919_v13  ;;  %v583_v15 = vpop.permute.xlu0 %582  ;;  %v640_v20 = vpop.permute.xlu1 %639 }
  0x90   : > { %863 = vmatpush3.bf16.msra.mxu0 %v412_v14  ;;  %864 = vmatprep.mubr.msk.bf16.mxu0 %vm932_vm0, %v931_v0 }
  0x91   : > { %874 = vmatprep.subr.bf16.mxu0 %v931_v0  ;;  %881 = vmatpush3.bf16.msra.mxu1 %v583_v15 }
  0x92   : > { %882 = vmatprep.mubr.msk.bf16.mxu1 %vm932_vm0, %v931_v0 }
  0x97   : > { %865 = vmatmul.mubr.msk.bf16.vlgmr.msra.gmra.mrb[8].mxu0 %vm194_vm1, %v918_v16  ;;  %883 = vmatmul.mubr.msk.bf16.vlgmr.msra.gmra.mrb[12].mxu1 %vm194_vm1, %v921_v17 }
  0x98   : > { %875 = vmatpush3.bf16.msra.mxu0 %v526_v18  ;;  %876 = vmatprep.mubr.msk.bf16.mxu0 %vm932_vm0, %v931_v0 }
  0x99   : > { %886 = vmatprep.subr.bf16.mxu0 %v931_v0 }
  0x9f   : > { %877 = vmatmul.mubr.msk.bf16.vlgmr.msra.gmra.mrb[12].mxu0 %vm194_vm1, %v920_v19 }
  0xa0   : > { %887 = vmatpush3.bf16.msra.mxu0 %v640_v20  ;;  %888 = vmatprep.mubr.msk.bf16.mxu0 %vm932_vm0, %v931_v0  ;;  %v691_v5 = vpop.permute.xlu0 %690  ;;  %v696_v9 = vpop.permute.xlu1 %695 }
  0xa7   : > { %889 = vmatmul.mubr.msk.bf16.vlgmr.msra.gmra.mrb[16].mxu0 %vm194_vm1, %v922_v21 }
  0xe9   : > { %v282_v22 = vpop.f32.mrb[0].mxu1 }
  0xea   : > { %v848_v23 = vpop.f32.mrb[1].mxu1 }
  0xeb   : > { %v285_v24 = vpop.f32.mrb[2].mxu1 }
  0xec   : > { %v849_v25 = vpop.f32.mrb[3].mxu1 }
 0x15a   : > { %v232_v26 = vpop.f32.mrb[0].mxu0  ;;  %v394_v27 = vpop.f32.mrb[4].mxu1 }
 0x15b   : > { %v283_v28 = vadd.f32 %v282_v22, %v232_v26  ;;  %v842_v29 = vpop.f32.mrb[1].mxu0  ;;  %v860_v30 = vpop.f32.mrb[5].mxu1 }
 0x15c   : > { %v235_v31 = vpop.f32.mrb[2].mxu0  ;;  %v397_v32 = vpop.f32.mrb[6].mxu1 }
 0x15d   : > { %v286_v33 = vadd.f32 %v285_v24, %v235_v31  ;;  %v843_v34 = vpop.f32.mrb[3].mxu0  ;;  %v861_v35 = vpop.f32.mrb[7].mxu1 }
 0x162   : > { %v337_v36 = vpop.f32.mrb[4].mxu0  ;;  %v508_v37 = vpop.f32.mrb[8].mxu1 }
 0x163   : > { %v344_v38 = vadd.f32 %v337_v36, %v283_v28  ;;  %v854_v39 = vpop.f32.mrb[5].mxu0  ;;  %v872_v40 = vpop.f32.mrb[9].mxu1 }
 0x164   : > { %v340_v41 = vpop.f32.mrb[6].mxu0  ;;  %v511_v42 = vpop.f32.mrb[10].mxu1 }
 0x165   : > { %v345_v43 = vadd.f32 %v340_v41, %v286_v33  ;;  %v401_v44 = vadd.f32 %v394_v27, %v344_v38  ;;  %v855_v45 = vpop.f32.mrb[7].mxu0  ;;  %v873_v46 = vpop.f32.mrb[11].mxu1 }
 0x167   : > { %v402_v47 = vadd.f32 %v397_v32, %v345_v43 }
 0x16a   : > { %v451_v48 = vpop.f32.mrb[8].mxu0  ;;  %v622_v49 = vpop.f32.mrb[12].mxu1 }
 0x16b   : > { %v458_v50 = vadd.f32 %v451_v48, %v401_v44  ;;  %v866_v51 = vpop.f32.mrb[9].mxu0  ;;  %v884_v52 = vpop.f32.mrb[13].mxu1 }
 0x16c   : > { %v454_v53 = vpop.f32.mrb[10].mxu0  ;;  %v625_v54 = vpop.f32.mrb[14].mxu1 }
 0x16d   : > { %v459_v55 = vadd.f32 %v454_v53, %v402_v47  ;;  %v515_v56 = vadd.f32 %v508_v37, %v458_v50  ;;  %v867_v57 = vpop.f32.mrb[11].mxu0  ;;  %v885_v58 = vpop.f32.mrb[15].mxu1 }
 0x16f   : > { %v516_v59 = vadd.f32 %v511_v42, %v459_v55 }
 0x172   : > { %v565_v60 = vpop.f32.mrb[12].mxu0 }
 0x173   : > { %v572_v61 = vadd.f32 %v565_v60, %v515_v56  ;;  %v878_v62 = vpop.f32.mrb[13].mxu0 }
 0x174   : > { %v568_v63 = vpop.f32.mrb[14].mxu0 }
 0x175   : > { %v573_v0 = vadd.f32 %v568_v63, %v516_v59  ;;  %v629_v1 = vadd.f32 %v622_v49, %v572_v61  ;;  %v879_v2 = vpop.f32.mrb[15].mxu0 }
 0x177   : > { %v630_v3 = vadd.f32 %v625_v54, %v573_v0 }
 0x17a   : > { %v679_v4 = vpop.f32.mrb[16].mxu0 }
 0x17b   : > { %v686_v6 = vadd.f32 %v679_v4, %v629_v1  ;;  %v890_v7 = vpop.f32.mrb[17].mxu0 }
 0x17c   : > { %v682_v8 = vpop.f32.mrb[18].mxu0 }
 0x17d   : > { %v687_v10 = vadd.f32 %v682_v8, %v630_v3  ;;  %v698_v11 = vadd.f32 %v691_v5, %v686_v6  ;;  %v891_v12 = vpop.f32.mrb[19].mxu0 }
 0x17f   : > { %v700_v13 = vmax.f32 %v698_v11, 0.0  ;;  %v699_v14 = vadd.f32 %v696_v9, %v687_v10 }
 0x181   : > { %v818_v15 = vpack.c.bf16 %v700_v13, %v700_v13  ;;  %v701_v16 = vmax.f32 %v699_v14, 0.0 }
 0x183   : > { %711 = vst.msk [vmem:[%s170_s26] sm:$0xf] %vm710_vm2, %v818_v15  ;;  %v819_v17 = vpack.c.bf16 %v701_v16, %v701_v16 }
 0x185   : > { %712 = vst.msk [vmem:[%s170_s26 + $0x4] sm:$0xf] %vm710_vm2, %v819_v17 }
 0x186 PF: > { %s13_s12 = sadd.s32 1, %s929_s12  }
 0x187   : > { %p10_p4 = scmp.ge.s32.totalorder %s13_s12, 4  }
 0x189   :  { %12 = sbr.rel (!%p10_p4) target bundleno = 1 (0x1), region = 70 }

// kernel: unet_forward.13
= control target key start
LH: loop header
LB: loop body
LE: loop exit
PB: predicated region body
PF: predicated region fallthrough
CT: control target
= control target key end

     0   :  { %s869_s12 = smov 0   ;;  %s966_s0 = inlined_call_operand.vmem [shape: bf16[2,16,26], index: 0, kind: input, shape index: {}]   ;;  %s967_s1 = inlined_call_operand.vmem [shape: bf16[9,8,16], index: 1, kind: input, shape index: {}]   ;;  %s968_s2 = inlined_call_operand.vmem [shape: f32[8,1], index: 2, kind: input, shape index: {}]   ;;  %s969_s3 = inlined_call_operand.vmem [shape: bf16[2,4,8,20], index: 3, kind: output, shape index: {}]  }
   0x1 LB: > { %s706_s13 = sadd.s32 4294967295, %s841_s12   ;;  %p710_p0 = scmp.ge.s32.totalorder %s841_s12, 1  ;;  %s841_s12 = sphi %s869_s12, %s13_s12  }
   0x2   : > { %p137_p1 = scmp.lt.s32.totalorder %s841_s12, 3 }
   0x4   : > { %p138_p2 = pnand %p710_p0, %p137_p1 }
   0x5   : > { %p161_p3 = scmp.lt.s32.totalorder (!%p138_p2), %s706_s13, 1  ;;  %v843_v0 = vmov (!%p138_p2), 0.0   ;;  %vm844_vm0 = vmmov (!%p138_p2), 0   ;;  %s845_s18 = smov (!%p138_p2), 127   ;;  %v175_v5 = vld [vmem:[%s967_s1] sm:$0xf] (!%p138_p2) }
   0x6   : > { %141 = sbr.rel (%p138_p2) target bundleno = 382 (0x17e), region = 32  ;;  %761 = vmatprep.subr.bf16.mxu0 (!%p138_p2), %v843_v0  ;;  %763 = vmatprep.mubr.msk.bf16.mxu0 (!%p138_p2), %vm844_vm0, %v843_v0  ;;  %vm187_vm1 = vcmask (!%p138_p2), 130048   ;;  %s846_s21 = smov (!%p138_p2), 123   ;;  %v717_v6 = vld [vmem:[%s967_s1 + $0x4] sm:$0xf] (!%p138_p2)  ;;  %v848_v8 = vmov (!%p138_p2), 0  }
   0x7   : > { %767 = vmatprep.subr.bf16.mxu1 (!%p138_p2), %v843_v0  ;;  %769 = vmatprep.mubr.msk.bf16.mxu1 (!%p138_p2), %vm844_vm0, %v843_v0  ;;  %s847_s22 = smov (!%p138_p2), 122   ;;  %v172_v7 = vld [vmem:[%s968_s2] sm:$0xff] (!%p138_p2)  ;;  %v723_v9 = vld [vmem:[%s967_s1 + $0xc] sm:$0xf] (!%p138_p2)  ;;  %v729_v10 = vld [vmem:[%s967_s1 + $0x14] sm:$0xf] (!%p138_p2) }
   0x8   : > { %829 = vset.pattern.permute.xlu1 (!%p138_p2), %v848_v8  ;;  %830 = vset.pattern.permute.xlu0 (!%p138_p2), %v848_v8  ;;  %v718_v12 = vld [vmem:[%s967_s1 + $0x8] sm:$0xf] (!%p138_p2)  ;;  %v724_v15 = vld [vmem:[%s967_s1 + $0x10] sm:$0xf] (!%p138_p2)  ;;  %v736_v16 = vld [vmem:[%s967_s1 + $0x20] sm:$0xf] (!%p138_p2) }
   0x9   : > { %v730_v18 = vld [vmem:[%s967_s1 + $0x18] sm:$0xf] (!%p138_p2)  ;;  %v734_v20 = vld [vmem:[%s967_s1 + $0x1c] sm:$0xf] (!%p138_p2)  ;;  %vm233_vm2 = vcmask (!%p138_p2), 158720  }
   0xd   : > { %s971_s13 = smov (!%p161_p3, %s706_s13), 1 }
   0xe   : > { %s741_s14 = sshll.u32 %s971_s13, 3  ;;  %s742_s16 = sshll.u32 %s971_s13, 4 }
   0xf   : > { %s165_s17 = scalar_lea.vmem %s966_s0, %s741_s14  ;;  %s953_s19 = scalar_lea.vmem %s969_s3, %s742_s16 }
  0x10   : > { %v831_v1 = vld [vmem:[%s165_s17] sm:$0xff]  }
  0x11   : > { %v832_v2 = vld [vmem:[%s165_s17] sm:$0xff]   ;;  %246 = vrot.lane.b32.xlu0 %v831_v1, %s845_s18 }
  0x12   : > { %v833_v3 = vld [vmem:[%s165_s17] sm:$0xff]  }
  0x13   : > { %v834_v4 = vld [vmem:[%s165_s17] sm:$0xff]   ;;  %458 = vrot.lane.b32.xlu1 %v833_v3, %s845_s18 }
  0x14   : > { %762 = vmatpush3.bf16.msra.mxu0 %v834_v4 }
  0x15   : > { %352 = vrot.lane.b32.xlu0 %v832_v2, %s846_s21  ;;  %773 = vmatprep.subr.bf16.mxu0 %v843_v0 }
  0x17   : > { %550 = vrot.lane.b32.xlu1 %v833_v3, %s846_s21  ;;  %764 = vmatmul.mubr.msk.bf16.vlgmr.msra.gmra.mrb[0].mxu0 %vm187_vm1, %v175_v5 }
  0x18   : > { %774 = vmatpush3.bf16.msra.mxu0 %v831_v1  ;;  %775 = vmatprep.mubr.msk.bf16.mxu0 %vm844_vm0, %v843_v0 }
  0x19   : > { %599 = vrot.lane.b32.xlu0 %v833_v3, %s847_s22  ;;  %785 = vmatprep.subr.bf16.mxu0 %v843_v0 }
  0x1b   : > { %178 = vperm.xlu1 %829, %v172_v7  }
  0x1f   : > { %776 = vmatmul.mubr.msk.bf16.vlgmr.msra.gmra.mrb[4].mxu0 %vm187_vm1, %v717_v6 }
  0x20   : > { %786 = vmatpush3.bf16.msra.mxu0 %v832_v2  ;;  %787 = vmatprep.mubr.msk.bf16.mxu0 %vm844_vm0, %v843_v0 }
  0x21   : > { %797 = vmatprep.subr.bf16.mxu0 %v843_v0 }
  0x27   : > { %788 = vmatmul.mubr.msk.bf16.vlgmr.msra.gmra.mrb[8].mxu0 %vm187_vm1, %v723_v9 }
  0x28   : > { %798 = vmatpush3.bf16.msra.mxu0 %v833_v3  ;;  %799 = vmatprep.mubr.msk.bf16.mxu0 %vm844_vm0, %v843_v0 }
  0x29   : > { %809 = vmatprep.subr.bf16.mxu0 %v843_v0 }
  0x2f   : > { %800 = vmatmul.mubr.msk.bf16.vlgmr.msra.gmra.mrb[12].mxu0 %vm187_vm1, %v729_v10 }
  0x30   : > { %811 = vmatprep.mubr.msk.bf16.mxu0 %vm844_vm0, %v843_v0 }
  0x83   : > { %v247_v11 = vpop.permute.xlu0 %246 }
  0x84   : > { %768 = vmatpush3.bf16.msra.mxu1 %v247_v11 }
  0x85   : > { %779 = vmatprep.subr.bf16.mxu1 %v843_v0  ;;  %v459_v17 = vpop.permute.xlu1 %458 }
  0x87   : > { %770 = vmatmul.mubr.msk.bf16.vlgmr.msra.gmra.mrb[0].mxu1 %vm187_vm1, %v718_v12  ;;  %v353_v13 = vpop.permute.xlu0 %352 }
  0x88   : > { %780 = vmatpush3.bf16.msra.mxu1 %v353_v13  ;;  %781 = vmatprep.mubr.msk.bf16.mxu1 %vm844_vm0, %v843_v0 }
  0x89   : > { %791 = vmatprep.subr.bf16.mxu1 %v843_v0  ;;  %v551_v19 = vpop.permute.xlu1 %550 }
  0x8b   : > { %v600_v14 = vpop.permute.xlu0 %599 }
  0x8c   : > { %810 = vmatpush3.bf16.msra.mxu0 %v600_v14 }
  0x8f   : > { %782 = vmatmul.mubr.msk.bf16.vlgmr.msra.gmra.mrb[4].mxu1 %vm187_vm1, %v724_v15  ;;  %812 = vmatmul.mubr.msk.bf16.vlgmr.msra.gmra.mrb[16].mxu0 %vm187_vm1, %v736_v16 }
  0x90   : > { %792 = vmatpush3.bf16.msra.mxu1 %v459_v17  ;;  %793 = vmatprep.mubr.msk.bf16.mxu1 %vm844_vm0, %v843_v0 }
  0x91   : > { %803 = vmatprep.subr.bf16.mxu1 %v843_v0 }
  0x97   : > { %794 = vmatmul.mubr.msk.bf16.vlgmr.msra.gmra.mrb[8].mxu1 %vm187_vm1, %v730_v18 }
  0x98   : > { %804 = vmatpush3.bf16.msra.mxu1 %v551_v19  ;;  %805 = vmatprep.mubr.msk.bf16.mxu1 %vm844_vm0, %v843_v0 }
  0x9a   : > { %v179_v21 = vpop.permute.xlu1 %178 }
  0x9f   : > { %806 = vmatmul.mubr.msk.bf16.vlgmr.msra.gmra.mrb[12].mxu1 %vm187_vm1, %v734_v20 }
  0xea   : > { %v225_v22 = vpop.f32.mrb[0].mxu0 }
  0xeb   : > { %v765_v23 = vpop.f32.mrb[1].mxu0  ;;  %v226_v24 = vadd.f32 %v225_v22, %v179_v21 }
  0xec   : > { %v228_v25 = vpop.f32.mrb[2].mxu0 }
  0xed   : > { %v231_v26 = vmax.f32 %v226_v24, 0.0  ;;  %v766_v27 = vpop.f32.mrb[3].mxu0 }
  0xef   : > { %v232_v28 = vpack.c.bf16 %v231_v26, %v231_v26 }
  0xf1   : > { %234 = vst.msk [vmem:[%s953_s19] sm:$0xf] %vm233_vm2, %v232_v28 }
  0xf2   : > { %v330_v29 = vpop.f32.mrb[4].mxu0 }
  0xf3   : > { %v777_v30 = vpop.f32.mrb[5].mxu0 }
  0xf4   : > { %v333_v31 = vpop.f32.mrb[6].mxu0 }
  0xf5   : > { %v778_v32 = vpop.f32.mrb[7].mxu0 }
  0xfa   : > { %v436_v33 = vpop.f32.mrb[8].mxu0 }
  0xfb   : > { %v789_v34 = vpop.f32.mrb[9].mxu0 }
  0xfc   : > { %v439_v35 = vpop.f32.mrb[10].mxu0 }
  0xfd   : > { %v790_v36 = vpop.f32.mrb[11].mxu0 }
 0x102   : > { %v542_v37 = vpop.f32.mrb[12].mxu0 }
 0x103   : > { %v801_v38 = vpop.f32.mrb[13].mxu0 }
 0x104   : > { %v545_v39 = vpop.f32.mrb[14].mxu0 }
 0x105   : > { %v802_v40 = vpop.f32.mrb[15].mxu0 }
 0x15a   : > { %v286_v41 = vpop.f32.mrb[0].mxu1 }
 0x15b   : > { %v331_v42 = vadd.f32 %v330_v29, %v286_v41  ;;  %v771_v43 = vpop.f32.mrb[1].mxu1 }
 0x15c   : > { %v289_v44 = vpop.f32.mrb[2].mxu1 }
 0x15d   : > { %v336_v45 = vadd.f32 %v331_v42, %v179_v21  ;;  %v772_v46 = vpop.f32.mrb[3].mxu1 }
 0x15f   : > { %v337_v47 = vmax.f32 %v336_v45, 0.0 }
 0x161   : > { %v338_v48 = vpack.c.bf16 %v337_v47, %v337_v47 }
 0x162   : > { %v392_v49 = vpop.f32.mrb[4].mxu1  ;;  %v639_v50 = vpop.f32.mrb[16].mxu0 }
 0x163   : > { %722 = vst.msk [vmem:[%s953_s19 + $0x4] sm:$0xf] %vm233_vm2, %v338_v48  ;;  %v437_v51 = vadd.f32 %v436_v33, %v392_v49  ;;  %v783_v52 = vpop.f32.mrb[5].mxu1  ;;  %v813_v53 = vpop.f32.mrb[17].mxu0 }
 0x164   : > { %v395_v54 = vpop.f32.mrb[6].mxu1  ;;  %v642_v55 = vpop.f32.mrb[18].mxu0 }
 0x165   : > { %v442_v56 = vadd.f32 %v437_v51, %v179_v21  ;;  %v784_v57 = vpop.f32.mrb[7].mxu1  ;;  %v814_v58 = vpop.f32.mrb[19].mxu0 }
 0x167   : > { %v443_v59 = vmax.f32 %v442_v56, 0.0 }
 0x169   : > { %v444_v60 = vpack.c.bf16 %v443_v59, %v443_v59 }
 0x16a   : > { %v498_v61 = vpop.f32.mrb[8].mxu1 }
 0x16b   : > { %728 = vst.msk [vmem:[%s953_s19 + $0x8] sm:$0xf] %vm233_vm2, %v444_v60  ;;  %v543_v62 = vadd.f32 %v542_v37, %v498_v61  ;;  %v795_v63 = vpop.f32.mrb[9].mxu1 }
 0x16c   : > { %v501_v0 = vpop.f32.mrb[10].mxu1 }
 0x16d   : > { %v796_v1 = vpop.f32.mrb[11].mxu1 }
 0x172   : > { %v590_v2 = vpop.f32.mrb[12].mxu1 }
 0x173   : > { %v596_v3 = vadd.f32 %v590_v2, %v543_v62  ;;  %v807_v4 = vpop.f32.mrb[13].mxu1 }
 0x174   : > { %v593_v5 = vpop.f32.mrb[14].mxu1 }
 0x175   : > { %v645_v6 = vadd.f32 %v639_v50, %v596_v3  ;;  %v808_v7 = vpop.f32.mrb[15].mxu1 }
 0x177   : > { %v646_v8 = vadd.f32 %v645_v6, %v179_v21 }
 0x179   : > { %v647_v9 = vmax.f32 %v646_v8, 0.0 }
 0x17b   : > { %v648_v10 = vpack.c.bf16 %v647_v9, %v647_v9 }
 0x17d   : > { %738 = vst.msk [vmem:[%s953_s19 + $0xc] sm:$0xf] %vm233_vm2, %v648_v10 }
 0x17e PF: > { %s13_s12 = sadd.s32 1, %s841_s12  }
 0x17f   : > { %p10_p4 = scmp.ge.s32.totalorder %s13_s12, 4  }
 0x181   :  { %12 = sbr.rel (!%p10_p4) target bundleno = 1 (0x1), region = 73 }

// kernel: unet_forward.14
= control target key start
LH: loop header
LB: loop body
LE: loop exit
PB: predicated region body
PF: predicated region fallthrough
CT: control target
= control target key end

     0   :  { %s839_s12 = smov 0   ;;  %s926_s0 = inlined_call_operand.vmem [shape: bf16[2,16,102], index: 0, kind: input, shape index: {}]   ;;  %s927_s1 = inlined_call_operand.vmem [shape: bf16[9,8,16], index: 1, kind: input, shape index: {}]   ;;  %s928_s2 = inlined_call_operand.vmem [shape: f32[8,1], index: 2, kind: input, shape index: {}]   ;;  %s929_s3 = inlined_call_operand.vmem [shape: bf16[2,1,8,80], index: 3, kind: output, shape index: {}]  }
   0x1 LB: > { %s678_s13 = sadd.s32 4294967295, %s806_s12   ;;  %p682_p0 = scmp.ge.s32.totalorder %s806_s12, 1  ;;  %s806_s12 = sphi %s839_s12, %s13_s12  }
   0x2   : > { %p137_p1 = scmp.lt.s32.totalorder %s806_s12, 3 }
   0x4   : > { %p138_p2 = pnand %p682_p0, %p137_p1 }
   0x5   : > { %p160_p3 = scmp.lt.s32.totalorder (!%p138_p2), %s678_s13, 1  ;;  %v808_v0 = vmov (!%p138_p2), 0.0   ;;  %vm809_vm0 = vmmov (!%p138_p2), 0   ;;  %s810_s18 = smov (!%p138_p2), 127   ;;  %vm184_vm1 = vcmask (!%p138_p2), 130048   ;;  %v170_v3 = vld [vmem:[%s928_s2] sm:$0xff] (!%p138_p2) }
   0x6   : > { %141 = sbr.rel (%p138_p2) target bundleno = 388 (0x184), region = 32  ;;  %725 = vmatprep.subr.bf16.mxu0 (!%p138_p2), %v808_v0  ;;  %731 = vmatprep.subr.bf16.mxu1 (!%p138_p2), %v808_v0  ;;  %s811_s19 = smov (!%p138_p2), 118   ;;  %v173_v2 = vld [vmem:[%s927_s1] sm:$0xf] (!%p138_p2)  ;;  %v818_v4 = vmov (!%p138_p2), 0   ;;  %vm623_vm2 = vcmask (!%p138_p2), 650240  }
   0x7   : > { %727 = vmatprep.mubr.msk.bf16.mxu0 (!%p138_p2), %vm809_vm0, %v808_v0  ;;  %733 = vmatprep.mubr.msk.bf16.mxu1 (!%p138_p2), %vm809_vm0, %v808_v0  ;;  %s812_s22 = smov (!%p138_p2), 126   ;;  %s813_s23 = smov (!%p138_p2), 117   ;;  %v686_v7 = vld [vmem:[%s927_s1 + $0x4] sm:$0xf] (!%p138_p2)  ;;  %v692_v8 = vld [vmem:[%s927_s1 + $0xc] sm:$0xf] (!%p138_p2) }
   0x8   : > { %s814_s24 = smov (!%p138_p2), 116   ;;  %s815_s25 = smov (!%p138_p2), 108   ;;  %798 = vset.pattern.permute.xlu0 (!%p138_p2), %v818_v4  ;;  %v690_v11 = vld [vmem:[%s927_s1 + $0x8] sm:$0xf] (!%p138_p2)  ;;  %v696_v12 = vld [vmem:[%s927_s1 + $0x14] sm:$0xf] (!%p138_p2) }
   0x9   : > { %s816_s26 = smov (!%p138_p2), 107   ;;  %s817_s27 = smov (!%p138_p2), 106   ;;  %v694_v15 = vld [vmem:[%s927_s1 + $0x10] sm:$0xf] (!%p138_p2)  ;;  %v700_v16 = vld [vmem:[%s927_s1 + $0x1c] sm:$0xf] (!%p138_p2) }
   0xa   : > { %v698_v18 = vld [vmem:[%s927_s1 + $0x18] sm:$0xf] (!%p138_p2)  ;;  %v702_v20 = vld [vmem:[%s927_s1 + $0x20] sm:$0xf] (!%p138_p2) }
   0xd   : > { %s931_s13 = smov (!%p160_p3, %s678_s13), 1 }
   0xe   : > { %s706_s14 = sshll.u32 %s931_s13, 3  ;;  %s685_s21 = sshll.u32 %s931_s13, 2 }
   0xf   : > { %s164_s17 = scalar_lea.vmem %s926_s0, %s706_s14 }
  0x10   : > { %v799_v1 = vld [vmem:[%s164_s17] sm:$0xff]  }
  0x11   : > { %181 = vrot.lane.b32.xlu0 %v799_v1, %s810_s18  ;;  %323 = vrot.lane.b32.xlu1 %v799_v1, %s811_s19 }
  0x12   : > { %732 = vmatpush3.bf16.msra.mxu1 %v799_v1 }
  0x13   : > { %743 = vmatprep.subr.bf16.mxu1 %v808_v0 }
  0x15   : > { %274 = vrot.lane.b32.xlu0 %v799_v1, %s812_s22  ;;  %372 = vrot.lane.b32.xlu1 %v799_v1, %s813_s23 }
  0x16   : > { %734 = vmatmul.mubr.msk.bf16.vlgmr.msra.gmra.mrb[0].mxu1 %vm184_vm1, %v173_v2 }
  0x17   : > { %745 = vmatprep.mubr.msk.bf16.mxu1 %vm809_vm0, %v808_v0 }
  0x19   : > { %421 = vrot.lane.b32.xlu0 %v799_v1, %s814_s24  ;;  %470 = vrot.lane.b32.xlu1 %v799_v1, %s815_s25  ;;  %s168_s24 = scalar_lea.vmem %s929_s3, %s685_s21 }
  0x1d   : > { %519 = vrot.lane.b32.xlu0 %v799_v1, %s816_s26  ;;  %568 = vrot.lane.b32.xlu1 %v799_v1, %s817_s27 }
  0x21   : > { %617 = vperm.xlu0 %798, %v170_v3  }
  0x83   : > { %v182_v5 = vpop.permute.xlu0 %181  ;;  %v324_v6 = vpop.permute.xlu1 %323 }
  0x84   : > { %726 = vmatpush3.bf16.msra.mxu0 %v182_v5  ;;  %744 = vmatpush3.bf16.msra.mxu1 %v324_v6 }
  0x85   : > { %737 = vmatprep.subr.bf16.mxu0 %v808_v0  ;;  %755 = vmatprep.subr.bf16.mxu1 %v808_v0 }
  0x87   : > { %728 = vmatmul.mubr.msk.bf16.vlgmr.msra.gmra.mrb[0].mxu0 %vm184_vm1, %v686_v7  ;;  %v275_v9 = vpop.permute.xlu0 %274  ;;  %746 = vmatmul.mubr.msk.bf16.vlgmr.msra.gmra.mrb[4].mxu1 %vm184_vm1, %v692_v8  ;;  %v373_v13 = vpop.permute.xlu1 %372 }
  0x88   : > { %738 = vmatpush3.bf16.msra.mxu0 %v275_v9  ;;  %739 = vmatprep.mubr.msk.bf16.mxu0 %vm809_vm0, %v808_v0 }
  0x89   : > { %749 = vmatprep.subr.bf16.mxu0 %v808_v0  ;;  %757 = vmatprep.mubr.msk.bf16.mxu1 %vm809_vm0, %v808_v0 }
  0x8b   : > { %v422_v10 = vpop.permute.xlu0 %421  ;;  %v471_v17 = vpop.permute.xlu1 %470 }
  0x8c   : > { %756 = vmatpush3.bf16.msra.mxu1 %v422_v10 }
  0x8d   : > { %767 = vmatprep.subr.bf16.mxu1 %v808_v0 }
  0x8f   : > { %740 = vmatmul.mubr.msk.bf16.vlgmr.msra.gmra.mrb[4].mxu0 %vm184_vm1, %v690_v11  ;;  %758 = vmatmul.mubr.msk.bf16.vlgmr.msra.gmra.mrb[8].mxu1 %vm184_vm1, %v696_v12  ;;  %v520_v14 = vpop.permute.xlu0 %519  ;;  %v569_v19 = vpop.permute.xlu1 %568 }
  0x90   : > { %750 = vmatpush3.bf16.msra.mxu0 %v373_v13  ;;  %751 = vmatprep.mubr.msk.bf16.mxu0 %vm809_vm0, %v808_v0 }
  0x91   : > { %761 = vmatprep.subr.bf16.mxu0 %v808_v0  ;;  %768 = vmatpush3.bf16.msra.mxu1 %v520_v14 }
  0x92   : > { %769 = vmatprep.mubr.msk.bf16.mxu1 %vm809_vm0, %v808_v0 }
  0x97   : > { %752 = vmatmul.mubr.msk.bf16.vlgmr.msra.gmra.mrb[8].mxu0 %vm184_vm1, %v694_v15  ;;  %770 = vmatmul.mubr.msk.bf16.vlgmr.msra.gmra.mrb[12].mxu1 %vm184_vm1, %v700_v16 }
  0x98   : > { %762 = vmatpush3.bf16.msra.mxu0 %v471_v17  ;;  %763 = vmatprep.mubr.msk.bf16.mxu0 %vm809_vm0, %v808_v0 }
  0x99   : > { %773 = vmatprep.subr.bf16.mxu0 %v808_v0 }
  0x9f   : > { %764 = vmatmul.mubr.msk.bf16.vlgmr.msra.gmra.mrb[12].mxu0 %vm184_vm1, %v698_v18 }
  0xa0   : > { %774 = vmatpush3.bf16.msra.mxu0 %v569_v19  ;;  %775 = vmatprep.mubr.msk.bf16.mxu0 %vm809_vm0, %v808_v0  ;;  %v618_v61 = vpop.permute.xlu0 %617 }
  0xa7   : > { %776 = vmatmul.mubr.msk.bf16.vlgmr.msra.gmra.mrb[16].mxu0 %vm184_vm1, %v702_v20 }
  0xe9   : > { %v266_v21 = vpop.f32.mrb[0].mxu1 }
  0xea   : > { %v735_v22 = vpop.f32.mrb[1].mxu1 }
  0xeb   : > { %v269_v23 = vpop.f32.mrb[2].mxu1 }
  0xec   : > { %v736_v24 = vpop.f32.mrb[3].mxu1 }
 0x15a   : > { %v222_v25 = vpop.f32.mrb[0].mxu0  ;;  %v363_v26 = vpop.f32.mrb[4].mxu1 }
 0x15b   : > { %v729_v27 = vpop.f32.mrb[1].mxu0  ;;  %v267_v28 = vadd.f32 %v266_v21, %v222_v25  ;;  %v747_v29 = vpop.f32.mrb[5].mxu1 }
 0x15c   : > { %v225_v30 = vpop.f32.mrb[2].mxu0  ;;  %v366_v31 = vpop.f32.mrb[6].mxu1 }
 0x15d   : > { %v730_v32 = vpop.f32.mrb[3].mxu0  ;;  %v748_v33 = vpop.f32.mrb[7].mxu1 }
 0x162   : > { %v314_v34 = vpop.f32.mrb[4].mxu0  ;;  %v461_v35 = vpop.f32.mrb[8].mxu1 }
 0x163   : > { %v320_v36 = vadd.f32 %v314_v34, %v267_v28  ;;  %v741_v37 = vpop.f32.mrb[5].mxu0  ;;  %v759_v38 = vpop.f32.mrb[9].mxu1 }
 0x164   : > { %v317_v39 = vpop.f32.mrb[6].mxu0  ;;  %v464_v40 = vpop.f32.mrb[10].mxu1 }
 0x165   : > { %v369_v41 = vadd.f32 %v363_v26, %v320_v36  ;;  %v742_v42 = vpop.f32.mrb[7].mxu0  ;;  %v760_v43 = vpop.f32.mrb[11].mxu1 }
 0x16a   : > { %v412_v44 = vpop.f32.mrb[8].mxu0  ;;  %v559_v45 = vpop.f32.mrb[12].mxu1 }
 0x16b   : > { %v418_v46 = vadd.f32 %v412_v44, %v369_v41  ;;  %v753_v47 = vpop.f32.mrb[9].mxu0  ;;  %v771_v48 = vpop.f32.mrb[13].mxu1 }
 0x16c   : > { %v415_v49 = vpop.f32.mrb[10].mxu0  ;;  %v562_v50 = vpop.f32.mrb[14].mxu1 }
 0x16d   : > { %v467_v51 = vadd.f32 %v461_v35, %v418_v46  ;;  %v754_v52 = vpop.f32.mrb[11].mxu0  ;;  %v772_v53 = vpop.f32.mrb[15].mxu1 }
 0x172   : > { %v510_v54 = vpop.f32.mrb[12].mxu0 }
 0x173   : > { %v516_v55 = vadd.f32 %v510_v54, %v467_v51  ;;  %v765_v56 = vpop.f32.mrb[13].mxu0 }
 0x174   : > { %v513_v57 = vpop.f32.mrb[14].mxu0 }
 0x175   : > { %v565_v58 = vadd.f32 %v559_v45, %v516_v55  ;;  %v766_v59 = vpop.f32.mrb[15].mxu0 }
 0x17a   : > { %v608_v60 = vpop.f32.mrb[16].mxu0 }
 0x17b   : > { %v614_v62 = vadd.f32 %v608_v60, %v565_v58  ;;  %v777_v63 = vpop.f32.mrb[17].mxu0 }
 0x17c   : > { %v611_v0 = vpop.f32.mrb[18].mxu0 }
 0x17d   : > { %v620_v1 = vadd.f32 %v618_v61, %v614_v62  ;;  %v778_v2 = vpop.f32.mrb[19].mxu0 }
 0x17f   : > { %v621_v3 = vmax.f32 %v620_v1, 0.0 }
 0x181   : > { %v622_v4 = vpack.c.bf16 %v621_v3, %v621_v3 }
 0x183   : > { %624 = vst.msk [vmem:[%s168_s24] sm:$0xf] %vm623_vm2, %v622_v4 }
 0x184 PF: > { %s13_s12 = sadd.s32 1, %s806_s12  }
 0x185   : > { %p10_p4 = scmp.ge.s32.totalorder %s13_s12, 4  }
 0x187   :  { %12 = sbr.rel (!%p10_p4) target bundleno = 1 (0x1), region = 70 }

// kernel: unet_forward.15
= control target key start
LH: loop header
LB: loop body
LE: loop exit
PB: predicated region body
PF: predicated region fallthrough
CT: control target
= control target key end

     0   :  { %s866_s12 = smov 0   ;;  %s972_s0 = inlined_call_operand.vmem [shape: bf16[2,8,82], index: 0, kind: input, shape index: {}]   ;;  %s973_s1 = inlined_call_operand.vmem [shape: bf16[9,4,8], index: 1, kind: input, shape index: {}]   ;;  %s974_s2 = inlined_call_operand.vmem [shape: f32[4,1], index: 2, kind: input, shape index: {}]   ;;  %s975_s3 = inlined_call_operand.vmem [shape: bf16[2,4,4,72], index: 3, kind: output, shape index: {}]  }
   0x1 LB: > { %s707_s13 = sadd.s32 4294967295, %s838_s12   ;;  %p711_p0 = scmp.ge.s32.totalorder %s838_s12, 1  ;;  %s838_s12 = sphi %s866_s12, %s13_s12  }
   0x2   : > { %p136_p1 = scmp.lt.s32.totalorder %s838_s12, 3 }
   0x4   : > { %p137_p2 = pnand %p711_p0, %p136_p1 }
   0x5   : > { %p159_p3 = scmp.lt.s32.totalorder (!%p137_p2), %s707_s13, 1  ;;  %v840_v0 = vmov (!%p137_p2), 0.0   ;;  %vm841_vm0 = vmmov (!%p137_p2), 0   ;;  %vm181_vm1 = vcmask (!%p137_p2), 1043456   ;;  %s842_s18 = smov (!%p137_p2), 127   ;;  %vm177_vm2 = vcmask (!%p137_p2), 64512  }
   0x6   : > { %140 = sbr.rel (%p137_p2) target bundleno = 385 (0x181), region = 32  ;;  %759 = vmatprep.subr.bf16.mxu0 (!%p137_p2), %v840_v0  ;;  %761 = vmatprep.mubr.msk.bf16.mxu0 (!%p137_p2), %vm841_vm0, %v840_v0  ;;  %v171_v9 = vld [vmem:[%s973_s1] sm:$0x3] (!%p137_p2)  ;;  %s843_s21 = smov (!%p137_p2), 119   ;;  %v716_v11 = vld [vmem:[%s973_s1 + $0x2] sm:$0x3] (!%p137_p2) }
   0x7   : > { %765 = vmatprep.subr.bf16.mxu1 (!%p137_p2), %v840_v0  ;;  %767 = vmatprep.mubr.msk.bf16.mxu1 (!%p137_p2), %vm841_vm0, %v840_v0  ;;  %s844_s22 = smov (!%p137_p2), 118   ;;  %v169_v13 = vld [vmem:[%s974_s2] sm:$0xf] (!%p137_p2)  ;;  %v845_v14 = vmov (!%p137_p2), 0   ;;  %v722_v15 = vld [vmem:[%s973_s1 + $0x6] sm:$0x3] (!%p137_p2) }
   0x8   : > { %827 = vset.pattern.permute.xlu1 (!%p137_p2), %v845_v14  ;;  %828 = vset.pattern.permute.xlu0 (!%p137_p2), %v845_v14  ;;  %v728_v17 = vld [vmem:[%s973_s1 + $0xa] sm:$0x3] (!%p137_p2)  ;;  %v717_v20 = vld [vmem:[%s973_s1 + $0x4] sm:$0x3] (!%p137_p2)  ;;  %v723_v26 = vld [vmem:[%s973_s1 + $0x8] sm:$0x3] (!%p137_p2) }
   0x9   : > { %v735_v27 = vld [vmem:[%s973_s1 + $0x10] sm:$0x3] (!%p137_p2)  ;;  %v729_v30 = vld [vmem:[%s973_s1 + $0xc] sm:$0x3] (!%p137_p2)  ;;  %v733_v32 = vld [vmem:[%s973_s1 + $0xe] sm:$0x3] (!%p137_p2) }
   0xa   : > { %vm227_vm3 = vcmask (!%p137_p2), 582656  }
   0xd   : > { %s977_s13 = smov (!%p159_p3, %s707_s13), 1 }
   0xe   : > { %s712_s14 = sshll.u32 %s977_s13, 2  ;;  %s740_s16 = sshll.u32 %s977_s13, 3 }
   0xf   : > { %s162_s17 = scalar_lea.vmem %s972_s0, %s712_s14  ;;  %s959_s19 = scalar_lea.vmem %s975_s3, %s740_s16 }
  0x10   : > { %v229_v1 = vld [vmem:[%s162_s17] sm:$0xf] }
  0x11   : > { %v336_v2 = vld [vmem:[%s162_s17] sm:$0xf]  ;;  %v718_v4 = vcombine.low %v229_v1, %v229_v1  ;;  %v289_v10 = vsel %vm181_vm1, %v229_v1, 0 }
  0x12   : > { %v443_v3 = vld [vmem:[%s162_s17] sm:$0xf]  ;;  %v724_v8 = vcombine.low %v336_v2, %v336_v2  ;;  %v396_v12 = vsel %vm181_vm1, %v336_v2, 0 }
  0x13   : > { %v730_v5 = vcombine.low %v443_v3, %v443_v3  ;;  %v170_v6 = vld [vmem:[%s162_s17] sm:$0xf]  ;;  %237 = vrot.lane.b32.xlu0 %v718_v4, %s842_s18  ;;  %v503_v16 = vsel %vm181_vm1, %v443_v3, 0 }
  0x14   : > { %v183_v7 = vsel %vm181_vm1, %v170_v6, 0 }
  0x15   : > { %451 = vrot.lane.b32.xlu1 %v730_v5, %s842_s18  ;;  %760 = vmatpush3.bf16.msra.mxu0 %v183_v7 }
  0x16   : > { %771 = vmatprep.subr.bf16.mxu0 %v840_v0 }
  0x17   : > { %344 = vrot.lane.b32.xlu0 %v724_v8, %s843_s21 }
  0x18   : > { %762 = vmatmul.mubr.msk.bf16.vlgmr.msra.gmra.mrb[0].mxu0 %vm177_vm2, %v171_v9 }
  0x19   : > { %547 = vrot.lane.b32.xlu1 %v730_v5, %s843_s21  ;;  %772 = vmatpush3.bf16.msra.mxu0 %v289_v10 }
  0x1a   : > { %773 = vmatprep.mubr.msk.bf16.mxu0 %vm841_vm0, %v840_v0  ;;  %783 = vmatprep.subr.bf16.mxu0 %v840_v0 }
  0x1b   : > { %598 = vrot.lane.b32.xlu0 %v730_v5, %s844_s22 }
  0x1d   : > { %174 = vperm.xlu1 %827, %v169_v13  }
  0x20   : > { %774 = vmatmul.mubr.msk.bf16.vlgmr.msra.gmra.mrb[4].mxu0 %vm177_vm2, %v716_v11 }
  0x21   : > { %784 = vmatpush3.bf16.msra.mxu0 %v396_v12  ;;  %785 = vmatprep.mubr.msk.bf16.mxu0 %vm841_vm0, %v840_v0 }
  0x22   : > { %795 = vmatprep.subr.bf16.mxu0 %v840_v0 }
  0x28   : > { %786 = vmatmul.mubr.msk.bf16.vlgmr.msra.gmra.mrb[8].mxu0 %vm177_vm2, %v722_v15 }
  0x29   : > { %796 = vmatpush3.bf16.msra.mxu0 %v503_v16  ;;  %797 = vmatprep.mubr.msk.bf16.mxu0 %vm841_vm0, %v840_v0 }
  0x2a   : > { %807 = vmatprep.subr.bf16.mxu0 %v840_v0 }
  0x30   : > { %798 = vmatmul.mubr.msk.bf16.vlgmr.msra.gmra.mrb[12].mxu0 %vm177_vm2, %v728_v17 }
  0x31   : > { %809 = vmatprep.mubr.msk.bf16.mxu0 %vm841_vm0, %v840_v0 }
  0x85   : > { %v238_v18 = vpop.permute.xlu0 %237 }
  0x86   : > { %v243_v19 = vsel %vm181_vm1, %v238_v18, 0 }
  0x87   : > { %766 = vmatpush3.bf16.msra.mxu1 %v243_v19  ;;  %v452_v23 = vpop.permute.xlu1 %451 }
  0x88   : > { %777 = vmatprep.subr.bf16.mxu1 %v840_v0  ;;  %v457_v28 = vsel %vm181_vm1, %v452_v23, 0 }
  0x89   : > { %v345_v21 = vpop.permute.xlu0 %344 }
  0x8a   : > { %v350_v22 = vsel %vm181_vm1, %v345_v21, 0  ;;  %768 = vmatmul.mubr.msk.bf16.vlgmr.msra.gmra.mrb[0].mxu1 %vm177_vm2, %v717_v20 }
  0x8b   : > { %778 = vmatpush3.bf16.msra.mxu1 %v350_v22  ;;  %779 = vmatprep.mubr.msk.bf16.mxu1 %vm841_vm0, %v840_v0  ;;  %v548_v29 = vpop.permute.xlu1 %547 }
  0x8c   : > { %789 = vmatprep.subr.bf16.mxu1 %v840_v0  ;;  %v553_v31 = vsel %vm181_vm1, %v548_v29, 0 }
  0x8d   : > { %v599_v24 = vpop.permute.xlu0 %598 }
  0x8e   : > { %v604_v25 = vsel %vm181_vm1, %v599_v24, 0 }
  0x8f   : > { %808 = vmatpush3.bf16.msra.mxu0 %v604_v25 }
  0x92   : > { %780 = vmatmul.mubr.msk.bf16.vlgmr.msra.gmra.mrb[4].mxu1 %vm177_vm2, %v723_v26  ;;  %810 = vmatmul.mubr.msk.bf16.vlgmr.msra.gmra.mrb[16].mxu0 %vm177_vm2, %v735_v27 }
  0x93   : > { %790 = vmatpush3.bf16.msra.mxu1 %v457_v28  ;;  %791 = vmatprep.mubr.msk.bf16.mxu1 %vm841_vm0, %v840_v0 }
  0x94   : > { %801 = vmatprep.subr.bf16.mxu1 %v840_v0 }
  0x9a   : > { %792 = vmatmul.mubr.msk.bf16.vlgmr.msra.gmra.mrb[8].mxu1 %vm177_vm2, %v729_v30 }
  0x9b   : > { %802 = vmatpush3.bf16.msra.mxu1 %v553_v31  ;;  %803 = vmatprep.mubr.msk.bf16.mxu1 %vm841_vm0, %v840_v0 }
  0x9c   : > { %v175_v33 = vpop.permute.xlu1 %174 }
  0xa2   : > { %804 = vmatmul.mubr.msk.bf16.vlgmr.msra.gmra.mrb[12].mxu1 %vm177_vm2, %v733_v32 }
  0xeb   : > { %v219_v34 = vpop.f32.mrb[0].mxu0 }
  0xec   : > { %v763_v35 = vpop.f32.mrb[1].mxu0  ;;  %v220_v36 = vadd.f32 %v219_v34, %v175_v33 }
  0xed   : > { %v222_v37 = vpop.f32.mrb[2].mxu0 }
  0xee   : > { %v225_v38 = vmax.f32 %v220_v36, 0.0  ;;  %v764_v39 = vpop.f32.mrb[3].mxu0 }
  0xf0   : > { %v226_v40 = vpack.c.bf16 %v225_v38, %v225_v38 }
  0xf2   : > { %228 = vst.msk [vmem:[%s959_s19] sm:$0x3] %vm227_vm3, %v226_v40 }
  0xf3   : > { %v325_v41 = vpop.f32.mrb[4].mxu0 }
  0xf4   : > { %v775_v42 = vpop.f32.mrb[5].mxu0 }
  0xf5   : > { %v328_v43 = vpop.f32.mrb[6].mxu0 }
  0xf6   : > { %v776_v44 = vpop.f32.mrb[7].mxu0 }
  0xfb   : > { %v432_v45 = vpop.f32.mrb[8].mxu0 }
  0xfc   : > { %v787_v46 = vpop.f32.mrb[9].mxu0 }
  0xfd   : > { %v435_v47 = vpop.f32.mrb[10].mxu0 }
  0xfe   : > { %v788_v48 = vpop.f32.mrb[11].mxu0 }
 0x103   : > { %v539_v49 = vpop.f32.mrb[12].mxu0 }
 0x104   : > { %v799_v50 = vpop.f32.mrb[13].mxu0 }
 0x105   : > { %v542_v51 = vpop.f32.mrb[14].mxu0 }
 0x106   : > { %v800_v52 = vpop.f32.mrb[15].mxu0 }
 0x15d   : > { %v279_v53 = vpop.f32.mrb[0].mxu1 }
 0x15e   : > { %v326_v54 = vadd.f32 %v325_v41, %v279_v53  ;;  %v769_v55 = vpop.f32.mrb[1].mxu1 }
 0x15f   : > { %v282_v56 = vpop.f32.mrb[2].mxu1 }
 0x160   : > { %v331_v57 = vadd.f32 %v326_v54, %v175_v33  ;;  %v770_v58 = vpop.f32.mrb[3].mxu1 }
 0x162   : > { %v332_v59 = vmax.f32 %v331_v57, 0.0 }
 0x164   : > { %v333_v60 = vpack.c.bf16 %v332_v59, %v332_v59 }
 0x165   : > { %v386_v61 = vpop.f32.mrb[4].mxu1  ;;  %v640_v62 = vpop.f32.mrb[16].mxu0 }
 0x166   : > { %721 = vst.msk [vmem:[%s959_s19 + $0x2] sm:$0x3] %vm227_vm3, %v333_v60  ;;  %v433_v63 = vadd.f32 %v432_v45, %v386_v61  ;;  %v781_v0 = vpop.f32.mrb[5].mxu1  ;;  %v811_v1 = vpop.f32.mrb[17].mxu0 }
 0x167   : > { %v389_v2 = vpop.f32.mrb[6].mxu1  ;;  %v643_v3 = vpop.f32.mrb[18].mxu0 }
 0x168   : > { %v438_v4 = vadd.f32 %v433_v63, %v175_v33  ;;  %v782_v5 = vpop.f32.mrb[7].mxu1  ;;  %v812_v6 = vpop.f32.mrb[19].mxu0 }
 0x16a   : > { %v439_v7 = vmax.f32 %v438_v4, 0.0 }
 0x16c   : > { %v440_v8 = vpack.c.bf16 %v439_v7, %v439_v7 }
 0x16d   : > { %v493_v9 = vpop.f32.mrb[8].mxu1 }
 0x16e   : > { %727 = vst.msk [vmem:[%s959_s19 + $0x4] sm:$0x3] %vm227_vm3, %v440_v8  ;;  %v540_v10 = vadd.f32 %v539_v49, %v493_v9  ;;  %v793_v11 = vpop.f32.mrb[9].mxu1 }
 0x16f   : > { %v496_v12 = vpop.f32.mrb[10].mxu1 }
 0x170   : > { %v794_v13 = vpop.f32.mrb[11].mxu1 }
 0x175   : > { %v589_v14 = vpop.f32.mrb[12].mxu1 }
 0x176   : > { %v595_v15 = vadd.f32 %v589_v14, %v540_v10  ;;  %v805_v16 = vpop.f32.mrb[13].mxu1 }
 0x177   : > { %v592_v17 = vpop.f32.mrb[14].mxu1 }
 0x178   : > { %v646_v18 = vadd.f32 %v640_v62, %v595_v15  ;;  %v806_v19 = vpop.f32.mrb[15].mxu1 }
 0x17a   : > { %v647_v20 = vadd.f32 %v646_v18, %v175_v33 }
 0x17c   : > { %v648_v21 = vmax.f32 %v647_v20, 0.0 }
 0x17e   : > { %v649_v22 = vpack.c.bf16 %v648_v21, %v648_v21 }
 0x180   : > { %737 = vst.msk [vmem:[%s959_s19 + $0x6] sm:$0x3] %vm227_vm3, %v649_v22 }
 0x181 PF: > { %s13_s12 = sadd.s32 1, %s838_s12  }
 0x182   : > { %p10_p4 = scmp.ge.s32.totalorder %s13_s12, 4  }
 0x184   :  { %12 = sbr.rel (!%p10_p4) target bundleno = 1 (0x1), region = 73 }

// kernel: unet_forward.16
= control target key start
LH: loop header
LB: loop body
LE: loop exit
PB: predicated region body
PF: predicated region fallthrough
CT: control target
= control target key end

     0   :  { %s1413_s12 = smov 0   ;;  %s1548_s0 = inlined_call_operand.vmem [shape: bf16[2,8,326], index: 0, kind: input, shape index: {}]   ;;  %s1549_s1 = inlined_call_operand.vmem [shape: bf16[9,4,8], index: 1, kind: input, shape index: {}]   ;;  %s1550_s2 = inlined_call_operand.vmem [shape: f32[4,1], index: 2, kind: input, shape index: {}]   ;;  %s1551_s3 = inlined_call_operand.vmem [shape: bf16[2,1,4,288], index: 3, kind: output, shape index: {}]  }
   0x1 LB: > { %s1227_s13 = sadd.s32 4294967295, %s1379_s12   ;;  %p1231_p0 = scmp.ge.s32.totalorder %s1379_s12, 1  ;;  %s1379_s12 = sphi %s1413_s12, %s13_s12  }
   0x2   : > { %p137_p1 = scmp.lt.s32.totalorder %s1379_s12, 3 }
   0x4   : > { %p138_p2 = pnand %p1231_p0, %p137_p1 }
   0x5   : > { %p161_p3 = scmp.lt.s32.totalorder (!%p138_p2), %s1227_s13, 1  ;;  %v1381_v0 = vmov (!%p138_p2), 0.0   ;;  %vm1382_vm0 = vmmov (!%p138_p2), 0   ;;  %v1383_v1 = vmov (!%p138_p2), 0   ;;  %s1384_s18 = smov (!%p138_p2), 127   ;;  %vm199_vm1 = vcmask (!%p138_p2), 1043456  }
   0x6   : > { %141 = sbr.rel (%p138_p2) target bundleno = 434 (0x1b2), region = 32  ;;  %1293 = vmatprep.subr.bf16.mxu1 (!%p138_p2), %v1381_v0  ;;  %1295 = vmatprep.mubr.msk.bf16.mxu1 (!%p138_p2), %vm1382_vm0, %v1381_v0  ;;  %s1385_s19 = smov (!%p138_p2), 126   ;;  %v172_v6 = vld [vmem:[%s1550_s2] sm:$0xf] (!%p138_p2)  ;;  %vm195_vm2 = vcmask (!%p138_p2), 64512   ;;  %vm192_vm3 = vcmask (!%p138_p2), 1039360  }
   0x7   : > { %241 = vmatprep.mubr.bf16.mxu0 (!%p138_p2), %v1383_v1  ;;  %1369 = vset.pattern.permute.xlu0 (!%p138_p2), %v1383_v1  ;;  %s1386_s20 = smov (!%p138_p2), 110   ;;  %s1387_s21 = smov (!%p138_p2), 109   ;;  %v1234_v10 = vld [vmem:[%s1549_s1 + $0x2] sm:$0x3] (!%p138_p2)  ;;  %vm391_vm4 = vcmask (!%p138_p2), 1031168   ;;  %vm498_vm5 = vcmask (!%p138_p2), 900096  }
   0x8   : > { %s1388_s22 = smov (!%p138_p2), 108   ;;  %s1389_s23 = smov (!%p138_p2), 92   ;;  %v175_v20 = vld [vmem:[%s1549_s1] sm:$0x3] (!%p138_p2)  ;;  %v1244_v29 = vld [vmem:[%s1549_s1 + $0x4] sm:$0x3] (!%p138_p2) }
   0x9   : > { %s1390_s24 = smov (!%p138_p2), 91   ;;  %s1391_s25 = smov (!%p138_p2), 90   ;;  %vm605_vm6 = vcmask (!%p138_p2), 891904   ;;  %v1248_v37 = vld [vmem:[%s1549_s1 + $0x6] sm:$0x3] (!%p138_p2)  ;;  %vm712_vm7 = vcmask (!%p138_p2), 883712  }
   0xa   : > { %v1252_v45 = vld [vmem:[%s1549_s1 + $0x8] sm:$0x3] (!%p138_p2)  ;;  %vm819_vm8 = vcmask (!%p138_p2), 752640   ;;  %v1256_v53 = vld [vmem:[%s1549_s1 + $0xa] sm:$0x3] (!%p138_p2)  ;;  %vm926_vm9 = vcmask (!%p138_p2), 744448  }
   0xb   : > { %v1260_v61 = vld [vmem:[%s1549_s1 + $0xc] sm:$0x3] (!%p138_p2)  ;;  %vm1033_vm10 = vcmask (!%p138_p2), 736256   ;;  %vm1166_vm11 = vcmask (!%p138_p2), 1041408   ;;  %vm1167_vm12 = vcmask (!%p138_p2), 1043458   ;;  %vm1169_vm14 = vcmask (!%p138_p2), 259076  }
   0xc   : > { %vm1168_vm13 = vmor (!%p138_p2), %vm1167_vm12, %vm1166_vm11 }
   0xd   : > { %s1553_s13 = smov (!%p161_p3, %s1227_s13), 1  ;;  %vm1170_vm15 = vmor %vm1169_vm14, %vm1168_vm13 }
   0xe   : > { %s1347_s14 = smul.u32 12, %s1553_s13 }
  0x10   : > { %s165_s17 = scalar_lea.vmem %s1548_s0, %s1347_s14 }
  0x11   : > { %v1370_v2 = vld [vmem:[%s165_s17 + $0x8] ss:$0 sps:$4 sm:$0xff]   ;;  %v173_v3 = vld [vmem:[%s165_s17] sm:$0xff] }
  0x12   : > { %v1235_v4 = vcombine.low %v173_v3, %v173_v3  ;;  %190 = vrot.lane.b32.xlu1 %v1370_v2, %s1384_s18  ;;  %v1236_v5 = vcombine.high %v173_v3, %v173_v3  ;;  %v300_v11 = vsel %vm199_vm1, %v1370_v2, 0 }
  0x14   : > { %186 = vrot.lane.b32.xlu0 %v1235_v4, %s1384_s18  ;;  %v294_v18 = vsel %vm199_vm1, %v1235_v4, 0 }
  0x16   : > { %385 = vrot.lane.b32.xlu1 %v1235_v4, %s1385_s19 }
  0x18   : > { %188 = vrot.lane.b32.xlu0 %v1236_v5, %s1384_s18 }
  0x1a   : > { %389 = vrot.lane.b32.xlu1 %v1370_v2, %s1385_s19 }
  0x1c   : > { %387 = vrot.lane.b32.xlu0 %v1236_v5, %s1385_s19 }
  0x1e   : > { %494 = vrot.lane.b32.xlu1 %v1236_v5, %s1386_s20 }
  0x20   : > { %492 = vrot.lane.b32.xlu0 %v1235_v4, %s1386_s20 }
  0x22   : > { %599 = vrot.lane.b32.xlu1 %v1235_v4, %s1387_s21 }
  0x24   : > { %496 = vrot.lane.b32.xlu0 %v1370_v2, %s1386_s20 }
  0x26   : > { %603 = vrot.lane.b32.xlu1 %v1370_v2, %s1387_s21 }
  0x28   : > { %601 = vrot.lane.b32.xlu0 %v1236_v5, %s1387_s21  ;;  %s1348_s21 = smul.u32 6, %s1553_s13 }
  0x2a   : > { %708 = vrot.lane.b32.xlu1 %v1236_v5, %s1388_s22 }
  0x2c   : > { %706 = vrot.lane.b32.xlu0 %v1235_v4, %s1388_s22 }
  0x2e   : > { %813 = vrot.lane.b32.xlu1 %v1235_v4, %s1389_s23 }
  0x30   : > { %710 = vrot.lane.b32.xlu0 %v1370_v2, %s1388_s22 }
  0x32   : > { %817 = vrot.lane.b32.xlu1 %v1370_v2, %s1389_s23 }
  0x34   : > { %815 = vrot.lane.b32.xlu0 %v1236_v5, %s1389_s23 }
  0x36   : > { %922 = vrot.lane.b32.xlu1 %v1236_v5, %s1390_s24 }
  0x38   : > { %920 = vrot.lane.b32.xlu0 %v1235_v4, %s1390_s24 }
  0x3a   : > { %1027 = vrot.lane.b32.xlu1 %v1235_v4, %s1391_s25 }
  0x3c   : > { %924 = vrot.lane.b32.xlu0 %v1370_v2, %s1390_s24  ;;  %s170_s24 = scalar_lea.vmem %s1551_s3, %s1348_s21 }
  0x3e   : > { %1031 = vrot.lane.b32.xlu1 %v1370_v2, %s1391_s25 }
  0x40   : > { %1029 = vrot.lane.b32.xlu0 %v1236_v5, %s1391_s25 }
  0x44   : > { %1134 = vperm.xlu0 %1369, %v172_v6   ;;  %v1264_v6 = vld [vmem:[%s1549_s1 + $0xe] sm:$0x3] }
  0x84   : > { %v191_v7 = vpop.permute.xlu1 %190 }
  0x85   : > { %v207_v9 = vsel %vm199_vm1, %v191_v7, 0 }
  0x86   : > { %v187_v8 = vpop.permute.xlu0 %186  ;;  %1294 = vmatpush3.bf16.msra.mxu1 %v207_v9 }
  0x87   : > { %1299 = vmatprep.subr.bf16.mxu1 %v1381_v0 }
  0x88   : > { %v386_v12 = vpop.permute.xlu1 %385 }
  0x89   : > { %1296 = vmatmul.mubr.msk.bf16.vlgmr.msra.gmra.mrb[0].mxu1 %vm195_vm2, %v1234_v10 }
  0x8a   : > { %v189_v13 = vpop.permute.xlu0 %188  ;;  %1300 = vmatpush3.bf16.msra.mxu1 %v300_v11  ;;  %1301 = vmatprep.mubr.msk.bf16.mxu1 %vm1382_vm0, %v1381_v0  ;;  %v1268_v11 = vld [vmem:[%s1549_s1 + $0x10] sm:$0x3] }
  0x8b   : > { %v194_v14 = vsel %vm192_vm3, %v189_v13, %v191_v7  ;;  %v193_v15 = vsel %vm192_vm3, %v187_v8, %v189_v13  ;;  %1305 = vmatprep.subr.bf16.mxu1 %v1381_v0 }
  0x8c   : > { %1238 = vmatprep.subr.msk.bf16.mxu0 %vm199_vm1, %v194_v14  ;;  %v201_v16 = vsel %vm199_vm1, %v193_v15, 0  ;;  %v390_v17 = vpop.permute.xlu1 %389 }
  0x8d   : > { %210 = vmatpush1.bf16.msra.mxu0 %v201_v16  ;;  %v404_v22 = vsel %vm199_vm1, %v390_v17, 0 }
  0x8e   : > { %1241 = vmatprep.subr.msk.bf16.mxu0 %vm199_vm1, %v1236_v5  ;;  %v388_v19 = vpop.permute.xlu0 %387 }
  0x8f   : > { %v393_v21 = vsel %vm391_vm4, %v388_v19, %v390_v17  ;;  %v392_v25 = vsel %vm391_vm4, %v386_v12, %v388_v19 }
  0x90   : > { %1239 = vmatmul.mubr.msk.bf16.vlgmr.msra.gmra.mrb[0].mxu0 %vm195_vm2, %v1234_v10  ;;  %v495_v23 = vpop.permute.xlu1 %494  ;;  %v398_v26 = vsel %vm199_vm1, %v392_v25, 0 }
  0x91   : > { %303 = vmatpush1.bf16.msra.mxu0 %v294_v18  ;;  %334 = vmatprep.mubr.bf16.mxu0 %v1383_v1 }
  0x92   : > { %1302 = vmatmul.mubr.msk.bf16.vlgmr.msra.gmra.mrb[4].mxu1 %vm195_vm2, %v175_v20  ;;  %1245 = vmatprep.subr.msk.bf16.mxu0 %vm199_vm1, %v393_v21  ;;  %v493_v24 = vpop.permute.xlu0 %492 }
  0x93   : > { %1306 = vmatpush3.bf16.msra.mxu1 %v404_v22  ;;  %1307 = vmatprep.mubr.msk.bf16.mxu1 %vm1382_vm0, %v1381_v0  ;;  %v499_v33 = vsel %vm498_vm5, %v493_v24, %v495_v23 }
  0x94   : > { %1311 = vmatprep.subr.bf16.mxu1 %v1381_v0  ;;  %v600_v28 = vpop.permute.xlu1 %599  ;;  %v505_v35 = vsel %vm199_vm1, %v499_v33, 0 }
  0x96   : > { %v497_v27 = vpop.permute.xlu0 %496 }
  0x97   : > { %v500_v30 = vsel %vm498_vm5, %v495_v23, %v497_v27  ;;  %v511_v31 = vsel %vm199_vm1, %v497_v27, 0 }
  0x98   : > { %1242 = vmatmul.mubr.msk.bf16.vlgmr.msra.gmra.mrb[4].mxu0 %vm195_vm2, %v175_v20  ;;  %v604_v34 = vpop.permute.xlu1 %603 }
  0x99   : > { %407 = vmatpush1.bf16.msra.mxu0 %v398_v26  ;;  %438 = vmatprep.mubr.bf16.mxu0 %v1383_v1  ;;  %v618_v39 = vsel %vm199_vm1, %v604_v34, 0 }
  0x9a   : > { %1308 = vmatmul.mubr.msk.bf16.vlgmr.msra.gmra.mrb[8].mxu1 %vm195_vm2, %v1244_v29  ;;  %1249 = vmatprep.subr.msk.bf16.mxu0 %vm199_vm1, %v500_v30  ;;  %v602_v32 = vpop.permute.xlu0 %601 }
  0x9b   : > { %1312 = vmatpush3.bf16.msra.mxu1 %v511_v31  ;;  %1313 = vmatprep.mubr.msk.bf16.mxu1 %vm1382_vm0, %v1381_v0  ;;  %v607_v38 = vsel %vm605_vm6, %v602_v32, %v604_v34  ;;  %v606_v41 = vsel %vm605_vm6, %v600_v28, %v602_v32 }
  0x9c   : > { %1317 = vmatprep.subr.bf16.mxu1 %v1381_v0  ;;  %v709_v40 = vpop.permute.xlu1 %708  ;;  %v612_v43 = vsel %vm199_vm1, %v606_v41, 0 }
  0x9e   : > { %v707_v36 = vpop.permute.xlu0 %706 }
  0x9f   : > { %v713_v49 = vsel %vm712_vm7, %v707_v36, %v709_v40 }
  0xa0   : > { %1246 = vmatmul.mubr.msk.bf16.vlgmr.msra.gmra.mrb[8].mxu0 %vm195_vm2, %v1244_v29  ;;  %v814_v44 = vpop.permute.xlu1 %813  ;;  %v719_v51 = vsel %vm199_vm1, %v713_v49, 0 }
  0xa1   : > { %514 = vmatpush1.bf16.msra.mxu0 %v505_v35  ;;  %545 = vmatprep.mubr.bf16.mxu0 %v1383_v1 }
  0xa2   : > { %1314 = vmatmul.mubr.msk.bf16.vlgmr.msra.gmra.mrb[12].mxu1 %vm195_vm2, %v1248_v37  ;;  %1253 = vmatprep.subr.msk.bf16.mxu0 %vm199_vm1, %v607_v38  ;;  %v711_v42 = vpop.permute.xlu0 %710 }
  0xa3   : > { %1318 = vmatpush3.bf16.msra.mxu1 %v618_v39  ;;  %1319 = vmatprep.mubr.msk.bf16.mxu1 %vm1382_vm0, %v1381_v0  ;;  %v714_v46 = vsel %vm712_vm7, %v709_v40, %v711_v42  ;;  %v725_v47 = vsel %vm199_vm1, %v711_v42, 0 }
  0xa4   : > { %1323 = vmatprep.subr.bf16.mxu1 %v1381_v0  ;;  %v818_v50 = vpop.permute.xlu1 %817 }
  0xa5   : > { %v832_v55 = vsel %vm199_vm1, %v818_v50, 0 }
  0xa6   : > { %v816_v48 = vpop.permute.xlu0 %815 }
  0xa7   : > { %v821_v54 = vsel %vm819_vm8, %v816_v48, %v818_v50  ;;  %v820_v57 = vsel %vm819_vm8, %v814_v44, %v816_v48 }
  0xa8   : > { %1250 = vmatmul.mubr.msk.bf16.vlgmr.msra.gmra.mrb[12].mxu0 %vm195_vm2, %v1248_v37  ;;  %v923_v56 = vpop.permute.xlu1 %922  ;;  %v826_v59 = vsel %vm199_vm1, %v820_v57, 0 }
  0xa9   : > { %621 = vmatpush1.bf16.msra.mxu0 %v612_v43  ;;  %652 = vmatprep.mubr.bf16.mxu0 %v1383_v1 }
  0xaa   : > { %1320 = vmatmul.mubr.msk.bf16.vlgmr.msra.gmra.mrb[16].mxu1 %vm195_vm2, %v1252_v45  ;;  %1257 = vmatprep.subr.msk.bf16.mxu0 %vm199_vm1, %v714_v46  ;;  %v921_v52 = vpop.permute.xlu0 %920 }
  0xab   : > { %1324 = vmatpush3.bf16.msra.mxu1 %v725_v47  ;;  %1325 = vmatprep.mubr.msk.bf16.mxu1 %vm1382_vm0, %v1381_v0  ;;  %v927_v2 = vsel %vm926_vm9, %v921_v52, %v923_v56 }
  0xac   : > { %1329 = vmatprep.subr.bf16.mxu1 %v1381_v0  ;;  %v1028_v60 = vpop.permute.xlu1 %1027  ;;  %v933_v5 = vsel %vm199_vm1, %v927_v2, 0 }
  0xae   : > { %v925_v58 = vpop.permute.xlu0 %924 }
  0xaf   : > { %v928_v62 = vsel %vm926_vm9, %v923_v56, %v925_v58  ;;  %v939_v63 = vsel %vm199_vm1, %v925_v58, 0 }
  0xb0   : > { %1254 = vmatmul.mubr.msk.bf16.vlgmr.msra.gmra.mrb[16].mxu0 %vm195_vm2, %v1252_v45  ;;  %v1032_v4 = vpop.permute.xlu1 %1031 }
  0xb1   : > { %728 = vmatpush1.bf16.msra.mxu0 %v719_v51  ;;  %759 = vmatprep.mubr.bf16.mxu0 %v1383_v1  ;;  %v1046_v8 = vsel %vm199_vm1, %v1032_v4, 0 }
  0xb2   : > { %1326 = vmatmul.mubr.msk.bf16.vlgmr.msra.gmra.mrb[20].mxu1 %vm195_vm2, %v1256_v53  ;;  %1261 = vmatprep.subr.msk.bf16.mxu0 %vm199_vm1, %v821_v54  ;;  %v1030_v3 = vpop.permute.xlu0 %1029 }
  0xb3   : > { %1330 = vmatpush3.bf16.msra.mxu1 %v832_v55  ;;  %1331 = vmatprep.mubr.msk.bf16.mxu1 %vm1382_vm0, %v1381_v0  ;;  %v1035_v7 = vsel %vm1033_vm10, %v1030_v3, %v1032_v4  ;;  %v1034_v9 = vsel %vm1033_vm10, %v1028_v60, %v1030_v3 }
  0xb4   : > { %1335 = vmatprep.subr.bf16.mxu1 %v1381_v0  ;;  %v1040_v10 = vsel %vm199_vm1, %v1034_v9, 0 }
  0xb8   : > { %1258 = vmatmul.mubr.msk.bf16.vlgmr.msra.gmra.mrb[20].mxu0 %vm195_vm2, %v1256_v53 }
  0xb9   : > { %835 = vmatpush1.bf16.msra.mxu0 %v826_v59  ;;  %866 = vmatprep.mubr.bf16.mxu0 %v1383_v1 }
  0xba   : > { %1332 = vmatmul.mubr.msk.bf16.vlgmr.msra.gmra.mrb[24].mxu1 %vm195_vm2, %v1260_v61  ;;  %1265 = vmatprep.subr.msk.bf16.mxu0 %vm199_vm1, %v928_v62 }
  0xbb   : > { %1336 = vmatpush3.bf16.msra.mxu1 %v939_v63  ;;  %1337 = vmatprep.mubr.msk.bf16.mxu1 %vm1382_vm0, %v1381_v0 }
  0xbc   : > { %1341 = vmatprep.subr.bf16.mxu1 %v1381_v0 }
  0xc0   : > { %1262 = vmatmul.mubr.msk.bf16.vlgmr.msra.gmra.mrb[24].mxu0 %vm195_vm2, %v1260_v61 }
  0xc1   : > { %942 = vmatpush1.bf16.msra.mxu0 %v933_v5  ;;  %973 = vmatprep.mubr.bf16.mxu0 %v1383_v1 }
  0xc2   : > { %1338 = vmatmul.mubr.msk.bf16.vlgmr.msra.gmra.mrb[28].mxu1 %vm195_vm2, %v1264_v6  ;;  %1269 = vmatprep.subr.msk.bf16.mxu0 %vm199_vm1, %v1035_v7 }
  0xc3   : > { %1342 = vmatpush3.bf16.msra.mxu1 %v1046_v8  ;;  %1343 = vmatprep.mubr.msk.bf16.mxu1 %vm1382_vm0, %v1381_v0 }
  0xc8   : > { %1266 = vmatmul.mubr.msk.bf16.vlgmr.msra.gmra.mrb[28].mxu0 %vm195_vm2, %v1264_v6 }
  0xc9   : > { %1049 = vmatpush1.bf16.msra.mxu0 %v1040_v10  ;;  %1080 = vmatprep.mubr.bf16.mxu0 %v1383_v1 }
  0xca   : > { %1344 = vmatmul.mubr.msk.bf16.vlgmr.msra.gmra.mrb[32].mxu1 %vm195_vm2, %v1268_v11 }
  0xd0   : > { %1270 = vmatmul.mubr.msk.bf16.vlgmr.msra.gmra.mrb[32].mxu0 %vm195_vm2, %v1268_v11 }
 0x15c   : > { %v284_v12 = vpop.f32.mrb[0].mxu1 }
 0x15d   : > { %v1297_v13 = vpop.f32.mrb[1].mxu1 }
 0x15e   : > { %v287_v14 = vpop.f32.mrb[2].mxu1 }
 0x15f   : > { %v1298_v15 = vpop.f32.mrb[3].mxu1 }
 0x163   : > { %v243_v0 = vpop.f32.mrb[0].mxu0 }
 0x164   : > { %v245_v16 = vpop.f32.mrb[1].mxu0 }
 0x165   : > { %v247_v17 = vpop.f32.mrb[2].mxu0  ;;  %v377_v18 = vpop.f32.mrb[4].mxu1 }
 0x166   : > { %v248_v19 = vpop.f32.mrb[3].mxu0  ;;  %v378_v20 = vadd.f32 %v377_v18, %v284_v12  ;;  %v1303_v21 = vpop.f32.mrb[5].mxu1 }
 0x167   : > { %v380_v22 = vpop.f32.mrb[6].mxu1 }
 0x168   : > { %v1304_v23 = vpop.f32.mrb[7].mxu1 }
 0x16b   : > { %v336_v24 = vpop.f32.mrb[4].mxu0 }
 0x16c   : > { %v337_v25 = vadd.f32 %v336_v24, %v243_v0  ;;  %v338_v1 = vpop.f32.mrb[5].mxu0 }
 0x16d   : > { %v339_v26 = vadd.f32 %v338_v1, %v245_v16  ;;  %v340_v27 = vpop.f32.mrb[6].mxu0  ;;  %v481_v28 = vpop.f32.mrb[8].mxu1 }
 0x16e   : > { %v341_v29 = vpop.f32.mrb[7].mxu0  ;;  %v489_v30 = vadd.f32 %v481_v28, %v378_v20  ;;  %v1309_v31 = vpop.f32.mrb[9].mxu1 }
 0x16f   : > { %v484_v32 = vpop.f32.mrb[10].mxu1  ;;  %v1135_v28 = vpop.permute.xlu0 %1134 }
 0x170   : > { %v1310_v33 = vpop.f32.mrb[11].mxu1 }
 0x173   : > { %v440_v34 = vpop.f32.mrb[8].mxu0 }
 0x174   : > { %v487_v35 = vadd.f32 %v440_v34, %v337_v25  ;;  %v442_v36 = vpop.f32.mrb[9].mxu0 }
 0x175   : > { %v488_v37 = vadd.f32 %v442_v36, %v339_v26  ;;  %v444_v38 = vpop.f32.mrb[10].mxu0  ;;  %v588_v39 = vpop.f32.mrb[12].mxu1 }
 0x176   : > { %v445_v40 = vpop.f32.mrb[11].mxu0  ;;  %v596_v41 = vadd.f32 %v588_v39, %v489_v30  ;;  %v1315_v42 = vpop.f32.mrb[13].mxu1  ;;  %v1153_v39 = vlaneseq }
 0x177   : > { %v591_v43 = vpop.f32.mrb[14].mxu1 }
 0x178   : > { %v1316_v44 = vpop.f32.mrb[15].mxu1 }
 0x17b   : > { %v547_v45 = vpop.f32.mrb[12].mxu0 }
 0x17c   : > { %v594_v46 = vadd.f32 %v547_v45, %v487_v35  ;;  %v549_v47 = vpop.f32.mrb[13].mxu0  ;;  %v1154_v45 = vshrl.u32 %v1153_v39, 7 }
 0x17d   : > { %v595_v48 = vadd.f32 %v549_v47, %v488_v37  ;;  %v551_v49 = vpop.f32.mrb[14].mxu0  ;;  %v695_v50 = vpop.f32.mrb[16].mxu1  ;;  %v1392_v37 = vmov 1983009808  }
 0x17e   : > { %v552_v51 = vpop.f32.mrb[15].mxu0  ;;  %v703_v52 = vadd.f32 %v695_v50, %v596_v41  ;;  %v1321_v53 = vpop.f32.mrb[17].mxu1  ;;  %v1151_v38 = vunpack.c.l.s4 %v1392_v37 }
 0x17f   : > { %v698_v54 = vpop.f32.mrb[18].mxu1 }
 0x180   : > { %v1322_v55 = vpop.f32.mrb[19].mxu1  ;;  %v1152_v44 = vunpack.c.0.s8 %v1151_v38 }
 0x182   : > { %v1155_v53 = vsub.s32 %v1152_v44, %v1154_v45 }
 0x183   : > { %v654_v56 = vpop.f32.mrb[16].mxu0 }
 0x184   : > { %v701_v57 = vadd.f32 %v654_v56, %v594_v46  ;;  %v656_v58 = vpop.f32.mrb[17].mxu0 }
 0x185   : > { %v702_v59 = vadd.f32 %v656_v58, %v595_v48  ;;  %v658_v60 = vpop.f32.mrb[18].mxu0  ;;  %v802_v61 = vpop.f32.mrb[20].mxu1 }
 0x186   : > { %v659_v62 = vpop.f32.mrb[19].mxu0  ;;  %v810_v63 = vadd.f32 %v802_v61, %v703_v52  ;;  %v1327_v2 = vpop.f32.mrb[21].mxu1 }
 0x187   : > { %v805_v3 = vpop.f32.mrb[22].mxu1 }
 0x188   : > { %v1328_v4 = vpop.f32.mrb[23].mxu1 }
 0x18b   : > { %v761_v5 = vpop.f32.mrb[20].mxu0 }
 0x18c   : > { %v808_v6 = vadd.f32 %v761_v5, %v701_v57  ;;  %v763_v7 = vpop.f32.mrb[21].mxu0 }
 0x18d   : > { %v809_v8 = vadd.f32 %v763_v7, %v702_v59  ;;  %v765_v9 = vpop.f32.mrb[22].mxu0  ;;  %v909_v10 = vpop.f32.mrb[24].mxu1 }
 0x18e   : > { %v766_v11 = vpop.f32.mrb[23].mxu0  ;;  %v917_v12 = vadd.f32 %v909_v10, %v810_v63  ;;  %v1333_v13 = vpop.f32.mrb[25].mxu1 }
 0x18f   : > { %v912_v14 = vpop.f32.mrb[26].mxu1 }
 0x190   : > { %v1334_v15 = vpop.f32.mrb[27].mxu1 }
 0x193   : > { %v868_v0 = vpop.f32.mrb[24].mxu0 }
 0x194   : > { %v915_v16 = vadd.f32 %v868_v0, %v808_v6  ;;  %v870_v17 = vpop.f32.mrb[25].mxu0 }
 0x195   : > { %v916_v18 = vadd.f32 %v870_v17, %v809_v8  ;;  %v872_v19 = vpop.f32.mrb[26].mxu0  ;;  %v1016_v20 = vpop.f32.mrb[28].mxu1 }
 0x196   : > { %v873_v21 = vpop.f32.mrb[27].mxu0  ;;  %v1024_v22 = vadd.f32 %v1016_v20, %v917_v12  ;;  %v1339_v23 = vpop.f32.mrb[29].mxu1 }
 0x197   : > { %v1019_v24 = vpop.f32.mrb[30].mxu1 }
 0x198   : > { %v1340_v25 = vpop.f32.mrb[31].mxu1 }
 0x19b   : > { %v975_v1 = vpop.f32.mrb[28].mxu0 }
 0x19c   : > { %v1022_v26 = vadd.f32 %v975_v1, %v915_v16  ;;  %v977_v27 = vpop.f32.mrb[29].mxu0 }
 0x19d   : > { %v1023_v29 = vadd.f32 %v977_v27, %v916_v18  ;;  %v979_v30 = vpop.f32.mrb[30].mxu0  ;;  %v1123_v31 = vpop.f32.mrb[32].mxu1 }
 0x19e   : > { %v980_v32 = vpop.f32.mrb[31].mxu0  ;;  %v1131_v33 = vadd.f32 %v1123_v31, %v1024_v22  ;;  %v1345_v34 = vpop.f32.mrb[33].mxu1 }
 0x19f   : > { %v1126_v35 = vpop.f32.mrb[34].mxu1 }
 0x1a0   : > { %v1346_v36 = vpop.f32.mrb[35].mxu1  ;;  %v1139_v40 = vadd.f32 %v1135_v28, %v1131_v33 }
 0x1a2   : > { %v1142_v46 = vmax.f32 %v1139_v40, 0.0 }
 0x1a3   : > { %v1082_v41 = vpop.f32.mrb[32].mxu0 }
 0x1a4   : > { %v1129_v42 = vadd.f32 %v1082_v41, %v1022_v26  ;;  %v1084_v43 = vpop.f32.mrb[33].mxu0  ;;  %v1145_v54 = vpack.c.bf16 %v1142_v46, %v1142_v46 }
 0x1a5   : > { %v1130_v47 = vadd.f32 %v1084_v43, %v1023_v29  ;;  %v1086_v48 = vpop.f32.mrb[34].mxu0 }
 0x1a6   : > { %v1137_v49 = vadd.f32 %v1135_v28, %v1129_v42  ;;  %v1087_v50 = vpop.f32.mrb[35].mxu0  ;;  %v1163_v57 = vrot.slane %v1145_v54, %v1155_v53 }
 0x1a7   : > { %v1138_v51 = vadd.f32 %v1135_v28, %v1130_v47 }
 0x1a8   : > { %v1140_v52 = vmax.f32 %v1137_v49, 0.0 }
 0x1a9   : > { %v1141_v55 = vmax.f32 %v1138_v51, 0.0 }
 0x1ab   : > { %v1272_v56 = vpack.c.bf16 %v1141_v55, %v1140_v52 }
 0x1ad   : > { %v1156_v58 = vrot.slane %v1272_v56, %v1155_v53 }
 0x1af   : > { %v1164_v59 = vcombine.low %v1156_v58, %v1163_v57 }
 0x1b1   : > { %1171 = vst.msk [vmem:[%s170_s24] sm:$0x3f] %vm1170_vm15, %v1164_v59 }
 0x1b2 PF: > { %s13_s12 = sadd.s32 1, %s1379_s12  }
 0x1b3   : > { %p10_p4 = scmp.ge.s32.totalorder %s13_s12, 4  }
 0x1b5   :  { %12 = sbr.rel (!%p10_p4) target bundleno = 1 (0x1), region = 70 }

// kernel: unet_forward.17
= control target key start
LH: loop header
LB: loop body
LE: loop exit
PB: predicated region body
PF: predicated region fallthrough
CT: control target
= control target key end

     0   :  { %s1523_s12 = smov 0   ;;  %s1700_s0 = inlined_call_operand.vmem [shape: bf16[2,4,326], index: 0, kind: input, shape index: {}]   ;;  %s1701_s1 = inlined_call_operand.vmem [shape: bf16[9,3,4], index: 1, kind: input, shape index: {}]   ;;  %s1702_s2 = inlined_call_operand.vmem [shape: f32[3,1], index: 2, kind: input, shape index: {}]   ;;  %s1703_s3 = inlined_call_operand.vmem [shape: f32[2,1,3,288], index: 3, kind: output, shape index: {}]  }
   0x1 LB: > { %s1336_s13 = sadd.s32 4294967295, %s1489_s12   ;;  %p1340_p0 = scmp.ge.s32.totalorder %s1489_s12, 1  ;;  %s1489_s12 = sphi %s1523_s12, %s13_s12  }
   0x2   : > { %p137_p1 = scmp.lt.s32.totalorder %s1489_s12, 3 }
   0x4   : > { %p138_p2 = pnand %p1340_p0, %p137_p1 }
   0x5   : > { %p161_p3 = scmp.lt.s32.totalorder (!%p138_p2), %s1336_s13, 1  ;;  %v182_v0 = vlaneseq (!%p138_p2)  ;;  %v1491_v1 = vmov (!%p138_p2), 1983009808   ;;  %v1492_v3 = vmov (!%p138_p2), 0.0   ;;  %vm1493_vm0 = vmmov (!%p138_p2), 0   ;;  %s1495_s18 = smov (!%p138_p2), 127  }
   0x6   : > { %141 = sbr.rel (%p138_p2) target bundleno = 428 (0x1ac), region = 32  ;;  %v180_v2 = vunpack.c.l.s4 (!%p138_p2), %v1491_v1  ;;  %1398 = vmatprep.subr.bf16.mxu1 (!%p138_p2), %v1492_v3  ;;  %1400 = vmatprep.mubr.msk.bf16.mxu1 (!%p138_p2), %vm1493_vm0, %v1492_v3  ;;  %v1494_v6 = vmov (!%p138_p2), 0   ;;  %s1496_s19 = smov (!%p138_p2), 126   ;;  %v172_v48 = vld [vmem:[%s1702_s2] sm:$0x7] (!%p138_p2)  ;;  %vm207_vm1 = vcmask (!%p138_p2), 1041408  }
   0x7   : > { %v183_v4 = vshrl.u32 (!%p138_p2), %v182_v0, 7  ;;  %249 = vmatprep.mubr.bf16.mxu0 (!%p138_p2), %v1494_v6  ;;  %1474 = vset.pattern.permute.xlu0 (!%p138_p2), %v1494_v6  ;;  %s1497_s20 = smov (!%p138_p2), 110   ;;  %s1498_s21 = smov (!%p138_p2), 109   ;;  %vm200_vm2 = vcmask (!%p138_p2), 1039360   ;;  %v1343_v53 = vld [vmem:[%s1701_s1 + $0x2] sm:$0x3] (!%p138_p2) }
   0x8   : > { %v181_v5 = vunpack.c.0.s8 (!%p138_p2), %v180_v2  ;;  %s1499_s22 = smov (!%p138_p2), 108   ;;  %s1500_s23 = smov (!%p138_p2), 92   ;;  %vm203_vm3 = vcmask (!%p138_p2), 31744   ;;  %vm417_vm4 = vcmask (!%p138_p2), 1031168   ;;  %v174_v63 = vld [vmem:[%s1701_s1] sm:$0x3] (!%p138_p2) }
   0x9   : > { %s1501_s24 = smov (!%p138_p2), 91   ;;  %s1502_s25 = smov (!%p138_p2), 90   ;;  %vm542_vm5 = vcmask (!%p138_p2), 900096   ;;  %vm667_vm6 = vcmask (!%p138_p2), 891904   ;;  %vm792_vm7 = vcmask (!%p138_p2), 883712   ;;  %vm917_vm8 = vcmask (!%p138_p2), 752640  }
   0xa   : > { %v1539_v7 = vsub.s32 (!%p138_p2), %v181_v5, %v183_v4  ;;  %vm1042_vm9 = vcmask (!%p138_p2), 744448   ;;  %vm1167_vm10 = vcmask (!%p138_p2), 736256   ;;  %vm1279_vm11 = vcmask (!%p138_p2), 256000  }
   0xd   : > { %s1705_s13 = smov (!%p161_p3, %s1336_s13), 1 }
   0xe   : > { %s1452_s14 = smul.u32 6, %s1705_s13 }
  0x10   : > { %s1544_s17 = scalar_lea.vmem %s1700_s0, %s1452_s14 }
  0x11   : > { %v173_v8 = vld [vmem:[%s1544_s17] sm:$0x3f] }
  0x12   : > { %v1548_v9 = vrot.slane %v173_v8, %v1539_v7  ;;  %v178_v10 = vcombine.high %v173_v8, %v173_v8  ;;  %v391_v11 = vld [vmem:[%s1544_s17] sm:$0x3f] }
  0x13   : > { %v402_v14 = vrot.slane %v391_v11, %v1539_v7  ;;  %v395_v15 = vcombine.high %v391_v11, %v391_v11  ;;  %v516_v17 = vld [vmem:[%s1544_s17] sm:$0x3f] }
  0x14   : > { %194 = vrot.lane.b32.xlu0 %v1548_v9, %s1495_s18  ;;  %v1553_v12 = vrot.slane %v178_v10, %v1539_v7  ;;  %v1557_v13 = vcombine.high %v1548_v9, %v1548_v9  ;;  %v527_v19 = vrot.slane %v516_v17, %v1539_v7  ;;  %v520_v20 = vcombine.high %v516_v17, %v516_v17  ;;  %v641_v22 = vld [vmem:[%s1544_s17] sm:$0x3f] }
  0x15   : > { %v410_v16 = vcombine.high %v402_v14, %v402_v14  ;;  %v409_v18 = vrot.slane %v395_v15, %v1539_v7  ;;  %v652_v24 = vrot.slane %v641_v22, %v1539_v7  ;;  %v645_v25 = vcombine.high %v641_v22, %v641_v22  ;;  %v766_v27 = vld [vmem:[%s1544_s17] sm:$0x3f] }
  0x16   : > { %198 = vrot.lane.b32.xlu1 %v1553_v12, %s1495_s18  ;;  %v535_v21 = vcombine.high %v527_v19, %v527_v19  ;;  %v534_v23 = vrot.slane %v520_v20, %v1539_v7  ;;  %v777_v29 = vrot.slane %v766_v27, %v1539_v7  ;;  %v770_v30 = vcombine.high %v766_v27, %v766_v27  ;;  %v891_v32 = vld [vmem:[%s1544_s17] sm:$0x3f]  ;;  %v1358_v27 = vld [vmem:[%s1701_s1 + $0x8] sm:$0x3] }
  0x17   : > { %v660_v26 = vcombine.high %v652_v24, %v652_v24  ;;  %v659_v28 = vrot.slane %v645_v25, %v1539_v7  ;;  %v902_v34 = vrot.slane %v891_v32, %v1539_v7  ;;  %v895_v35 = vcombine.high %v891_v32, %v891_v32  ;;  %v1016_v37 = vld [vmem:[%s1544_s17] sm:$0x3f] }
  0x18   : > { %196 = vrot.lane.b32.xlu0 %v1557_v13, %s1495_s18  ;;  %v785_v31 = vcombine.high %v777_v29, %v777_v29  ;;  %v784_v33 = vrot.slane %v770_v30, %v1539_v7  ;;  %v1027_v39 = vrot.slane %v1016_v37, %v1539_v7  ;;  %v1020_v40 = vcombine.high %v1016_v37, %v1016_v37  ;;  %v1141_v42 = vld [vmem:[%s1544_s17] sm:$0x3f] }
  0x19   : > { %v910_v36 = vcombine.high %v902_v34, %v902_v34  ;;  %v909_v38 = vrot.slane %v895_v35, %v1539_v7  ;;  %v1152_v44 = vrot.slane %v1141_v42, %v1539_v7  ;;  %v1145_v45 = vcombine.high %v1141_v42, %v1141_v42  ;;  %v1350_v10 = vld [vmem:[%s1701_s1 + $0x4] sm:$0x3]  ;;  %v1362_v35 = vld [vmem:[%s1701_s1 + $0xa] sm:$0x3]  ;;  %v1366_v42 = vld [vmem:[%s1701_s1 + $0xc] sm:$0x3] }
  0x1a   : > { %411 = vrot.lane.b32.xlu1 %v402_v14, %s1496_s19  ;;  %v1035_v41 = vcombine.high %v1027_v39, %v1027_v39  ;;  %v1034_v43 = vrot.slane %v1020_v40, %v1539_v7  ;;  %v308_v56 = vsel %vm207_vm1, %v1553_v12, 0  ;;  %v302_v59 = vsel %vm207_vm1, %v1548_v9, 0 }
  0x1b   : > { %v1160_v46 = vcombine.high %v1152_v44, %v1152_v44  ;;  %v1159_v47 = vrot.slane %v1145_v45, %v1539_v7 }
  0x1c   : > { %413 = vrot.lane.b32.xlu0 %v410_v16, %s1496_s19 }
  0x1e   : > { %415 = vrot.lane.b32.xlu1 %v409_v18, %s1496_s19 }
  0x20   : > { %536 = vrot.lane.b32.xlu0 %v527_v19, %s1497_s20  ;;  %v1354_v19 = vld [vmem:[%s1701_s1 + $0x6] sm:$0x3] }
  0x22   : > { %538 = vrot.lane.b32.xlu1 %v535_v21, %s1497_s20 }
  0x24   : > { %540 = vrot.lane.b32.xlu0 %v534_v23, %s1497_s20 }
  0x26   : > { %661 = vrot.lane.b32.xlu1 %v652_v24, %s1498_s21 }
  0x28   : > { %663 = vrot.lane.b32.xlu0 %v660_v26, %s1498_s21 }
  0x2a   : > { %665 = vrot.lane.b32.xlu1 %v659_v28, %s1498_s21  ;;  %s1453_s21 = smul.u32 12, %s1705_s13 }
  0x2c   : > { %786 = vrot.lane.b32.xlu0 %v777_v29, %s1499_s22 }
  0x2e   : > { %788 = vrot.lane.b32.xlu1 %v785_v31, %s1499_s22 }
  0x30   : > { %790 = vrot.lane.b32.xlu0 %v784_v33, %s1499_s22 }
  0x32   : > { %911 = vrot.lane.b32.xlu1 %v902_v34, %s1500_s23 }
  0x34   : > { %913 = vrot.lane.b32.xlu0 %v910_v36, %s1500_s23 }
  0x36   : > { %915 = vrot.lane.b32.xlu1 %v909_v38, %s1500_s23 }
  0x38   : > { %1036 = vrot.lane.b32.xlu0 %v1027_v39, %s1501_s24 }
  0x3a   : > { %1038 = vrot.lane.b32.xlu1 %v1035_v41, %s1501_s24 }
  0x3c   : > { %1040 = vrot.lane.b32.xlu0 %v1034_v43, %s1501_s24  ;;  %s170_s24 = scalar_lea.vmem %s1703_s3, %s1453_s21 }
  0x3e   : > { %1161 = vrot.lane.b32.xlu1 %v1152_v44, %s1502_s25 }
  0x40   : > { %1163 = vrot.lane.b32.xlu0 %v1160_v46, %s1502_s25 }
  0x42   : > { %1165 = vrot.lane.b32.xlu1 %v1159_v47, %s1502_s25 }
  0x44   : > { %1268 = vperm.xlu0 %1474, %v172_v48  }
  0x86   : > { %v195_v49 = vpop.permute.xlu0 %194 }
  0x88   : > { %v199_v50 = vpop.permute.xlu1 %198 }
  0x89   : > { %v215_v51 = vsel %vm207_vm1, %v199_v50, 0 }
  0x8a   : > { %v197_v52 = vpop.permute.xlu0 %196  ;;  %1399 = vmatpush3.bf16.msra.mxu1 %v215_v51 }
  0x8b   : > { %v202_v54 = vsel %vm200_vm2, %v197_v52, %v199_v50  ;;  %v201_v55 = vsel %vm200_vm2, %v195_v49, %v197_v52  ;;  %1404 = vmatprep.subr.bf16.mxu1 %v1492_v3  ;;  %v1370_v49 = vld [vmem:[%s1701_s1 + $0xe] sm:$0x3] }
  0x8c   : > { %1344 = vmatprep.subr.msk.bf16.mxu0 %vm207_vm1, %v202_v54  ;;  %v209_v57 = vsel %vm207_vm1, %v201_v55, 0  ;;  %v412_v58 = vpop.permute.xlu1 %411 }
  0x8d   : > { %218 = vmatpush1.bf16.msra.mxu0 %v209_v57  ;;  %1401 = vmatmul.mubr.msk.bf16.vlgmr.msra.gmra.mrb[0].mxu1 %vm203_vm3, %v1343_v53 }
  0x8e   : > { %1347 = vmatprep.subr.msk.bf16.mxu0 %vm207_vm1, %v1557_v13  ;;  %v414_v60 = vpop.permute.xlu0 %413  ;;  %1405 = vmatpush3.bf16.msra.mxu1 %v308_v56 }
  0x8f   : > { %1406 = vmatprep.mubr.msk.bf16.mxu1 %vm1493_vm0, %v1492_v3  ;;  %1410 = vmatprep.subr.bf16.mxu1 %v1492_v3  ;;  %v418_v1 = vsel %vm417_vm4, %v412_v58, %v414_v60 }
  0x90   : > { %1345 = vmatmul.mubr.msk.bf16.vlgmr.msra.gmra.mrb[0].mxu0 %vm203_vm3, %v1343_v53  ;;  %v416_v61 = vpop.permute.xlu1 %415  ;;  %v424_v5 = vsel %vm207_vm1, %v418_v1, 0  ;;  %v1374_v53 = vld [vmem:[%s1701_s1 + $0x10] sm:$0x3] }
  0x91   : > { %311 = vmatpush1.bf16.msra.mxu0 %v302_v59  ;;  %v419_v62 = vsel %vm417_vm4, %v414_v60, %v416_v61  ;;  %342 = vmatprep.mubr.bf16.mxu0 %v1494_v6  ;;  %v430_v2 = vsel %vm207_vm1, %v416_v61, 0 }
  0x92   : > { %1351 = vmatprep.subr.msk.bf16.mxu0 %vm207_vm1, %v419_v62  ;;  %v537_v0 = vpop.permute.xlu0 %536 }
  0x94   : > { %v539_v4 = vpop.permute.xlu1 %538 }
  0x95   : > { %1407 = vmatmul.mubr.msk.bf16.vlgmr.msra.gmra.mrb[4].mxu1 %vm203_vm3, %v174_v63  ;;  %v543_v12 = vsel %vm542_vm5, %v537_v0, %v539_v4 }
  0x96   : > { %1411 = vmatpush3.bf16.msra.mxu1 %v430_v2  ;;  %1412 = vmatprep.mubr.msk.bf16.mxu1 %vm1493_vm0, %v1492_v3  ;;  %v541_v7 = vpop.permute.xlu0 %540  ;;  %v549_v15 = vsel %vm207_vm1, %v543_v12, 0 }
  0x97   : > { %v544_v8 = vsel %vm542_vm5, %v539_v4, %v541_v7  ;;  %1416 = vmatprep.subr.bf16.mxu1 %v1492_v3  ;;  %v555_v13 = vsel %vm207_vm1, %v541_v7, 0 }
  0x98   : > { %1348 = vmatmul.mubr.msk.bf16.vlgmr.msra.gmra.mrb[4].mxu0 %vm203_vm3, %v174_v63  ;;  %v662_v9 = vpop.permute.xlu1 %661 }
  0x99   : > { %433 = vmatpush1.bf16.msra.mxu0 %v424_v5  ;;  %464 = vmatprep.mubr.bf16.mxu0 %v1494_v6 }
  0x9a   : > { %1355 = vmatprep.subr.msk.bf16.mxu0 %vm207_vm1, %v544_v8  ;;  %v664_v11 = vpop.permute.xlu0 %663 }
  0x9b   : > { %v668_v20 = vsel %vm667_vm6, %v662_v9, %v664_v11 }
  0x9c   : > { %v666_v14 = vpop.permute.xlu1 %665  ;;  %v674_v23 = vsel %vm207_vm1, %v668_v20, 0 }
  0x9d   : > { %1413 = vmatmul.mubr.msk.bf16.vlgmr.msra.gmra.mrb[8].mxu1 %vm203_vm3, %v1350_v10  ;;  %v669_v17 = vsel %vm667_vm6, %v664_v11, %v666_v14  ;;  %v680_v21 = vsel %vm207_vm1, %v666_v14, 0 }
  0x9e   : > { %1417 = vmatpush3.bf16.msra.mxu1 %v555_v13  ;;  %1418 = vmatprep.mubr.msk.bf16.mxu1 %vm1493_vm0, %v1492_v3  ;;  %v787_v16 = vpop.permute.xlu0 %786 }
  0x9f   : > { %1422 = vmatprep.subr.bf16.mxu1 %v1492_v3 }
  0xa0   : > { %1352 = vmatmul.mubr.msk.bf16.vlgmr.msra.gmra.mrb[8].mxu0 %vm203_vm3, %v1350_v10  ;;  %v789_v18 = vpop.permute.xlu1 %788 }
  0xa1   : > { %558 = vmatpush1.bf16.msra.mxu0 %v549_v15  ;;  %589 = vmatprep.mubr.bf16.mxu0 %v1494_v6  ;;  %v793_v28 = vsel %vm792_vm7, %v787_v16, %v789_v18 }
  0xa2   : > { %1359 = vmatprep.subr.msk.bf16.mxu0 %vm207_vm1, %v669_v17  ;;  %v791_v22 = vpop.permute.xlu0 %790  ;;  %v799_v31 = vsel %vm207_vm1, %v793_v28, 0 }
  0xa3   : > { %v794_v25 = vsel %vm792_vm7, %v789_v18, %v791_v22  ;;  %v805_v29 = vsel %vm207_vm1, %v791_v22, 0 }
  0xa4   : > { %v912_v24 = vpop.permute.xlu1 %911 }
  0xa5   : > { %1419 = vmatmul.mubr.msk.bf16.vlgmr.msra.gmra.mrb[12].mxu1 %vm203_vm3, %v1354_v19 }
  0xa6   : > { %1423 = vmatpush3.bf16.msra.mxu1 %v680_v21  ;;  %1424 = vmatprep.mubr.msk.bf16.mxu1 %vm1493_vm0, %v1492_v3  ;;  %v914_v26 = vpop.permute.xlu0 %913 }
  0xa7   : > { %1428 = vmatprep.subr.bf16.mxu1 %v1492_v3  ;;  %v918_v36 = vsel %vm917_vm8, %v912_v24, %v914_v26 }
  0xa8   : > { %1356 = vmatmul.mubr.msk.bf16.vlgmr.msra.gmra.mrb[12].mxu0 %vm203_vm3, %v1354_v19  ;;  %v916_v30 = vpop.permute.xlu1 %915  ;;  %v924_v39 = vsel %vm207_vm1, %v918_v36, 0 }
  0xa9   : > { %683 = vmatpush1.bf16.msra.mxu0 %v674_v23  ;;  %714 = vmatprep.mubr.bf16.mxu0 %v1494_v6  ;;  %v919_v33 = vsel %vm917_vm8, %v914_v26, %v916_v30  ;;  %v930_v37 = vsel %vm207_vm1, %v916_v30, 0 }
  0xaa   : > { %1363 = vmatprep.subr.msk.bf16.mxu0 %vm207_vm1, %v794_v25  ;;  %v1037_v32 = vpop.permute.xlu0 %1036 }
  0xac   : > { %v1039_v34 = vpop.permute.xlu1 %1038 }
  0xad   : > { %1425 = vmatmul.mubr.msk.bf16.vlgmr.msra.gmra.mrb[16].mxu1 %vm203_vm3, %v1358_v27  ;;  %v1043_v43 = vsel %vm1042_vm9, %v1037_v32, %v1039_v34 }
  0xae   : > { %1429 = vmatpush3.bf16.msra.mxu1 %v805_v29  ;;  %1430 = vmatprep.mubr.msk.bf16.mxu1 %vm1493_vm0, %v1492_v3  ;;  %v1041_v38 = vpop.permute.xlu0 %1040  ;;  %v1049_v47 = vsel %vm207_vm1, %v1043_v43, 0 }
  0xaf   : > { %1434 = vmatprep.subr.bf16.mxu1 %v1492_v3  ;;  %v1044_v41 = vsel %vm1042_vm9, %v1039_v34, %v1041_v38  ;;  %v1055_v44 = vsel %vm207_vm1, %v1041_v38, 0 }
  0xb0   : > { %1360 = vmatmul.mubr.msk.bf16.vlgmr.msra.gmra.mrb[16].mxu0 %vm203_vm3, %v1358_v27  ;;  %v1162_v40 = vpop.permute.xlu1 %1161 }
  0xb1   : > { %808 = vmatpush1.bf16.msra.mxu0 %v799_v31  ;;  %839 = vmatprep.mubr.bf16.mxu0 %v1494_v6 }
  0xb2   : > { %1367 = vmatprep.subr.msk.bf16.mxu0 %vm207_vm1, %v919_v33  ;;  %v1164_v45 = vpop.permute.xlu0 %1163 }
  0xb3   : > { %v1168_v50 = vsel %vm1167_vm10, %v1162_v40, %v1164_v45 }
  0xb4   : > { %v1166_v46 = vpop.permute.xlu1 %1165  ;;  %v1174_v52 = vsel %vm207_vm1, %v1168_v50, 0 }
  0xb5   : > { %1431 = vmatmul.mubr.msk.bf16.vlgmr.msra.gmra.mrb[20].mxu1 %vm203_vm3, %v1362_v35  ;;  %v1169_v48 = vsel %vm1167_vm10, %v1164_v45, %v1166_v46  ;;  %v1180_v51 = vsel %vm207_vm1, %v1166_v46, 0 }
  0xb6   : > { %1435 = vmatpush3.bf16.msra.mxu1 %v930_v37  ;;  %1436 = vmatprep.mubr.msk.bf16.mxu1 %vm1493_vm0, %v1492_v3 }
  0xb7   : > { %1440 = vmatprep.subr.bf16.mxu1 %v1492_v3 }
  0xb8   : > { %1364 = vmatmul.mubr.msk.bf16.vlgmr.msra.gmra.mrb[20].mxu0 %vm203_vm3, %v1362_v35 }
  0xb9   : > { %933 = vmatpush1.bf16.msra.mxu0 %v924_v39  ;;  %964 = vmatprep.mubr.bf16.mxu0 %v1494_v6 }
  0xba   : > { %1371 = vmatprep.subr.msk.bf16.mxu0 %vm207_vm1, %v1044_v41 }
  0xbd   : > { %1437 = vmatmul.mubr.msk.bf16.vlgmr.msra.gmra.mrb[24].mxu1 %vm203_vm3, %v1366_v42 }
  0xbe   : > { %1441 = vmatpush3.bf16.msra.mxu1 %v1055_v44  ;;  %1442 = vmatprep.mubr.msk.bf16.mxu1 %vm1493_vm0, %v1492_v3 }
  0xbf   : > { %1446 = vmatprep.subr.bf16.mxu1 %v1492_v3 }
  0xc0   : > { %1368 = vmatmul.mubr.msk.bf16.vlgmr.msra.gmra.mrb[24].mxu0 %vm203_vm3, %v1366_v42 }
  0xc1   : > { %1058 = vmatpush1.bf16.msra.mxu0 %v1049_v47  ;;  %1089 = vmatprep.mubr.bf16.mxu0 %v1494_v6 }
  0xc2   : > { %1375 = vmatprep.subr.msk.bf16.mxu0 %vm207_vm1, %v1169_v48 }
  0xc5   : > { %1443 = vmatmul.mubr.msk.bf16.vlgmr.msra.gmra.mrb[28].mxu1 %vm203_vm3, %v1370_v49 }
  0xc6   : > { %1447 = vmatpush3.bf16.msra.mxu1 %v1180_v51  ;;  %1448 = vmatprep.mubr.msk.bf16.mxu1 %vm1493_vm0, %v1492_v3 }
  0xc8   : > { %1372 = vmatmul.mubr.msk.bf16.vlgmr.msra.gmra.mrb[28].mxu0 %vm203_vm3, %v1370_v49 }
  0xc9   : > { %1183 = vmatpush1.bf16.msra.mxu0 %v1174_v52  ;;  %1214 = vmatprep.mubr.bf16.mxu0 %v1494_v6 }
  0xcd   : > { %1449 = vmatmul.mubr.msk.bf16.vlgmr.msra.gmra.mrb[32].mxu1 %vm203_vm3, %v1374_v53 }
  0xd0   : > { %1376 = vmatmul.mubr.msk.bf16.vlgmr.msra.gmra.mrb[32].mxu0 %vm203_vm3, %v1374_v53 }
 0x160   : > { %v292_v54 = vpop.f32.mrb[0].mxu1 }
 0x161   : > { %v1402_v55 = vpop.f32.mrb[1].mxu1 }
 0x162   : > { %v295_v56 = vpop.f32.mrb[2].mxu1 }
 0x163   : > { %v251_v57 = vpop.f32.mrb[0].mxu0  ;;  %v1403_v58 = vpop.f32.mrb[3].mxu1 }
 0x164   : > { %v253_v59 = vpop.f32.mrb[1].mxu0 }
 0x165   : > { %v255_v3 = vpop.f32.mrb[2].mxu0 }
 0x166   : > { %v256_v60 = vpop.f32.mrb[3].mxu0 }
 0x168   : > { %v385_v61 = vpop.f32.mrb[4].mxu1 }
 0x169   : > { %v386_v62 = vadd.f32 %v385_v61, %v292_v54  ;;  %v1408_v63 = vpop.f32.mrb[5].mxu1 }
 0x16a   : > { %v388_v6 = vpop.f32.mrb[6].mxu1 }
 0x16b   : > { %v344_v0 = vpop.f32.mrb[4].mxu0  ;;  %v1409_v1 = vpop.f32.mrb[7].mxu1 }
 0x16c   : > { %v345_v2 = vadd.f32 %v344_v0, %v251_v57  ;;  %v346_v4 = vpop.f32.mrb[5].mxu0 }
 0x16d   : > { %v347_v5 = vadd.f32 %v346_v4, %v253_v59  ;;  %v348_v7 = vpop.f32.mrb[6].mxu0 }
 0x16e   : > { %v349_v8 = vpop.f32.mrb[7].mxu0 }
 0x170   : > { %v507_v9 = vpop.f32.mrb[8].mxu1 }
 0x171   : > { %v515_v10 = vadd.f32 %v507_v9, %v386_v62  ;;  %v1414_v11 = vpop.f32.mrb[9].mxu1 }
 0x172   : > { %v510_v12 = vpop.f32.mrb[10].mxu1 }
 0x173   : > { %v466_v13 = vpop.f32.mrb[8].mxu0  ;;  %v1415_v14 = vpop.f32.mrb[11].mxu1 }
 0x174   : > { %v513_v15 = vadd.f32 %v466_v13, %v345_v2  ;;  %v468_v16 = vpop.f32.mrb[9].mxu0  ;;  %v1269_v12 = vpop.permute.xlu0 %1268 }
 0x175   : > { %v514_v17 = vadd.f32 %v468_v16, %v347_v5  ;;  %v470_v18 = vpop.f32.mrb[10].mxu0 }
 0x176   : > { %v471_v19 = vpop.f32.mrb[11].mxu0 }
 0x178   : > { %v632_v20 = vpop.f32.mrb[12].mxu1 }
 0x179   : > { %v640_v21 = vadd.f32 %v632_v20, %v515_v10  ;;  %v1420_v22 = vpop.f32.mrb[13].mxu1 }
 0x17a   : > { %v635_v23 = vpop.f32.mrb[14].mxu1 }
 0x17b   : > { %v591_v24 = vpop.f32.mrb[12].mxu0  ;;  %v1421_v25 = vpop.f32.mrb[15].mxu1 }
 0x17c   : > { %v638_v26 = vadd.f32 %v591_v24, %v513_v15  ;;  %v593_v27 = vpop.f32.mrb[13].mxu0 }
 0x17d   : > { %v639_v28 = vadd.f32 %v593_v27, %v514_v17  ;;  %v595_v29 = vpop.f32.mrb[14].mxu0 }
 0x17e   : > { %v596_v30 = vpop.f32.mrb[15].mxu0 }
 0x180   : > { %v757_v31 = vpop.f32.mrb[16].mxu1 }
 0x181   : > { %v765_v32 = vadd.f32 %v757_v31, %v640_v21  ;;  %v1426_v33 = vpop.f32.mrb[17].mxu1 }
 0x182   : > { %v760_v34 = vpop.f32.mrb[18].mxu1 }
 0x183   : > { %v716_v35 = vpop.f32.mrb[16].mxu0  ;;  %v1427_v36 = vpop.f32.mrb[19].mxu1 }
 0x184   : > { %v763_v37 = vadd.f32 %v716_v35, %v638_v26  ;;  %v718_v38 = vpop.f32.mrb[17].mxu0 }
 0x185   : > { %v764_v39 = vadd.f32 %v718_v38, %v639_v28  ;;  %v720_v40 = vpop.f32.mrb[18].mxu0 }
 0x186   : > { %v721_v41 = vpop.f32.mrb[19].mxu0 }
 0x188   : > { %v882_v42 = vpop.f32.mrb[20].mxu1 }
 0x189   : > { %v890_v43 = vadd.f32 %v882_v42, %v765_v32  ;;  %v1432_v44 = vpop.f32.mrb[21].mxu1 }
 0x18a   : > { %v885_v45 = vpop.f32.mrb[22].mxu1 }
 0x18b   : > { %v841_v46 = vpop.f32.mrb[20].mxu0  ;;  %v1433_v47 = vpop.f32.mrb[23].mxu1 }
 0x18c   : > { %v888_v48 = vadd.f32 %v841_v46, %v763_v37  ;;  %v843_v49 = vpop.f32.mrb[21].mxu0 }
 0x18d   : > { %v889_v50 = vadd.f32 %v843_v49, %v764_v39  ;;  %v845_v51 = vpop.f32.mrb[22].mxu0 }
 0x18e   : > { %v846_v52 = vpop.f32.mrb[23].mxu0 }
 0x190   : > { %v1007_v53 = vpop.f32.mrb[24].mxu1 }
 0x191   : > { %v1015_v54 = vadd.f32 %v1007_v53, %v890_v43  ;;  %v1438_v55 = vpop.f32.mrb[25].mxu1 }
 0x192   : > { %v1010_v56 = vpop.f32.mrb[26].mxu1 }
 0x193   : > { %v966_v57 = vpop.f32.mrb[24].mxu0  ;;  %v1439_v58 = vpop.f32.mrb[27].mxu1 }
 0x194   : > { %v1013_v59 = vadd.f32 %v966_v57, %v888_v48  ;;  %v968_v3 = vpop.f32.mrb[25].mxu0 }
 0x195   : > { %v1014_v60 = vadd.f32 %v968_v3, %v889_v50  ;;  %v970_v61 = vpop.f32.mrb[26].mxu0 }
 0x196   : > { %v971_v62 = vpop.f32.mrb[27].mxu0 }
 0x198   : > { %v1132_v63 = vpop.f32.mrb[28].mxu1 }
 0x199   : > { %v1140_v6 = vadd.f32 %v1132_v63, %v1015_v54  ;;  %v1444_v0 = vpop.f32.mrb[29].mxu1 }
 0x19a   : > { %v1135_v1 = vpop.f32.mrb[30].mxu1 }
 0x19b   : > { %v1091_v2 = vpop.f32.mrb[28].mxu0  ;;  %v1445_v4 = vpop.f32.mrb[31].mxu1 }
 0x19c   : > { %v1138_v5 = vadd.f32 %v1091_v2, %v1013_v59  ;;  %v1093_v7 = vpop.f32.mrb[29].mxu0 }
 0x19d   : > { %v1139_v8 = vadd.f32 %v1093_v7, %v1014_v60  ;;  %v1095_v9 = vpop.f32.mrb[30].mxu0 }
 0x19e   : > { %v1096_v10 = vpop.f32.mrb[31].mxu0 }
 0x1a0   : > { %v1257_v11 = vpop.f32.mrb[32].mxu1 }
 0x1a1   : > { %v1265_v13 = vadd.f32 %v1257_v11, %v1140_v6  ;;  %v1450_v14 = vpop.f32.mrb[33].mxu1 }
 0x1a2   : > { %v1260_v15 = vpop.f32.mrb[34].mxu1 }
 0x1a3   : > { %v1273_v16 = vadd.f32 %v1269_v12, %v1265_v13  ;;  %v1216_v17 = vpop.f32.mrb[32].mxu0  ;;  %v1451_v18 = vpop.f32.mrb[35].mxu1 }
 0x1a4   : > { %v1263_v19 = vadd.f32 %v1216_v17, %v1138_v5  ;;  %v1218_v20 = vpop.f32.mrb[33].mxu0 }
 0x1a5   : > { %1280 = vst.msk [vmem:[%s170_s24 + $0x8] sm:$0x7] %vm1279_vm11, %v1273_v16  ;;  %v1264_v21 = vadd.f32 %v1218_v20, %v1139_v8  ;;  %v1220_v22 = vpop.f32.mrb[34].mxu0 }
 0x1a6   : > { %v1271_v23 = vadd.f32 %v1269_v12, %v1263_v19  ;;  %v1221_v24 = vpop.f32.mrb[35].mxu0 }
 0x1a7   : > { %v1272_v25 = vadd.f32 %v1269_v12, %v1264_v21 }
 0x1a9   : > { %v1276_v26 = vcombine.low %v1271_v23, %v1272_v25 }
 0x1ab   : > { %1278 = vst [vmem:[%s170_s24] sm:$0x77] %v1276_v26 }
 0x1ac PF: > { %s13_s12 = sadd.s32 1, %s1489_s12  }
 0x1ad   : > { %p10_p4 = scmp.ge.s32.totalorder %s13_s12, 4  }
 0x1af   :  { %12 = sbr.rel (!%p10_p4) target bundleno = 1 (0x1), region = 70 }

</bundles_post_ra>
